<compile_context>
chip_gen: v7x
topology: tpu7x:2x2x1
jax: 0.10.0
libtpu: 0.0.40
codegen_flags: <defaults>
</compile_context>

<pallas_src>
import functools

import jax
import jax.numpy as jnp
from jax import lax
from jax.experimental import pallas as pl
from jax.experimental.pallas import tpu as pltpu

N_OPS = 5  # [skip, conv3x3, conv1x1, avg_pool3x3, max_pool3x3]


def _mixed_op_kernel(gate_ref, x_ref, w3_hbm, w1_hbm, o_ref,
                     xpad_ref, w3_ref, w1_ref, w_sem, *,
                     conv_dtype, use_im2col):
    """One batch element per grid step.

    gate_ref: (N_OPS,) int32 in SMEM — binary gate (1 for sampled ops).
    x_ref:    (1, H, W, C) unpadded input block (NHWC, f32).
    w3_hbm:   (9*C, C) conv3x3 weight in HBM (rows ordered (dy, dx, c_in)).
    w1_hbm:   (C, C)   conv1x1 weight in HBM.
    o_ref:    (1, H, W, C) output block (doubles as the accumulator).
    xpad_ref: (H+2, W+2, C) f32 VMEM scratch, zero halo (persistent).
    w3_ref / w1_ref: persistent VMEM weight scratch (conv_dtype).
    w_sem:    DMA semaphores for the one-time weight fetch.
    """
    H, W, C = o_ref.shape[1], o_ref.shape[2], o_ref.shape[3]
    first = pl.program_id(0) == 0

    # --- one-time weight fetch, skipped entirely when the op is unsampled ----
    @pl.when(jnp.logical_and(first, gate_ref[1] != 0))
    def _fetch_w3():
        cp = pltpu.make_async_copy(w3_hbm, w3_ref, w_sem.at[0])
        cp.start()
        cp.wait()

    @pl.when(jnp.logical_and(first, gate_ref[2] != 0))
    def _fetch_w1():
        cp = pltpu.make_async_copy(w1_hbm, w1_ref, w_sem.at[1])
        cp.start()
        cp.wait()

    x = x_ref[0]                                   # (H, W, C) f32

    # --- fused zero-init + op 0 (skip_connect): one unconditional first store
    @pl.when(gate_ref[0] != 0)
    def _init_skip():
        o_ref[0] = x

    @pl.when(gate_ref[0] == 0)
    def _init_zero():
        o_ref[0] = jnp.zeros_like(x)

    # --- op 2: conv 1x1, no bias (single MXU dot) ----------------------------
    @pl.when(gate_ref[2] != 0)
    def _conv1x1():
        y = jnp.dot(x.reshape(H * W, C).astype(conv_dtype), w1_ref[...],
                    preferred_element_type=jnp.float32)
        o_ref[0] = o_ref[0] + y.reshape(H, W, C)

    # --- ops 1 / 3 / 4 all need the 1-pixel zero halo -------------------------
    need_halo = ((gate_ref[1] != 0) | (gate_ref[3] != 0) | (gate_ref[4] != 0))

    @pl.when(need_halo)
    def _halo_ops():
        # Zero the halo scratch only once; the border is never overwritten and
        # the scratch persists across grid steps (batch axis is "arbitrary").
        @pl.when(first)
        def _zero_halo():
            xpad_ref[...] = jnp.zeros_like(xpad_ref)

        xpad_ref[1:H + 1, 1:W + 1, :] = x

        # Three aligned row slices (axis-0 slicing: no sublane shift); dx
        # shifts below reuse these values instead of 9 misaligned tap loads.
        r0 = xpad_ref[0:H, :, :]                   # (H, W+2, C)
        r1 = xpad_ref[1:H + 1, :, :]
        r2 = xpad_ref[2:H + 2, :, :]
        rows = (r0, r1, r2)

        # --- op 1: conv 3x3, stride 1, pad 1, no bias -------------------------
        @pl.when(gate_ref[1] != 0)
        def _conv3x3():
            if use_im2col:
                # Small C: one (HW, 9C) @ (9C, C) dot keeps the MXU K filled.
                # Taps are cast to conv_dtype *before* the lane concat.
                cols = jnp.concatenate(
                    [rows[dy][:, dx:dx + W, :].reshape(H * W, C).astype(conv_dtype)
                     for dy in range(3) for dx in range(3)], axis=1)
                y = jnp.dot(cols, w3_ref[...], preferred_element_type=jnp.float32)
            else:
                # Large C: 9 accumulated K=C dots, no (HW, 9C) cols buffer.
                y = jnp.zeros((H * W, C), jnp.float32)
                for dy in range(3):
                    for dx in range(3):
                        k = dy * 3 + dx
                        tap = rows[dy][:, dx:dx + W, :].reshape(H * W, C)
                        y = y + jnp.dot(tap.astype(conv_dtype),
                                        w3_ref[k * C:(k + 1) * C, :],
                                        preferred_element_type=jnp.float32)
            o_ref[0] = o_ref[0] + y.reshape(H, W, C)

        # --- op 3: avg_pool 3x3, pad 1 (count_include_pad -> /9), separable ---
        @pl.when(gate_ref[3] != 0)
        def _avg_pool():
            sh = r0 + r1 + r2                                     # (H, W+2, C)
            s = sh[:, 0:W, :] + sh[:, 1:W + 1, :] + sh[:, 2:W + 2, :]
            o_ref[0] = o_ref[0] + s * (1.0 / 9.0)

        # --- op 4: max_pool 3x3, pad 1 (separable, masked zero halo) ----------
        @pl.when(gate_ref[4] != 0)
        def _max_pool():
            big_neg = float(jnp.finfo(jnp.float32).min)
            row = lax.broadcasted_iota(jnp.int32, (H, W + 2, C), 0)
            col = lax.broadcasted_iota(jnp.int32, (H, W, C), 1)
            # H reduction with row-validity mask (excludes the zero halo rows).
            mh = jnp.maximum(jnp.where(row >= 1, r0, big_neg), r1)
            mh = jnp.maximum(mh, jnp.where(row <= H - 2, r2, big_neg))
            # W reduction with column-validity mask.
            m = jnp.maximum(jnp.where(col >= 1, mh[:, 0:W, :], big_neg),
                            mh[:, 1:W + 1, :])
            m = jnp.maximum(m, jnp.where(col <= W - 2, mh[:, 2:W + 2, :], big_neg))
            o_ref[0] = o_ref[0] + m


def _vmem_limit_bytes(H, W, C, conv_itemsize, use_im2col):
    f32 = 4
    blk = H * W * C * f32
    xpad = (H + 2) * (W + 2) * C * f32
    w3 = 9 * C * C * conv_itemsize
    w1 = C * C * conv_itemsize
    cols = H * W * 9 * C * conv_itemsize if use_im2col else 0
    # double-buffered x/out blocks + persistent scratch + live temporaries
    est = 2 * blk + 2 * blk + xpad + w3 + w1 + cols \
        + 6 * blk + 3 * H * (W + 2) * C * f32
    return int(min(max(32 * 1024 * 1024, 2 * est), 96 * 1024 * 1024))


@jax.jit
def _mixed_op_call(x_nhwc, gate, w3_mat, w1_mat):
    N, H, W, C = x_nhwc.shape
    conv_dtype = jnp.dtype(w3_mat.dtype)
    use_im2col = C < 128
    kernel = functools.partial(_mixed_op_kernel,
                               conv_dtype=conv_dtype, use_im2col=use_im2col)
    return pl.pallas_call(
        kernel,
        out_shape=jax.ShapeDtypeStruct((N, H, W, C), jnp.float32),
        grid=(N,),
        in_specs=[
            pl.BlockSpec(memory_space=pltpu.MemorySpace.SMEM),     # gate
            pl.BlockSpec((1, H, W, C), lambda n: (n, 0, 0, 0)),    # x (unpadded)
            pl.BlockSpec(memory_space=pl.ANY),                     # conv3x3 W (HBM)
            pl.BlockSpec(memory_space=pl.ANY),                     # conv1x1 W (HBM)
        ],
        out_specs=pl.BlockSpec((1, H, W, C), lambda n: (n, 0, 0, 0)),
        scratch_shapes=[
            pltpu.VMEM((H + 2, W + 2, C), jnp.float32),            # halo scratch
            pltpu.VMEM((9 * C, C), conv_dtype),                    # w3 (persistent)
            pltpu.VMEM((C, C), conv_dtype),                        # w1 (persistent)
            pltpu.SemaphoreType.DMA((2,)),
        ],
        compiler_params=pltpu.CompilerParams(
            # "arbitrary": the init-at-step-0 persistent-scratch pattern
            # (halo border + on-demand weight fetch) requires a single core to
            # walk the whole batch axis.  TODO(synk): H-tiled parallel axis.
            dimension_semantics=("arbitrary",),
            vmem_limit_bytes=_vmem_limit_bytes(
                H, W, C, conv_dtype.itemsize, use_im2col)),
    )(gate, x_nhwc, w3_mat, w1_mat)


def bin_gate_mixed_op_forward(x_list, gate, w3_hwio, w1):
    """BinGateMixedOp.forward for in_deg == 1 (x is a list with one NCHW tensor)."""
    assert len(x_list) == 1
    x_nchw = x_list[0]
    c_in = x_nchw.shape[1]
    x_nhwc = jnp.transpose(x_nchw, (0, 2, 3, 1)).astype(jnp.float32)
    # bf16 MXU operands (f32 accumulation) once K=9C comfortably exceeds the
    # 128-wide v5e MXU; tiny channel counts stay f32 (tighter vs. reference).
    conv_dtype = jnp.bfloat16 if c_in >= 32 else jnp.float32
    # HWIO (3,3,Cin,Cout) -> (9*Cin, Cout); row order (dy, dx, cin) matches the
    # in-kernel tap order.  Cast host-side so the one-time weight DMA is small.
    w3_mat = w3_hwio.reshape(9 * c_in, c_in).astype(conv_dtype)
    w1_mat = w1.astype(conv_dtype)
    out_nhwc = _mixed_op_call(x_nhwc, gate, w3_mat, w1_mat)
    return jnp.transpose(out_nhwc, (0, 3, 1, 2))


def _reference(x_nchw, sampled, w3_hwio, w1):
    """Pure-JAX reference: sum of the sampled candidate ops (for verification)."""
    x = jnp.transpose(x_nchw, (0, 2, 3, 1)).astype(jnp.float32)
    skip = x
    conv3 = lax.conv_general_dilated(
        x, w3_hwio, window_strides=(1, 1), padding="SAME",
        dimension_numbers=("NHWC", "HWIO", "NHWC"))
    conv1 = jnp.einsum("nhwc,cd->nhwd", x, w1)
    ap = lax.reduce_window(x, 0.0, lax.add, (1, 3, 3, 1), (1, 1, 1, 1),
                           "SAME") / 9.0
    mp = lax.reduce_window(x, -jnp.inf, lax.max, (1, 3, 3, 1), (1, 1, 1, 1),
                           "SAME")
    ops = [skip, conv3, conv1, ap, mp]
    out = sum(ops[int(i)] for i in sampled)
    return jnp.transpose(out, (0, 3, 1, 2))


if __name__ == "__main__":
    key = jax.random.PRNGKey(0)
    k_alpha, k_x, k_w3, k_w1, k_smp = jax.random.split(key, 5)

    # Shapes implied by the module: chn_in == chn_out, stride 1, n_ops candidates.
    N, C, H, W = 2, 16, 16, 16
    n_samples = 2   # config.samples

    alpha = 0.001 * jax.random.normal(k_alpha, (N_OPS,), jnp.float32)  # arch param
    w3 = 0.1 * jax.random.normal(k_w3, (3, 3, C, C), jnp.float32)      # HWIO
    w1 = 0.1 * jax.random.normal(k_w1, (C, C), jnp.float32)
    x = jax.random.normal(k_x, (N, C, H, W), jnp.float32)

    # param_forward / sample_ops: softmax over the arch param, sample n_samples
    # paths without replacement, build the binary gate over candidate ops.
    w_path = jax.nn.softmax(alpha)
    s_path = jax.random.choice(k_smp, N_OPS, (n_samples,), replace=False, p=w_path)
    gate = jnp.zeros((N_OPS,), jnp.int32).at[s_path].set(1)

    out = jax.block_until_ready(bin_gate_mixed_op_forward([x], gate, w3, w1))

    sampled = [int(i) for i in jax.device_get(s_path)]
    ref = jax.block_until_ready(_reference(x, sampled, w3, w1))
    assert out.shape == (N, C, H, W)
    err = float(jnp.max(jnp.abs(out - ref)))
    assert jnp.allclose(out, ref, atol=2e-3, rtol=2e-3), f"max abs err {err}"

    print("KERNEL_OK")
</pallas_src>

<mosaic_0001>
module attributes {stable_mosaic.version = 11 : i64} {
  func.func @_mixed_op_kernel(%arg0: i32, %arg1: memref<5xi32, #tpu.memory_space<smem>>, %arg2: memref<1x16x16x16xf32, #tpu.memory_space<vmem>>, %arg3: memref<144x16xf32, #tpu.memory_space<any>>, %arg4: memref<16x16xf32, #tpu.memory_space<any>>, %arg5: memref<1x16x16x16xf32, #tpu.memory_space<vmem>>, %arg6: memref<18x18x16xf32, #tpu.memory_space<vmem>>, %arg7: memref<144x16xf32, #tpu.memory_space<vmem>>, %arg8: memref<16x16xf32, #tpu.memory_space<vmem>>, %arg9: memref<2x!tpu.dma_semaphore, #tpu.memory_space<semaphore_mem>>) attributes {dimension_semantics = [#tpu.dimension_semantics<arbitrary>], iteration_bounds = array<i64: 2>, scalar_prefetch = 0 : i64, scratch_operands = 4 : i64, tpu.core_type = #tpu.core_type<tc>, window_params = [{transform_indices = @transform_0, window_bounds = array<i64: 5>}, {transform_indices = @transform_1, window_bounds = array<i64: 1, 16, 16, 16>}, {}, {}, {transform_indices = @transform_4, window_bounds = array<i64: 1, 16, 16, 16>}]} {
    %c0_i32 = arith.constant 0 : i32
    %0 = arith.cmpi eq, %arg0, %c0_i32 : i32
    %c1 = arith.constant 1 : index
    %1 = memref.load %arg1[%c1] : memref<5xi32, #tpu.memory_space<smem>>
    %c0_i32_0 = arith.constant 0 : i32
    %2 = arith.cmpi ne, %1, %c0_i32_0 : i32
    %3 = arith.andi %0, %2 : i1
    %4 = arith.extui %3 : i1 to i32
    %c0_i32_1 = arith.constant 0 : i32
    %5 = arith.cmpi ne, %4, %c0_i32_1 : i32
    scf.if %5 {
      %c0_i32_21 = arith.constant 0 : i32
      %35 = tpu.memref_slice %arg9[%c0_i32_21] : memref<2x!tpu.dma_semaphore, #tpu.memory_space<semaphore_mem>> -> memref<1x!tpu.dma_semaphore, #tpu.memory_space<semaphore_mem>>
      %36 = tpu.memref_squeeze %35 : memref<1x!tpu.dma_semaphore, #tpu.memory_space<semaphore_mem>> -> memref<!tpu.dma_semaphore, #tpu.memory_space<semaphore_mem>>
      tpu.enqueue_dma source(%arg3 : memref<144x16xf32, #tpu.memory_space<any>>) target(%arg7 : memref<144x16xf32, #tpu.memory_space<vmem>>) target_semaphore(%36 : memref<!tpu.dma_semaphore, #tpu.memory_space<semaphore_mem>>)
      %c0_i32_22 = arith.constant 0 : i32
      %37 = tpu.memref_slice %arg9[%c0_i32_22] : memref<2x!tpu.dma_semaphore, #tpu.memory_space<semaphore_mem>> -> memref<1x!tpu.dma_semaphore, #tpu.memory_space<semaphore_mem>>
      %38 = tpu.memref_squeeze %37 : memref<1x!tpu.dma_semaphore, #tpu.memory_space<semaphore_mem>> -> memref<!tpu.dma_semaphore, #tpu.memory_space<semaphore_mem>>
      tpu.wait_dma2 semaphore(%38 : memref<!tpu.dma_semaphore, #tpu.memory_space<semaphore_mem>>) src(%arg3 : memref<144x16xf32, #tpu.memory_space<any>>) dst(%arg7 : memref<144x16xf32, #tpu.memory_space<vmem>>)
    } else {
    }
    %c2 = arith.constant 2 : index
    %6 = memref.load %arg1[%c2] : memref<5xi32, #tpu.memory_space<smem>>
    %c0_i32_2 = arith.constant 0 : i32
    %7 = arith.cmpi ne, %6, %c0_i32_2 : i32
    %8 = arith.andi %0, %7 : i1
    %9 = arith.extui %8 : i1 to i32
    %c0_i32_3 = arith.constant 0 : i32
    %10 = arith.cmpi ne, %9, %c0_i32_3 : i32
    scf.if %10 {
      %c1_i32 = arith.constant 1 : i32
      %35 = tpu.memref_slice %arg9[%c1_i32] : memref<2x!tpu.dma_semaphore, #tpu.memory_space<semaphore_mem>> -> memref<1x!tpu.dma_semaphore, #tpu.memory_space<semaphore_mem>>
      %36 = tpu.memref_squeeze %35 : memref<1x!tpu.dma_semaphore, #tpu.memory_space<semaphore_mem>> -> memref<!tpu.dma_semaphore, #tpu.memory_space<semaphore_mem>>
      tpu.enqueue_dma source(%arg4 : memref<16x16xf32, #tpu.memory_space<any>>) target(%arg8 : memref<16x16xf32, #tpu.memory_space<vmem>>) target_semaphore(%36 : memref<!tpu.dma_semaphore, #tpu.memory_space<semaphore_mem>>)
      %c1_i32_21 = arith.constant 1 : i32
      %37 = tpu.memref_slice %arg9[%c1_i32_21] : memref<2x!tpu.dma_semaphore, #tpu.memory_space<semaphore_mem>> -> memref<1x!tpu.dma_semaphore, #tpu.memory_space<semaphore_mem>>
      %38 = tpu.memref_squeeze %37 : memref<1x!tpu.dma_semaphore, #tpu.memory_space<semaphore_mem>> -> memref<!tpu.dma_semaphore, #tpu.memory_space<semaphore_mem>>
      tpu.wait_dma2 semaphore(%38 : memref<!tpu.dma_semaphore, #tpu.memory_space<semaphore_mem>>) src(%arg4 : memref<16x16xf32, #tpu.memory_space<any>>) dst(%arg8 : memref<16x16xf32, #tpu.memory_space<vmem>>)
    } else {
    }
    %c0 = arith.constant 0 : index
    %c0_4 = arith.constant 0 : index
    %c0_5 = arith.constant 0 : index
    %c0_6 = arith.constant 0 : index
    %11 = vector.load %arg2[%c0, %c0_4, %c0_5, %c0_6] : memref<1x16x16x16xf32, #tpu.memory_space<vmem>>, vector<1x16x16x16xf32>
    %12 = vector.shape_cast %11 : vector<1x16x16x16xf32> to vector<16x16x16xf32>
    %c0_7 = arith.constant 0 : index
    %13 = memref.load %arg1[%c0_7] : memref<5xi32, #tpu.memory_space<smem>>
    %c0_i32_8 = arith.constant 0 : i32
    %14 = arith.cmpi ne, %13, %c0_i32_8 : i32
    %15 = arith.extui %14 : i1 to i32
    %c0_i32_9 = arith.constant 0 : i32
    %16 = arith.cmpi ne, %15, %c0_i32_9 : i32
    scf.if %16 {
      %c0_21 = arith.constant 0 : index
      %c0_22 = arith.constant 0 : index
      %c0_23 = arith.constant 0 : index
      %c0_24 = arith.constant 0 : index
      %35 = vector.load %arg5[%c0_21, %c0_22, %c0_23, %c0_24] : memref<1x16x16x16xf32, #tpu.memory_space<vmem>>, vector<1x16x16x16xf32>
      %36 = vector.shape_cast %35 : vector<1x16x16x16xf32> to vector<16x16x16xf32>
      %37 = vector.shape_cast %12 : vector<16x16x16xf32> to vector<1x16x16x16xf32>
      tpu.vector_store %arg5[%c0_21, %c0_22, %c0_23, %c0_24], %37 {strides = array<i32>} : memref<1x16x16x16xf32, #tpu.memory_space<vmem>>, vector<1x16x16x16xf32>,
    } else {
    }
    %c0_10 = arith.constant 0 : index
    %17 = memref.load %arg1[%c0_10] : memref<5xi32, #tpu.memory_space<smem>>
    %c0_i32_11 = arith.constant 0 : i32
    %18 = arith.cmpi eq, %17, %c0_i32_11 : i32
    %19 = arith.extui %18 : i1 to i32
    %c0_i32_12 = arith.constant 0 : i32
    %20 = arith.cmpi ne, %19, %c0_i32_12 : i32
    scf.if %20 {
      %cst = arith.constant 0.000000e+00 : f32
      %35 = vector.broadcast %cst : f32 to vector<16x16x16xf32>
      %c0_21 = arith.constant 0 : index
      %c0_22 = arith.constant 0 : index
      %c0_23 = arith.constant 0 : index
      %c0_24 = arith.constant 0 : index
      %36 = vector.load %arg5[%c0_21, %c0_22, %c0_23, %c0_24] : memref<1x16x16x16xf32, #tpu.memory_space<vmem>>, vector<1x16x16x16xf32>
      %37 = vector.shape_cast %36 : vector<1x16x16x16xf32> to vector<16x16x16xf32>
      %38 = vector.shape_cast %35 : vector<16x16x16xf32> to vector<1x16x16x16xf32>
      tpu.vector_store %arg5[%c0_21, %c0_22, %c0_23, %c0_24], %38 {strides = array<i32>} : memref<1x16x16x16xf32, #tpu.memory_space<vmem>>, vector<1x16x16x16xf32>,
    } else {
    }
    %c2_13 = arith.constant 2 : index
    %21 = memref.load %arg1[%c2_13] : memref<5xi32, #tpu.memory_space<smem>>
    %c0_i32_14 = arith.constant 0 : i32
    %22 = arith.cmpi ne, %21, %c0_i32_14 : i32
    %23 = arith.extui %22 : i1 to i32
    %c0_i32_15 = arith.constant 0 : i32
    %24 = arith.cmpi ne, %23, %c0_i32_15 : i32
    scf.if %24 {
      %35 = vector.shape_cast %12 : vector<16x16x16xf32> to vector<256x16xf32>
      %c0_21 = arith.constant 0 : index
      %c0_22 = arith.constant 0 : index
      %36 = vector.load %arg8[%c0_21, %c0_22] : memref<16x16xf32, #tpu.memory_space<vmem>>, vector<16x16xf32>
      %cst = arith.constant dense<0.000000e+00> : vector<256x16xf32>
      %37 = tpu.matmul %35, %36, %cst {dimension_numbers = #tpu.dot_dimension_numbers<[1], [0], [0], [1], [0, 0, 1, 1], [], []>} : vector<256x16xf32>, vector<16x16xf32>, vector<256x16xf32> -> vector<256x16xf32>
      %c0_23 = arith.constant 0 : index
      %c0_24 = arith.constant 0 : index
      %c0_25 = arith.constant 0 : index
      %c0_26 = arith.constant 0 : index
      %38 = vector.load %arg5[%c0_23, %c0_24, %c0_25, %c0_26] : memref<1x16x16x16xf32, #tpu.memory_space<vmem>>, vector<1x16x16x16xf32>
      %39 = vector.shape_cast %38 : vector<1x16x16x16xf32> to vector<16x16x16xf32>
      %40 = vector.shape_cast %37 : vector<256x16xf32> to vector<16x16x16xf32>
      %41 = arith.addf %39, %40 : vector<16x16x16xf32>
      %c0_27 = arith.constant 0 : index
      %c0_28 = arith.constant 0 : index
      %c0_29 = arith.constant 0 : index
      %c0_30 = arith.constant 0 : index
      %42 = vector.load %arg5[%c0_27, %c0_28, %c0_29, %c0_30] : memref<1x16x16x16xf32, #tpu.memory_space<vmem>>, vector<1x16x16x16xf32>
      %43 = vector.shape_cast %42 : vector<1x16x16x16xf32> to vector<16x16x16xf32>
      %44 = vector.shape_cast %41 : vector<16x16x16xf32> to vector<1x16x16x16xf32>
      tpu.vector_store %arg5[%c0_27, %c0_28, %c0_29, %c0_30], %44 {strides = array<i32>} : memref<1x16x16x16xf32, #tpu.memory_space<vmem>>, vector<1x16x16x16xf32>,
    } else {
    }
    %c1_16 = arith.constant 1 : index
    %25 = memref.load %arg1[%c1_16] : memref<5xi32, #tpu.memory_space<smem>>
    %c0_i32_17 = arith.constant 0 : i32
    %26 = arith.cmpi ne, %25, %c0_i32_17 : i32
    %c3 = arith.constant 3 : index
    %27 = memref.load %arg1[%c3] : memref<5xi32, #tpu.memory_space<smem>>
    %c0_i32_18 = arith.constant 0 : i32
    %28 = arith.cmpi ne, %27, %c0_i32_18 : i32
    %29 = arith.ori %26, %28 : i1
    %c4 = arith.constant 4 : index
    %30 = memref.load %arg1[%c4] : memref<5xi32, #tpu.memory_space<smem>>
    %c0_i32_19 = arith.constant 0 : i32
    %31 = arith.cmpi ne, %30, %c0_i32_19 : i32
    %32 = arith.ori %29, %31 : i1
    %33 = arith.extui %32 : i1 to i32
    %c0_i32_20 = arith.constant 0 : i32
    %34 = arith.cmpi ne, %33, %c0_i32_20 : i32
    scf.if %34 {
      %35 = arith.extui %0 : i1 to i32
      %c0_i32_21 = arith.constant 0 : i32
      %36 = arith.cmpi ne, %35, %c0_i32_21 : i32
      scf.if %36 {
        %cst = arith.constant 0.000000e+00 : f32
        %53 = vector.broadcast %cst : f32 to vector<18x18x16xf32>
        %c0_43 = arith.constant 0 : index
        %c0_44 = arith.constant 0 : index
        %c0_45 = arith.constant 0 : index
        %54 = vector.load %arg6[%c0_43, %c0_44, %c0_45] : memref<18x18x16xf32, #tpu.memory_space<vmem>>, vector<18x18x16xf32>
        tpu.vector_store %arg6[%c0_43, %c0_44, %c0_45], %53 {strides = array<i32>} : memref<18x18x16xf32, #tpu.memory_space<vmem>>, vector<18x18x16xf32>,
      } else {
      }
      %c1_22 = arith.constant 1 : index
      %c1_23 = arith.constant 1 : index
      %c0_24 = arith.constant 0 : index
      %37 = vector.load %arg6[%c1_22, %c1_23, %c0_24] : memref<18x18x16xf32, #tpu.memory_space<vmem>>, vector<16x16x16xf32>
      tpu.vector_store %arg6[%c1_22, %c1_23, %c0_24], %12 {strides = array<i32>} : memref<18x18x16xf32, #tpu.memory_space<vmem>>, vector<16x16x16xf32>,
      %c0_25 = arith.constant 0 : index
      %c0_26 = arith.constant 0 : index
      %c0_27 = arith.constant 0 : index
      %38 = vector.load %arg6[%c0_25, %c0_26, %c0_27] : memref<18x18x16xf32, #tpu.memory_space<vmem>>, vector<16x18x16xf32>
      %c1_28 = arith.constant 1 : index
      %c0_29 = arith.constant 0 : index
      %c0_30 = arith.constant 0 : index
      %39 = vector.load %arg6[%c1_28, %c0_29, %c0_30] : memref<18x18x16xf32, #tpu.memory_space<vmem>>, vector<16x18x16xf32>
      %c2_31 = arith.constant 2 : index
      %c0_32 = arith.constant 0 : index
      %c0_33 = arith.constant 0 : index
      %40 = vector.load %arg6[%c2_31, %c0_32, %c0_33] : memref<18x18x16xf32, #tpu.memory_space<vmem>>, vector<16x18x16xf32>
      %c1_34 = arith.constant 1 : index
      %41 = memref.load %arg1[%c1_34] : memref<5xi32, #tpu.memory_space<smem>>
      %c0_i32_35 = arith.constant 0 : i32
      %42 = arith.cmpi ne, %41, %c0_i32_35 : i32
      %43 = arith.extui %42 : i1 to i32
      %c0_i32_36 = arith.constant 0 : i32
      %44 = arith.cmpi ne, %43, %c0_i32_36 : i32
      scf.if %44 {
        %53 = vector.extract_strided_slice %38 {offsets = [0, 0, 0], sizes = [16, 16, 16], strides = [1, 1, 1]} : vector<16x18x16xf32> to vector<16x16x16xf32>
        %54 = vector.shape_cast %53 : vector<16x16x16xf32> to vector<256x16xf32>
        %55 = vector.extract_strided_slice %38 {offsets = [0, 1, 0], sizes = [16, 16, 16], strides = [1, 1, 1]} : vector<16x18x16xf32> to vector<16x16x16xf32>
        %56 = vector.shape_cast %55 : vector<16x16x16xf32> to vector<256x16xf32>
        %57 = vector.extract_strided_slice %38 {offsets = [0, 2, 0], sizes = [16, 16, 16], strides = [1, 1, 1]} : vector<16x18x16xf32> to vector<16x16x16xf32>
        %58 = vector.shape_cast %57 : vector<16x16x16xf32> to vector<256x16xf32>
        %59 = vector.extract_strided_slice %39 {offsets = [0, 0, 0], sizes = [16, 16, 16], strides = [1, 1, 1]} : vector<16x18x16xf32> to vector<16x16x16xf32>
        %60 = vector.shape_cast %59 : vector<16x16x16xf32> to vector<256x16xf32>
        %61 = vector.extract_strided_slice %39 {offsets = [0, 1, 0], sizes = [16, 16, 16], strides = [1, 1, 1]} : vector<16x18x16xf32> to vector<16x16x16xf32>
        %62 = vector.shape_cast %61 : vector<16x16x16xf32> to vector<256x16xf32>
        %63 = vector.extract_strided_slice %39 {offsets = [0, 2, 0], sizes = [16, 16, 16], strides = [1, 1, 1]} : vector<16x18x16xf32> to vector<16x16x16xf32>
        %64 = vector.shape_cast %63 : vector<16x16x16xf32> to vector<256x16xf32>
        %65 = vector.extract_strided_slice %40 {offsets = [0, 0, 0], sizes = [16, 16, 16], strides = [1, 1, 1]} : vector<16x18x16xf32> to vector<16x16x16xf32>
        %66 = vector.shape_cast %65 : vector<16x16x16xf32> to vector<256x16xf32>
        %67 = vector.extract_strided_slice %40 {offsets = [0, 1, 0], sizes = [16, 16, 16], strides = [1, 1, 1]} : vector<16x18x16xf32> to vector<16x16x16xf32>
        %68 = vector.shape_cast %67 : vector<16x16x16xf32> to vector<256x16xf32>
        %69 = vector.extract_strided_slice %40 {offsets = [0, 2, 0], sizes = [16, 16, 16], strides = [1, 1, 1]} : vector<16x18x16xf32> to vector<16x16x16xf32>
        %70 = vector.shape_cast %69 : vector<16x16x16xf32> to vector<256x16xf32>
        %71 = tpu.concatenate %54, %56, %58, %60, %62, %64, %66, %68, %70 in 1 : vector<256x16xf32>, vector<256x16xf32>, vector<256x16xf32>, vector<256x16xf32>, vector<256x16xf32>, vector<256x16xf32>, vector<256x16xf32>, vector<256x16xf32>, vector<256x16xf32> -> vector<256x144xf32>
        %c0_43 = arith.constant 0 : index
        %c0_44 = arith.constant 0 : index
        %72 = vector.load %arg7[%c0_43, %c0_44] : memref<144x16xf32, #tpu.memory_space<vmem>>, vector<144x16xf32>
        %cst = arith.constant dense<0.000000e+00> : vector<256x16xf32>
        %73 = tpu.matmul %71, %72, %cst {dimension_numbers = #tpu.dot_dimension_numbers<[1], [0], [0], [1], [0, 0, 1, 1], [], []>} : vector<256x144xf32>, vector<144x16xf32>, vector<256x16xf32> -> vector<256x16xf32>
        %c0_45 = arith.constant 0 : index
        %c0_46 = arith.constant 0 : index
        %c0_47 = arith.constant 0 : index
        %c0_48 = arith.constant 0 : index
        %74 = vector.load %arg5[%c0_45, %c0_46, %c0_47, %c0_48] : memref<1x16x16x16xf32, #tpu.memory_space<vmem>>, vector<1x16x16x16xf32>
        %75 = vector.shape_cast %74 : vector<1x16x16x16xf32> to vector<16x16x16xf32>
        %76 = vector.shape_cast %73 : vector<256x16xf32> to vector<16x16x16xf32>
        %77 = arith.addf %75, %76 : vector<16x16x16xf32>
        %c0_49 = arith.constant 0 : index
        %c0_50 = arith.constant 0 : index
        %c0_51 = arith.constant 0 : index
        %c0_52 = arith.constant 0 : index
        %78 = vector.load %arg5[%c0_49, %c0_50, %c0_51, %c0_52] : memref<1x16x16x16xf32, #tpu.memory_space<vmem>>, vector<1x16x16x16xf32>
        %79 = vector.shape_cast %78 : vector<1x16x16x16xf32> to vector<16x16x16xf32>
        %80 = vector.shape_cast %77 : vector<16x16x16xf32> to vector<1x16x16x16xf32>
        tpu.vector_store %arg5[%c0_49, %c0_50, %c0_51, %c0_52], %80 {strides = array<i32>} : memref<1x16x16x16xf32, #tpu.memory_space<vmem>>, vector<1x16x16x16xf32>,
      } else {
      }
      %c3_37 = arith.constant 3 : index
      %45 = memref.load %arg1[%c3_37] : memref<5xi32, #tpu.memory_space<smem>>
      %c0_i32_38 = arith.constant 0 : i32
      %46 = arith.cmpi ne, %45, %c0_i32_38 : i32
      %47 = arith.extui %46 : i1 to i32
      %c0_i32_39 = arith.constant 0 : i32
      %48 = arith.cmpi ne, %47, %c0_i32_39 : i32
      scf.if %48 {
        %53 = arith.addf %38, %39 : vector<16x18x16xf32>
        %54 = arith.addf %53, %40 : vector<16x18x16xf32>
        %55 = vector.extract_strided_slice %54 {offsets = [0, 0, 0], sizes = [16, 16, 16], strides = [1, 1, 1]} : vector<16x18x16xf32> to vector<16x16x16xf32>
        %56 = vector.extract_strided_slice %54 {offsets = [0, 1, 0], sizes = [16, 16, 16], strides = [1, 1, 1]} : vector<16x18x16xf32> to vector<16x16x16xf32>
        %57 = arith.addf %55, %56 : vector<16x16x16xf32>
        %58 = vector.extract_strided_slice %54 {offsets = [0, 2, 0], sizes = [16, 16, 16], strides = [1, 1, 1]} : vector<16x18x16xf32> to vector<16x16x16xf32>
        %59 = arith.addf %57, %58 : vector<16x16x16xf32>
        %c0_43 = arith.constant 0 : index
        %c0_44 = arith.constant 0 : index
        %c0_45 = arith.constant 0 : index
        %c0_46 = arith.constant 0 : index
        %60 = vector.load %arg5[%c0_43, %c0_44, %c0_45, %c0_46] : memref<1x16x16x16xf32, #tpu.memory_space<vmem>>, vector<1x16x16x16xf32>
        %61 = vector.shape_cast %60 : vector<1x16x16x16xf32> to vector<16x16x16xf32>
        %cst = arith.constant 0.111111112 : f32
        %62 = vector.broadcast %cst : f32 to vector<16x16x16xf32>
        %63 = arith.mulf %59, %62 : vector<16x16x16xf32>
        %64 = arith.addf %61, %63 : vector<16x16x16xf32>
        %c0_47 = arith.constant 0 : index
        %c0_48 = arith.constant 0 : index
        %c0_49 = arith.constant 0 : index
        %c0_50 = arith.constant 0 : index
        %65 = vector.load %arg5[%c0_47, %c0_48, %c0_49, %c0_50] : memref<1x16x16x16xf32, #tpu.memory_space<vmem>>, vector<1x16x16x16xf32>
        %66 = vector.shape_cast %65 : vector<1x16x16x16xf32> to vector<16x16x16xf32>
        %67 = vector.shape_cast %64 : vector<16x16x16xf32> to vector<1x16x16x16xf32>
        tpu.vector_store %arg5[%c0_47, %c0_48, %c0_49, %c0_50], %67 {strides = array<i32>} : memref<1x16x16x16xf32, #tpu.memory_space<vmem>>, vector<1x16x16x16xf32>,
      } else {
      }
      %c4_40 = arith.constant 4 : index
      %49 = memref.load %arg1[%c4_40] : memref<5xi32, #tpu.memory_space<smem>>
      %c0_i32_41 = arith.constant 0 : i32
      %50 = arith.cmpi ne, %49, %c0_i32_41 : i32
      %51 = arith.extui %50 : i1 to i32
      %c0_i32_42 = arith.constant 0 : i32
      %52 = arith.cmpi ne, %51, %c0_i32_42 : i32
      scf.if %52 {
        %53 = tpu.iota {dimensions = array<i32: 0>} : vector<16x18x16xi32>
        %54 = tpu.iota {dimensions = array<i32: 1>} : vector<16x16x16xi32>
        %c1_i32 = arith.constant 1 : i32
        %55 = vector.broadcast %c1_i32 : i32 to vector<16x18x16xi32>
        %56 = arith.cmpi sge, %53, %55 : vector<16x18x16xi32>
        %cst = arith.constant -3.40282347E+38 : f32
        %57 = vector.broadcast %cst : f32 to vector<16x18x16xf32>
        %58 = arith.select %56, %38, %57 : vector<16x18x16xi1>, vector<16x18x16xf32>
        %59 = arith.maximumf %58, %39 : vector<16x18x16xf32>
        %c14_i32 = arith.constant 14 : i32
        %60 = vector.broadcast %c14_i32 : i32 to vector<16x18x16xi32>
        %61 = arith.cmpi sle, %53, %60 : vector<16x18x16xi32>
        %cst_43 = arith.constant -3.40282347E+38 : f32
        %62 = vector.broadcast %cst_43 : f32 to vector<16x18x16xf32>
        %63 = arith.select %61, %40, %62 : vector<16x18x16xi1>, vector<16x18x16xf32>
        %64 = arith.maximumf %59, %63 : vector<16x18x16xf32>
        %c1_i32_44 = arith.constant 1 : i32
        %65 = vector.broadcast %c1_i32_44 : i32 to vector<16x16x16xi32>
        %66 = arith.cmpi sge, %54, %65 : vector<16x16x16xi32>
        %67 = vector.extract_strided_slice %64 {offsets = [0, 0, 0], sizes = [16, 16, 16], strides = [1, 1, 1]} : vector<16x18x16xf32> to vector<16x16x16xf32>
        %cst_45 = arith.constant -3.40282347E+38 : f32
        %68 = vector.broadcast %cst_45 : f32 to vector<16x16x16xf32>
        %69 = arith.select %66, %67, %68 : vector<16x16x16xi1>, vector<16x16x16xf32>
        %70 = vector.extract_strided_slice %64 {offsets = [0, 1, 0], sizes = [16, 16, 16], strides = [1, 1, 1]} : vector<16x18x16xf32> to vector<16x16x16xf32>
        %71 = arith.maximumf %69, %70 : vector<16x16x16xf32>
        %c14_i32_46 = arith.constant 14 : i32
        %72 = vector.broadcast %c14_i32_46 : i32 to vector<16x16x16xi32>
        %73 = arith.cmpi sle, %54, %72 : vector<16x16x16xi32>
        %74 = vector.extract_strided_slice %64 {offsets = [0, 2, 0], sizes = [16, 16, 16], strides = [1, 1, 1]} : vector<16x18x16xf32> to vector<16x16x16xf32>
        %cst_47 = arith.constant -3.40282347E+38 : f32
        %75 = vector.broadcast %cst_47 : f32 to vector<16x16x16xf32>
        %76 = arith.select %73, %74, %75 : vector<16x16x16xi1>, vector<16x16x16xf32>
        %77 = arith.maximumf %71, %76 : vector<16x16x16xf32>
        %c0_48 = arith.constant 0 : index
        %c0_49 = arith.constant 0 : index
        %c0_50 = arith.constant 0 : index
        %c0_51 = arith.constant 0 : index
        %78 = vector.load %arg5[%c0_48, %c0_49, %c0_50, %c0_51] : memref<1x16x16x16xf32, #tpu.memory_space<vmem>>, vector<1x16x16x16xf32>
        %79 = vector.shape_cast %78 : vector<1x16x16x16xf32> to vector<16x16x16xf32>
        %80 = arith.addf %79, %77 : vector<16x16x16xf32>
        %c0_52 = arith.constant 0 : index
        %c0_53 = arith.constant 0 : index
        %c0_54 = arith.constant 0 : index
        %c0_55 = arith.constant 0 : index
        %81 = vector.load %arg5[%c0_52, %c0_53, %c0_54, %c0_55] : memref<1x16x16x16xf32, #tpu.memory_space<vmem>>, vector<1x16x16x16xf32>
        %82 = vector.shape_cast %81 : vector<1x16x16x16xf32> to vector<16x16x16xf32>
        %83 = vector.shape_cast %80 : vector<16x16x16xf32> to vector<1x16x16x16xf32>
        tpu.vector_store %arg5[%c0_52, %c0_53, %c0_54, %c0_55], %83 {strides = array<i32>} : memref<1x16x16x16xf32, #tpu.memory_space<vmem>>, vector<1x16x16x16xf32>,
      } else {
      }
    } else {
    }
    return
  }
  func.func @transform_0(%arg0: i32) -> i32 {
    %c0_i32 = arith.constant 0 : i32
    %c0_i32_0 = arith.constant 0 : i32
    return %c0_i32 : i32
  }
  func.func @transform_1(%arg0: i32) -> (i32, i32, i32, i32) {
    %c0_i32 = arith.constant 0 : i32
    %c0_i32_0 = arith.constant 0 : i32
    %c0_i32_1 = arith.constant 0 : i32
    %c0_i32_2 = arith.constant 0 : i32
    return %arg0, %c0_i32, %c0_i32_0, %c0_i32_1 : i32, i32, i32, i32
  }
  func.func @transform_4(%arg0: i32) -> (i32, i32, i32, i32) {
    %c0_i32 = arith.constant 0 : i32
    %c0_i32_0 = arith.constant 0 : i32
    %c0_i32_1 = arith.constant 0 : i32
    %c0_i32_2 = arith.constant 0 : i32
    return %arg0, %c0_i32, %c0_i32_0, %c0_i32_1 : i32, i32, i32, i32
  }
}

</mosaic_0001>

<bundles_post_ra>
// kernel: _mixed_op_call.1
= control target key start
LH: loop header
LB: loop body
LE: loop exit
PB: predicated region body
PF: predicated region fallthrough
CT: control target
= control target key end

     0   :  { %9 = vsyncpa [#allocation9], 0  ;;  %s8541_s0 = inlined_call_operand.vmem [shape: s32[5], index: 0, kind: input, shape index: {}]   ;;  %s8542_s1 = inlined_call_operand.hbm [shape: f32[2,16,16,16], index: 1, kind: input, shape index: {}]   ;;  %s8543_s2 = inlined_call_operand.vmem [shape: f32[144,16], index: 2, kind: input, shape index: {}]   ;;  %s8544_s3 = inlined_call_operand.vmem [shape: f32[16,16], index: 3, kind: input, shape index: {}]   ;;  %s8545_s4 = inlined_call_operand.hbm [shape: f32[2,16,16,16], index: 4, kind: output, shape index: {}]  }
   0x1   :  { %10 = vsyncpa [#allocation7], 0 }
   0x2   :  { %12 = vsyncpa [#allocation7 + $0x1], 0 }
   0x3   :  { %13 = vsyncpa [#allocation8], 0 }
   0x4   :  { %15 = vsyncpa [#allocation8 + $0x1], 0  ;;  %s5464_s15 = smov 0   ;;  %s5466_s16 = smov 0  }
   0x5   :  { %s5468_s17 = smov 0   ;;  %s5470_s18 = smov 0  }
   0x6 LB: > { %s5485_s19 = sadd.s32 4294967295, %s5420_s18   ;;  %s4433_s20 = sadd.s32 4294967294, %s5420_s18   ;;  %s5420_s18 = sphi %s5470_s18, %s9248_s18   ;;  %s5416_s17 = sphi %s5468_s17, %s9247_s17   ;;  %s5412_s16 = sphi %s5466_s16, %s9246_s16   ;;  %s5408_s15 = sphi %s5464_s15, %s9245_s15  }
   0x7   : > { %s5489_s21 = sadd.s32 1, %s5420_s18   ;;  %s49_s22 = sadd.s32 1, %s5416_s17 }
   0x8   : > { %s46_s23 = ssub.s32 %s5420_s18, %s5489_s21  ;;  %p56_p0 = scmp.ne.s32.totalorder %s5416_s17, %s5412_s16 }
   0x9   : > { %p47_p1 = scmp.eq.s32.totalorder %s46_s23, 0  ;;  %p57_p2 = scmp.eq.s32.totalorder %s5420_s18, 0 }
   0xa   : > { %p62_p3 = scmp.ne.s32.totalorder %s5412_s16, %s5408_s15  ;;  %p8547_p4 = scmp.eq.s32.totalorder %s5485_s19, 0 }
   0xb   : > { %s5501_s24 = scalar_select %p47_p1, %s5416_s17, %s49_s22  }
   0xc   : > { %p5503_p5 = por %p57_p2, %p56_p0  ;;  %p5509_p6 = por %p8547_p4, %p62_p3 }
   0xd   : > { %p86_p7 = scmp.eq.s32.totalorder %s5485_s19, 1  ;;  %p92_p8 = scmp.eq.s32.totalorder %s4433_s20, 1 }
   0xe   : > { %s8782_s26 = scalar_select %p5509_p6, 1, 0 }
   0xf   : > { %p4434_p9 = scmp.ge.s32.totalorder %s5420_s18, 1  ;;  %p99_p10 = scmp.lt.s32.totalorder %s5420_s18, 3 }
  0x10   : > { %p5516_p11 = por %p86_p7, %p56_p0  ;;  %p5520_p12 = por %p92_p8, %p62_p3 }
  0x11   : > { %p5524_p13 = pnand %p4434_p9, %p99_p10  ;;  %s112_s6 = sshll.u32 %s8541_s0, 4  ;;  %s113_s6 = int_to_ptr.vmem [resolvable:$true] %s112_s6 }
  0x12   : > { %s8783_s27 = scalar_select %p5516_p11, 1, 0 }
  0x13   : > { %s8784_s28 = scalar_select %p5520_p12, 1, 0 }
  0x14   : > { %p4678_p2 = pneg %p5524_p13  ;;  %p4691_p7 = scmp.lt.s32.totalorder %s5420_s18, 2 }
  0x15   : > { %s123_s8 = sand.u32 1, %s5416_s17   ;;  %s5301_s11 = scalar_lea.vmem %s113_s6, 16 }
  0x16   : > { %p5538_p3 = pnand %p4678_p2, %p8547_p4  ;;  %p5545_p8 = pnand %p4691_p7, %p5503_p5 }
  0x17   : > { %s4437_s10 = sshll.u32 %s123_s8, 8  ;;  %p5302_p9 = scmp.ne.s32.totalorder %s113_s6, %s5301_s11 }
  0x18   : > { %p5303_p10 = pneg %p5538_p3  ;;  %p5309_p12 = scmp.lt.s32.totalorder %s113_s6, %s113_s6 }
  0x19   : > { %p5310_p11 = scmp.lt.s32.totalorder %s5301_s11, %s5301_s11 }
  0x1a   : > { %p5304_p1 = pnand %p5303_p10, %p5302_p9 }
  0x1b   : > { %p5311_p2 = por %p5310_p11, %p5309_p12 }
  0x1c   : > { %p5305_p0 = pneg %p5304_p1 }
  0x1e   : > { %p5312_p4 = pnand %p5311_p2, %p5305_p0 }
  0x20   : > { %5315 = shalt.err (!%p5312_p4)
}
  0x21   : > { %s5422_s12 = smov [#allocation6]   ;;  %s4531_s13 = sshll.u32 %s5420_s18, 12 }
  0x22   : > { %4681 = dma.vmem_to_smem (!%p5538_p3), %s113_s6, 16, %s5422_s12, [#allocation9]  }
  0x23   : > { %s127_s14 = scalar_lea.vmem [#allocation10], %s4437_s10  ;;  %s5557_s25 = scalar_lea.hbm %s8542_s1, %s4531_s13 }
  0x24   : > { %s134_s20 = sshll.u32 %s127_s14, 4  ;;  %s5561_s30 = scalar_lea.sflag [#allocation7], %s123_s8  ;;  %s5559_s20 = int_to_ptr.vmem [resolvable:$true] %s134_s20 }
  0x25   : > { %s5316_s5 = scalar_lea.hbm %s5557_s25, 4096  ;;  %p5318_p5 = pneg %p5545_p8 }
  0x26   : > { %p5317_p4 = scmp.ne.s32.totalorder %s5557_s25, %s5316_s5  ;;  %s5321_s10 = scalar_lea.hbm %s8542_s1, 8192 }
  0x27   : > { %p5322_p1 = scmp.lt.u32.totalorder %s5557_s25, %s8542_s1  ;;  %p5323_p0 = scmp.lt.u32.totalorder %s5321_s10, %s5316_s5 }
  0x28   : > { %p5319_p11 = pnand %p5318_p5, %p5317_p4  ;;  %p5325_p3 = scmp.lt.u32.totalorder %s5316_s5, %s5557_s25 }
  0x29   : > { %p5324_p7 = por %p5323_p0, %p5322_p1 }
  0x2a   : > { %p5320_p12 = pneg %p5319_p11 }
  0x2b   : > { %p5326_p9 = por %p5325_p3, %p5324_p7 }
  0x2d   : > { %p5327_p10 = pnand %p5326_p9, %p5320_p12 }
  0x2f   : > { %5330 = shalt.err (!%p5327_p10)
}
  0x30   : > { %s5331_s8 = scalar_lea.vmem %s5559_s20, 4096  ;;  %s5423_s13 = smov [#allocation10]  }
  0x31   : > { %p5332_p2 = scmp.ne.s32.totalorder %s5559_s20, %s5331_s8  ;;  %s5336_s14 = sshll.u32 %s5423_s13, 4  ;;  %s5337_s14 = int_to_ptr.vmem [resolvable:$false] %s5336_s14 }
  0x32   : > { %s5338_s22 = scalar_lea.vmem %s5337_s14, 8192  ;;  %p5339_p6 = scmp.lt.s32.totalorder %s5559_s20, %s5337_s14 }
  0x33   : > { %p5334_p4 = pnand %p5332_p2, %p5318_p5  ;;  %p5340_p1 = scmp.lt.s32.totalorder %s5338_s22, %s5331_s8 }
  0x35   : > { %p5335_p11 = pneg %p5334_p4  ;;  %p5341_p0 = por %p5340_p1, %p5339_p6 }
  0x37   : > { %p5342_p7 = pnand %p5341_p0, %p5335_p11 }
  0x39   : > { %5345 = shalt.err (!%p5342_p7)
}
  0x3a   : > { %s5424_s23 = smov 128   ;;  %s5425_s5 = smov 8  }
  0x3b   : > { %4685 = dma.hbm_to_vmem [thread:$0]  (!%p5545_p8), %s5557_s25, 4096, %s5559_s20, %s5561_s30, %s5424_s23, %s5424_s23, %s5425_s5  }
  0x3c   : > { %146 = sbr.rel (%p5524_p13) target bundleno = 1342 (0x53e), region = 28  ;;  %p8788_p5 = scmp.eq.s32.totalorder (!%p5524_p13), %s5485_s19, 0 }
  0x43   : > { %5391 = dma.done.wait (%p8788_p5), [#allocation9], 16   ;;  %p8789_p12 = pmov %p8788_p5 }
  0x44   : > { %s5596_s6 = sand.u32 1, %s5412_s16   ;;  %p8790_p6 = scmp.ne.s32.totalorder %s8782_s26, 0 }
  0x45   : > { %5393 = vsyncadd (%p8789_p12), [#allocation9], 4294967280  ;;  %s4442_s7 = sshll.u32 %s5596_s6, 8  ;;  %s153_s10 = scalar_lea.sflag [#allocation7], %s5596_s6 }
  0x46   : > { %s5600_s11 = scalar_lea.vmem [#allocation10], %s4442_s7 }
  0x47   : > { %5395 = dma.done.wait (%p8790_p6), %s153_s10, 4096  }
  0x48   : > { %5397 = vsyncadd (%p8790_p6), %s153_s10, 4294963200 }
  0x49   : > { %161 = sfence }
  0x4a   : > { %s4444_s29 = sld [smem:[#allocation6 + $0x1]]  ;;  %p8791_p8 = pmov %p8788_p5 }
  0x4b   : > { %s5608_s9 = scalar_lea.vmem [#allocation11], %s4442_s7 }
  0x50   : > { %p180_p13 = scmp.ne.s32.totalorder %s4444_s29, 0 }
  0x52   : > { %p181_p3 = pnand %p180_p13, %p8791_p8 }
  0x53   : > { %v217_v0 = vld [vmem:[%s8543_s2] sm:$0xff] (!%p181_p3)  ;;  %v219_v1 = vld [vmem:[%s8543_s2 + $0x8] sm:$0xff] (!%p181_p3)  ;;  %v221_v2 = vld [vmem:[%s8543_s2 + $0x10] sm:$0xff] (!%p181_p3) }
  0x54   : > { %184 = sbr.rel (%p181_p3) target bundleno = 96 (0x60), region = 40  ;;  %218 = vst [vmem:[#allocation3] sm:$0xff] (!%p181_p3), %v217_v0  ;;  %220 = vst [vmem:[#allocation3 + $0x8] sm:$0xff] (!%p181_p3), %v219_v1  ;;  %v223_v3 = vld [vmem:[%s8543_s2 + $0x18] sm:$0xff] (!%p181_p3)  ;;  %v225_v4 = vld [vmem:[%s8543_s2 + $0x20] sm:$0xff] (!%p181_p3) }
  0x55   : > { %222 = vst [vmem:[#allocation3 + $0x10] sm:$0xff] (!%p181_p3), %v221_v2  ;;  %v227_v5 = vld [vmem:[%s8543_s2 + $0x28] sm:$0xff] (!%p181_p3)  ;;  %224 = vst [vmem:[#allocation3 + $0x18] sm:$0xff] (!%p181_p3), %v223_v3  ;;  %v229_v6 = vld [vmem:[%s8543_s2 + $0x30] sm:$0xff] (!%p181_p3) }
  0x56   : > { %226 = vst [vmem:[#allocation3 + $0x20] sm:$0xff] (!%p181_p3), %v225_v4  ;;  %228 = vst [vmem:[#allocation3 + $0x28] sm:$0xff] (!%p181_p3), %v227_v5  ;;  %v231_v7 = vld [vmem:[%s8543_s2 + $0x38] sm:$0xff] (!%p181_p3)  ;;  %v233_v8 = vld [vmem:[%s8543_s2 + $0x40] sm:$0xff] (!%p181_p3) }
  0x57   : > { %230 = vst [vmem:[#allocation3 + $0x30] sm:$0xff] (!%p181_p3), %v229_v6  ;;  %232 = vst [vmem:[#allocation3 + $0x38] sm:$0xff] (!%p181_p3), %v231_v7  ;;  %v235_v9 = vld [vmem:[%s8543_s2 + $0x48] sm:$0xff] (!%p181_p3)  ;;  %v237_v10 = vld [vmem:[%s8543_s2 + $0x50] sm:$0xff] (!%p181_p3) }
  0x58   : > { %234 = vst [vmem:[#allocation3 + $0x40] sm:$0xff] (!%p181_p3), %v233_v8  ;;  %v239_v11 = vld [vmem:[%s8543_s2 + $0x58] sm:$0xff] (!%p181_p3)  ;;  %236 = vst [vmem:[#allocation3 + $0x48] sm:$0xff] (!%p181_p3), %v235_v9  ;;  %v241_v12 = vld [vmem:[%s8543_s2 + $0x60] sm:$0xff] (!%p181_p3) }
  0x59   : > { %238 = vst [vmem:[#allocation3 + $0x50] sm:$0xff] (!%p181_p3), %v237_v10  ;;  %240 = vst [vmem:[#allocation3 + $0x58] sm:$0xff] (!%p181_p3), %v239_v11  ;;  %v243_v13 = vld [vmem:[%s8543_s2 + $0x68] sm:$0xff] (!%p181_p3)  ;;  %v245_v14 = vld [vmem:[%s8543_s2 + $0x70] sm:$0xff] (!%p181_p3) }
  0x5a   : > { %242 = vst [vmem:[#allocation3 + $0x60] sm:$0xff] (!%p181_p3), %v241_v12  ;;  %244 = vst [vmem:[#allocation3 + $0x68] sm:$0xff] (!%p181_p3), %v243_v13  ;;  %v247_v15 = vld [vmem:[%s8543_s2 + $0x78] sm:$0xff] (!%p181_p3)  ;;  %v249_v16 = vld [vmem:[%s8543_s2 + $0x80] sm:$0xff] (!%p181_p3) }
  0x5b   : > { %246 = vst [vmem:[#allocation3 + $0x70] sm:$0xff] %v245_v14  ;;  %v251_v17 = vld [vmem:[%s8543_s2 + $0x88] sm:$0xff]  ;;  %248 = vst [vmem:[#allocation3 + $0x78] sm:$0xff] %v247_v15 }
  0x5c   : > { %250 = vst [vmem:[#allocation3 + $0x80] sm:$0xff] %v249_v16  ;;  %252 = vst [vmem:[#allocation3 + $0x88] sm:$0xff] %v251_v17 }
  0x5d   : > { %260 = vsyncadd [#allocation5], 2304 }
  0x5e   : > { %5398 = dma.done.wait [#allocation5], 2304 }
  0x5f   : > { %5399 = vsyncadd [#allocation5], 4294964992 }
  0x60 PF: > { %s4445_s22 = sld [smem:[#allocation6 + $0x2]]  ;;  %p8792_p10 = scmp.eq.s32.totalorder %s5485_s19, 0 }
  0x66   : > { %p265_p9 = scmp.ne.s32.totalorder %s4445_s22, 0 }
  0x68   : > { %p266_p2 = pnand %p265_p9, %p8792_p10 }
  0x69   : > { %v303_v18 = vld [vmem:[%s8544_s3] sm:$0xff] (!%p266_p2)  ;;  %v305_v19 = vld [vmem:[%s8544_s3 + $0x8] sm:$0xff] (!%p266_p2) }
  0x6a   : > { %269 = sbr.rel (%p266_p2) target bundleno = 116 (0x74), region = 78  ;;  %304 = vst [vmem:[#allocation4] sm:$0xff] (!%p266_p2), %v303_v18  ;;  %306 = vst [vmem:[#allocation4 + $0x8] sm:$0xff] (!%p266_p2), %v305_v19 }
  0x71   : > { %314 = vsyncadd [#allocation5 + $0x1], 256 }
  0x72   : > { %5400 = dma.done.wait [#allocation5 + $0x1], 256 }
  0x73   : > { %5401 = vsyncadd [#allocation5 + $0x1], 4294967040 }
  0x74 PF: > { %v5673_v20 = vld [vmem:[%s5600_s11] sm:$0xff]  ;;  %v5676_v21 = vld [vmem:[%s5600_s11 + $0x8] sm:$0xff]  ;;  %v5679_v22 = vld [vmem:[%s5600_s11 + $0x10] sm:$0xff]  ;;  %s5681_s29 = sld [smem:[#allocation6]] }
  0x75   : > { %v5684_v23 = vld [vmem:[%s5600_s11 + $0x18] sm:$0xff]  ;;  %v5687_v24 = vld [vmem:[%s5600_s11 + $0x20] sm:$0xff]  ;;  %v5690_v25 = vld [vmem:[%s5600_s11 + $0x28] sm:$0xff] }
  0x76   : > { %v5693_v26 = vld [vmem:[%s5600_s11 + $0x30] sm:$0xff]  ;;  %v5696_v27 = vld [vmem:[%s5600_s11 + $0x38] sm:$0xff]  ;;  %v5699_v28 = vld [vmem:[%s5600_s11 + $0x40] sm:$0xff] }
  0x77   : > { %v5702_v29 = vld [vmem:[%s5600_s11 + $0x48] sm:$0xff]  ;;  %v5705_v30 = vld [vmem:[%s5600_s11 + $0x50] sm:$0xff]  ;;  %v5708_v31 = vld [vmem:[%s5600_s11 + $0x58] sm:$0xff] }
  0x78   : > { %v5711_v32 = vld [vmem:[%s5600_s11 + $0x60] sm:$0xff]  ;;  %v5714_v33 = vld [vmem:[%s5600_s11 + $0x68] sm:$0xff]  ;;  %v5717_v34 = vld [vmem:[%s5600_s11 + $0x70] sm:$0xff] }
  0x79   : > { %v5720_v35 = vld [vmem:[%s5600_s11 + $0x78] sm:$0xff]  ;;  %v5723_v36 = vld [vmem:[%s5600_s11 + $0x80] sm:$0xff]  ;;  %v5726_v37 = vld [vmem:[%s5600_s11 + $0x88] sm:$0xff] }
  0x7a   : > { %v5729_v38 = vld [vmem:[%s5600_s11 + $0x90] sm:$0xff]  ;;  %v5732_v39 = vld [vmem:[%s5600_s11 + $0x98] sm:$0xff]  ;;  %v5735_v40 = vld [vmem:[%s5600_s11 + $0xa0] sm:$0xff]  ;;  %p4446_p4 = scmp.eq.s32.totalorder %s5681_s29, 0 }
  0x7b   : > { %v5738_v41 = vld [vmem:[%s5600_s11 + $0xa8] sm:$0xff]  ;;  %v5741_v42 = vld [vmem:[%s5600_s11 + $0xb0] sm:$0xff]  ;;  %v5744_v43 = vld [vmem:[%s5600_s11 + $0xb8] sm:$0xff]  ;;  %vm355_vm0 = vcmask (!%p4446_p4), 130048  }
  0x7c   : > { %v5747_v44 = vld [vmem:[%s5600_s11 + $0xc0] sm:$0xff]  ;;  %v5750_v45 = vld [vmem:[%s5600_s11 + $0xc8] sm:$0xff]  ;;  %v5753_v46 = vld [vmem:[%s5600_s11 + $0xd0] sm:$0xff]  ;;  %354 = sbr.rel (%p4446_p4) target bundleno = 141 (0x8d), region = 116  ;;  %356 = vst.msk [vmem:[%s5608_s9] sm:$0xff] (!%p4446_p4), %vm355_vm0, %v5673_v20 }
  0x7d   : > { %v5756_v47 = vld [vmem:[%s5600_s11 + $0xd8] sm:$0xff]  ;;  %v5759_v48 = vld [vmem:[%s5600_s11 + $0xe0] sm:$0xff]  ;;  %v5762_v49 = vld [vmem:[%s5600_s11 + $0xe8] sm:$0xff]  ;;  %357 = vst.msk [vmem:[%s5608_s9 + $0x8] sm:$0xff] (!%p4446_p4), %vm355_vm0, %v5676_v21 }
  0x7e   : > { %v5765_v50 = vld [vmem:[%s5600_s11 + $0xf0] sm:$0xff]  ;;  %v5768_v51 = vld [vmem:[%s5600_s11 + $0xf8] sm:$0xff]  ;;  %358 = vst.msk [vmem:[%s5608_s9 + $0x10] sm:$0xff] (!%p4446_p4), %vm355_vm0, %v5679_v22  ;;  %359 = vst.msk [vmem:[%s5608_s9 + $0x18] sm:$0xff] (!%p4446_p4), %vm355_vm0, %v5684_v23 }
  0x7f   : > { %360 = vst.msk [vmem:[%s5608_s9 + $0x20] sm:$0xff] (!%p4446_p4), %vm355_vm0, %v5687_v24  ;;  %361 = vst.msk [vmem:[%s5608_s9 + $0x28] sm:$0xff] (!%p4446_p4), %vm355_vm0, %v5690_v25 }
  0x80   : > { %362 = vst.msk [vmem:[%s5608_s9 + $0x30] sm:$0xff] (!%p4446_p4), %vm355_vm0, %v5693_v26  ;;  %363 = vst.msk [vmem:[%s5608_s9 + $0x38] sm:$0xff] (!%p4446_p4), %vm355_vm0, %v5696_v27 }
  0x81   : > { %364 = vst.msk [vmem:[%s5608_s9 + $0x40] sm:$0xff] (!%p4446_p4), %vm355_vm0, %v5699_v28  ;;  %365 = vst.msk [vmem:[%s5608_s9 + $0x48] sm:$0xff] (!%p4446_p4), %vm355_vm0, %v5702_v29 }
  0x82   : > { %366 = vst.msk [vmem:[%s5608_s9 + $0x50] sm:$0xff] (!%p4446_p4), %vm355_vm0, %v5705_v30  ;;  %367 = vst.msk [vmem:[%s5608_s9 + $0x58] sm:$0xff] (!%p4446_p4), %vm355_vm0, %v5708_v31 }
  0x83   : > { %368 = vst.msk [vmem:[%s5608_s9 + $0x60] sm:$0xff] %vm355_vm0, %v5711_v32  ;;  %369 = vst.msk [vmem:[%s5608_s9 + $0x68] sm:$0xff] %vm355_vm0, %v5714_v33 }
  0x84   : > { %370 = vst.msk [vmem:[%s5608_s9 + $0x70] sm:$0xff] %vm355_vm0, %v5717_v34  ;;  %371 = vst.msk [vmem:[%s5608_s9 + $0x78] sm:$0xff] %vm355_vm0, %v5720_v35 }
  0x85   : > { %372 = vst.msk [vmem:[%s5608_s9 + $0x80] sm:$0xff] %vm355_vm0, %v5723_v36  ;;  %373 = vst.msk [vmem:[%s5608_s9 + $0x88] sm:$0xff] %vm355_vm0, %v5726_v37 }
  0x86   : > { %374 = vst.msk [vmem:[%s5608_s9 + $0x90] sm:$0xff] %vm355_vm0, %v5729_v38  ;;  %375 = vst.msk [vmem:[%s5608_s9 + $0x98] sm:$0xff] %vm355_vm0, %v5732_v39 }
  0x87   : > { %376 = vst.msk [vmem:[%s5608_s9 + $0xa0] sm:$0xff] %vm355_vm0, %v5735_v40  ;;  %377 = vst.msk [vmem:[%s5608_s9 + $0xa8] sm:$0xff] %vm355_vm0, %v5738_v41 }
  0x88   : > { %378 = vst.msk [vmem:[%s5608_s9 + $0xb0] sm:$0xff] %vm355_vm0, %v5741_v42  ;;  %379 = vst.msk [vmem:[%s5608_s9 + $0xb8] sm:$0xff] %vm355_vm0, %v5744_v43 }
  0x89   : > { %380 = vst.msk [vmem:[%s5608_s9 + $0xc0] sm:$0xff] %vm355_vm0, %v5747_v44  ;;  %381 = vst.msk [vmem:[%s5608_s9 + $0xc8] sm:$0xff] %vm355_vm0, %v5750_v45 }
  0x8a   : > { %382 = vst.msk [vmem:[%s5608_s9 + $0xd0] sm:$0xff] %vm355_vm0, %v5753_v46  ;;  %383 = vst.msk [vmem:[%s5608_s9 + $0xd8] sm:$0xff] %vm355_vm0, %v5756_v47 }
  0x8b   : > { %384 = vst.msk [vmem:[%s5608_s9 + $0xe0] sm:$0xff] %vm355_vm0, %v5759_v48  ;;  %385 = vst.msk [vmem:[%s5608_s9 + $0xe8] sm:$0xff] %vm355_vm0, %v5762_v49 }
  0x8c   : > { %386 = vst.msk [vmem:[%s5608_s9 + $0xf0] sm:$0xff] %vm355_vm0, %v5765_v50  ;;  %387 = vst.msk [vmem:[%s5608_s9 + $0xf8] sm:$0xff] %vm355_vm0, %v5768_v51 }
  0x8d PF: > { %s388_s11 = sld [smem:[#allocation6]] }
  0x93   : > { %p4447_p11 = scmp.ne.s32.totalorder %s388_s11, 0 }
  0x94   : > { %vm393_vm1 = vcmask (!%p4447_p11), 130048   ;;  %v5426_v52 = vmov (!%p4447_p11), 0.0  }
  0x95   : > { %392 = sbr.rel (%p4447_p11) target bundleno = 165 (0xa5), region = 120  ;;  %394 = vst.msk [vmem:[%s5608_s9] sm:$0xff] (!%p4447_p11), %vm393_vm1, %v5426_v52  ;;  %395 = vst.msk [vmem:[%s5608_s9 + $0x8] sm:$0xff] (!%p4447_p11), %vm393_vm1, %v5426_v52 }
  0x96   : > { %396 = vst.msk [vmem:[%s5608_s9 + $0x10] sm:$0xff] (!%p4447_p11), %vm393_vm1, %v5426_v52  ;;  %397 = vst.msk [vmem:[%s5608_s9 + $0x18] sm:$0xff] (!%p4447_p11), %vm393_vm1, %v5426_v52 }
  0x97   : > { %398 = vst.msk [vmem:[%s5608_s9 + $0x20] sm:$0xff] (!%p4447_p11), %vm393_vm1, %v5426_v52  ;;  %399 = vst.msk [vmem:[%s5608_s9 + $0x28] sm:$0xff] (!%p4447_p11), %vm393_vm1, %v5426_v52 }
  0x98   : > { %400 = vst.msk [vmem:[%s5608_s9 + $0x30] sm:$0xff] (!%p4447_p11), %vm393_vm1, %v5426_v52  ;;  %401 = vst.msk [vmem:[%s5608_s9 + $0x38] sm:$0xff] (!%p4447_p11), %vm393_vm1, %v5426_v52 }
  0x99   : > { %402 = vst.msk [vmem:[%s5608_s9 + $0x40] sm:$0xff] (!%p4447_p11), %vm393_vm1, %v5426_v52  ;;  %403 = vst.msk [vmem:[%s5608_s9 + $0x48] sm:$0xff] (!%p4447_p11), %vm393_vm1, %v5426_v52 }
  0x9a   : > { %404 = vst.msk [vmem:[%s5608_s9 + $0x50] sm:$0xff] (!%p4447_p11), %vm393_vm1, %v5426_v52  ;;  %405 = vst.msk [vmem:[%s5608_s9 + $0x58] sm:$0xff] (!%p4447_p11), %vm393_vm1, %v5426_v52 }
  0x9b   : > { %406 = vst.msk [vmem:[%s5608_s9 + $0x60] sm:$0xff] (!%p4447_p11), %vm393_vm1, %v5426_v52  ;;  %407 = vst.msk [vmem:[%s5608_s9 + $0x68] sm:$0xff] (!%p4447_p11), %vm393_vm1, %v5426_v52 }
  0x9c   : > { %408 = vst.msk [vmem:[%s5608_s9 + $0x70] sm:$0xff] %vm393_vm1, %v5426_v52  ;;  %409 = vst.msk [vmem:[%s5608_s9 + $0x78] sm:$0xff] %vm393_vm1, %v5426_v52 }
  0x9d   : > { %410 = vst.msk [vmem:[%s5608_s9 + $0x80] sm:$0xff] %vm393_vm1, %v5426_v52  ;;  %411 = vst.msk [vmem:[%s5608_s9 + $0x88] sm:$0xff] %vm393_vm1, %v5426_v52 }
  0x9e   : > { %412 = vst.msk [vmem:[%s5608_s9 + $0x90] sm:$0xff] %vm393_vm1, %v5426_v52  ;;  %413 = vst.msk [vmem:[%s5608_s9 + $0x98] sm:$0xff] %vm393_vm1, %v5426_v52 }
  0x9f   : > { %414 = vst.msk [vmem:[%s5608_s9 + $0xa0] sm:$0xff] %vm393_vm1, %v5426_v52  ;;  %415 = vst.msk [vmem:[%s5608_s9 + $0xa8] sm:$0xff] %vm393_vm1, %v5426_v52 }
  0xa0   : > { %416 = vst.msk [vmem:[%s5608_s9 + $0xb0] sm:$0xff] %vm393_vm1, %v5426_v52  ;;  %417 = vst.msk [vmem:[%s5608_s9 + $0xb8] sm:$0xff] %vm393_vm1, %v5426_v52 }
  0xa1   : > { %418 = vst.msk [vmem:[%s5608_s9 + $0xc0] sm:$0xff] %vm393_vm1, %v5426_v52  ;;  %419 = vst.msk [vmem:[%s5608_s9 + $0xc8] sm:$0xff] %vm393_vm1, %v5426_v52 }
  0xa2   : > { %420 = vst.msk [vmem:[%s5608_s9 + $0xd0] sm:$0xff] %vm393_vm1, %v5426_v52  ;;  %421 = vst.msk [vmem:[%s5608_s9 + $0xd8] sm:$0xff] %vm393_vm1, %v5426_v52 }
  0xa3   : > { %422 = vst.msk [vmem:[%s5608_s9 + $0xe0] sm:$0xff] %vm393_vm1, %v5426_v52  ;;  %423 = vst.msk [vmem:[%s5608_s9 + $0xe8] sm:$0xff] %vm393_vm1, %v5426_v52 }
  0xa4   : > { %424 = vst.msk [vmem:[%s5608_s9 + $0xf0] sm:$0xff] %vm393_vm1, %v5426_v52  ;;  %425 = vst.msk [vmem:[%s5608_s9 + $0xf8] sm:$0xff] %vm393_vm1, %v5426_v52 }
  0xa5 PF: > { %s4448_s20 = sld [smem:[#allocation6 + $0x2]] }
  0xab   : > { %p4449_p1 = scmp.eq.s32.totalorder %s4448_s20, 0 }
  0xac   : > { %v431_v53 = vld [vmem:[#allocation4] sm:$0xff] (!%p4449_p1)  ;;  %v432_v54 = vld [vmem:[#allocation4 + $0x8] sm:$0xff] (!%p4449_p1)  ;;  %vm433_vm2 = vcmask (!%p4449_p1), 130048   ;;  %v756_v56 = vld [vmem:[%s5608_s9 + $0x8] sm:$0xff] (!%p4449_p1) }
  0xad   : > { %430 = sbr.rel (%p4449_p1) target bundleno = 423 (0x1a7), region = 124  ;;  %v4619_v55 = vpack.c.bf16 (!%p4449_p1), %v432_v54, %v431_v53  ;;  %4571 = vmatprep.mubr.msk.f32.mxu0 (!%p4449_p1), %vm433_vm2, %v5673_v20  ;;  %4595 = vmatprep.mubr.msk.f32.mxu1 (!%p4449_p1), %vm433_vm2, %v5723_v36  ;;  %v772_v57 = vld [vmem:[%s5608_s9 + $0x88] sm:$0xff] (!%p4449_p1)  ;;  %v755_v58 = vld [vmem:[%s5608_s9] sm:$0xff] (!%p4449_p1)  ;;  %v758_v4 = vld [vmem:[%s5608_s9 + $0x18] sm:$0xff] (!%p4449_p1) }
  0xae   : > { %v771_v59 = vld [vmem:[%s5608_s9 + $0x80] sm:$0xff] (!%p4449_p1)  ;;  %v774_v5 = vld [vmem:[%s5608_s9 + $0x98] sm:$0xff] (!%p4449_p1)  ;;  %v757_v6 = vld [vmem:[%s5608_s9 + $0x10] sm:$0xff] (!%p4449_p1) }
  0xaf   : > { %4620 = vmatprep.subr.bf16.mxu0 (!%p4449_p1), %v4619_v55  ;;  %4650 = vmatprep.subr.bf16.mxu1 (!%p4449_p1), %v4619_v55  ;;  %v773_v7 = vld [vmem:[%s5608_s9 + $0x90] sm:$0xff] (!%p4449_p1)  ;;  %v760_v16 = vld [vmem:[%s5608_s9 + $0x28] sm:$0xff] (!%p4449_p1)  ;;  %v759_v18 = vld [vmem:[%s5608_s9 + $0x20] sm:$0xff] (!%p4449_p1) }
  0xb0   : > { %4622 = vmatpush3.bf16.msra.mxu0 (!%p4449_p1), %v4619_v55  ;;  %4651 = vmatpush3.bf16.msra.mxu1 (!%p4449_p1), %v4619_v55  ;;  %v776_v17 = vld [vmem:[%s5608_s9 + $0xa8] sm:$0xff] (!%p4449_p1)  ;;  %v775_v19 = vld [vmem:[%s5608_s9 + $0xa0] sm:$0xff] (!%p4449_p1) }
  0xb3   : > { %4572 = vmatmul.mubr.msk.f32.vlgmr.msra.gmra.mrb[0].mxu0 (!%p4449_p1), %vm433_vm2, %v5676_v21  ;;  %4596 = vmatmul.mubr.msk.f32.vlgmr.msra.gmra.mrb[0].mxu1 (!%p4449_p1), %vm433_vm2, %v5726_v37 }
  0xb4   : > { %4574 = vmatprep.mubr.msk.f32.mxu0 %vm433_vm2, %v5679_v22  ;;  %4598 = vmatprep.mubr.msk.f32.mxu1 %vm433_vm2, %v5729_v38 }
  0xb7   : > { %4575 = vmatmul.mubr.msk.f32.gmra.mrb[2].mxu0 %vm433_vm2, %v5684_v23  ;;  %4599 = vmatmul.mubr.msk.f32.gmra.mrb[2].mxu1 %vm433_vm2, %v5732_v39 }
  0xb8   : > { %4577 = vmatprep.mubr.msk.f32.mxu0 %vm433_vm2, %v5687_v24  ;;  %4601 = vmatprep.mubr.msk.f32.mxu1 %vm433_vm2, %v5735_v40 }
  0xbb   : > { %4578 = vmatmul.mubr.msk.f32.gmra.mrb[4].mxu0 %vm433_vm2, %v5690_v25  ;;  %4602 = vmatmul.mubr.msk.f32.gmra.mrb[4].mxu1 %vm433_vm2, %v5738_v41 }
  0xbc   : > { %4580 = vmatprep.mubr.msk.f32.mxu0 %vm433_vm2, %v5693_v26  ;;  %4604 = vmatprep.mubr.msk.f32.mxu1 %vm433_vm2, %v5741_v42 }
  0xbf   : > { %4581 = vmatmul.mubr.msk.f32.gmra.mrb[6].mxu0 %vm433_vm2, %v5696_v27  ;;  %4605 = vmatmul.mubr.msk.f32.gmra.mrb[6].mxu1 %vm433_vm2, %v5744_v43 }
  0xc0   : > { %4583 = vmatprep.mubr.msk.f32.mxu0 %vm433_vm2, %v5699_v28  ;;  %4607 = vmatprep.mubr.msk.f32.mxu1 %vm433_vm2, %v5747_v44 }
  0xc3   : > { %4584 = vmatmul.mubr.msk.f32.gmra.mrb[8].mxu0 %vm433_vm2, %v5702_v29  ;;  %4608 = vmatmul.mubr.msk.f32.gmra.mrb[8].mxu1 %vm433_vm2, %v5750_v45 }
  0xc4   : > { %4586 = vmatprep.mubr.msk.f32.mxu0 %vm433_vm2, %v5705_v30  ;;  %4610 = vmatprep.mubr.msk.f32.mxu1 %vm433_vm2, %v5753_v46 }
  0xc7   : > { %4587 = vmatmul.mubr.msk.f32.gmra.mrb[10].mxu0 %vm433_vm2, %v5708_v31  ;;  %4611 = vmatmul.mubr.msk.f32.gmra.mrb[10].mxu1 %vm433_vm2, %v5756_v47 }
  0xc8   : > { %4589 = vmatprep.mubr.msk.f32.mxu0 %vm433_vm2, %v5711_v32  ;;  %4613 = vmatprep.mubr.msk.f32.mxu1 %vm433_vm2, %v5759_v48 }
  0xcb   : > { %4590 = vmatmul.mubr.msk.f32.gmra.mrb[12].mxu0 %vm433_vm2, %v5714_v33  ;;  %4614 = vmatmul.mubr.msk.f32.gmra.mrb[12].mxu1 %vm433_vm2, %v5762_v49 }
  0xcc   : > { %4592 = vmatprep.mubr.msk.f32.mxu0 %vm433_vm2, %v5717_v34  ;;  %4616 = vmatprep.mubr.msk.f32.mxu1 %vm433_vm2, %v5765_v50 }
  0xcf   : > { %4593 = vmatmul.mubr.msk.f32.gmra.mrb[14].mxu0 %vm433_vm2, %v5720_v35  ;;  %4617 = vmatmul.mubr.msk.f32.gmra.mrb[14].mxu1 %vm433_vm2, %v5768_v51 }
 0x186   : > { %v4573_v60 = vpop.f32.mrb[0].mxu0  ;;  %v4597_v61 = vpop.f32.mrb[0].mxu1 }
 0x187   : > { %v788_v62 = vadd.f32 %v4573_v60, %v756_v56  ;;  %v804_v63 = vadd.f32 %v4597_v61, %v772_v57  ;;  %v596_v0 = vpop.f32.mrb[1].mxu0  ;;  %v676_v1 = vpop.f32.mrb[1].mxu1  ;;  %v762_v60 = vld [vmem:[%s5608_s9 + $0x38] sm:$0xff] }
 0x188   : > { %v787_v2 = vadd.f32 %v755_v58, %v596_v0  ;;  %v803_v3 = vadd.f32 %v771_v59, %v676_v1  ;;  %v778_v61 = vld [vmem:[%s5608_s9 + $0xb8] sm:$0xff] }
 0x189   : > { %820 = vst.msk [vmem:[%s5608_s9 + $0x8] sm:$0xff] %vm433_vm2, %v788_v62  ;;  %836 = vst.msk [vmem:[%s5608_s9 + $0x88] sm:$0xff] %vm433_vm2, %v804_v63  ;;  %v761_v62 = vld [vmem:[%s5608_s9 + $0x30] sm:$0xff] }
 0x18a   : > { %819 = vst.msk [vmem:[%s5608_s9] sm:$0xff] %vm433_vm2, %v787_v2  ;;  %835 = vst.msk [vmem:[%s5608_s9 + $0x80] sm:$0xff] %vm433_vm2, %v803_v3  ;;  %v4576_v8 = vpop.f32.mrb[2].mxu0  ;;  %v4600_v9 = vpop.f32.mrb[2].mxu1  ;;  %v777_v63 = vld [vmem:[%s5608_s9 + $0xb0] sm:$0xff] }
 0x18b   : > { %v790_v10 = vadd.f32 %v4576_v8, %v758_v4  ;;  %v806_v11 = vadd.f32 %v4600_v9, %v774_v5  ;;  %v606_v12 = vpop.f32.mrb[3].mxu0  ;;  %v686_v13 = vpop.f32.mrb[3].mxu1  ;;  %v764_v8 = vld [vmem:[%s5608_s9 + $0x48] sm:$0xff] }
 0x18c   : > { %v789_v14 = vadd.f32 %v757_v6, %v606_v12  ;;  %v805_v15 = vadd.f32 %v773_v7, %v686_v13  ;;  %v780_v9 = vld [vmem:[%s5608_s9 + $0xc8] sm:$0xff] }
 0x18d   : > { %822 = vst.msk [vmem:[%s5608_s9 + $0x18] sm:$0xff] %vm433_vm2, %v790_v10  ;;  %838 = vst.msk [vmem:[%s5608_s9 + $0x98] sm:$0xff] %vm433_vm2, %v806_v11  ;;  %v763_v10 = vld [vmem:[%s5608_s9 + $0x40] sm:$0xff] }
 0x18e   : > { %821 = vst.msk [vmem:[%s5608_s9 + $0x10] sm:$0xff] %vm433_vm2, %v789_v14  ;;  %837 = vst.msk [vmem:[%s5608_s9 + $0x90] sm:$0xff] %vm433_vm2, %v805_v15  ;;  %v4579_v52 = vpop.f32.mrb[4].mxu0  ;;  %v4603_v53 = vpop.f32.mrb[4].mxu1  ;;  %v779_v11 = vld [vmem:[%s5608_s9 + $0xc0] sm:$0xff] }
 0x18f   : > { %v792_v54 = vadd.f32 %v4579_v52, %v760_v16  ;;  %v808_v55 = vadd.f32 %v4603_v53, %v776_v17  ;;  %v616_v56 = vpop.f32.mrb[5].mxu0  ;;  %v696_v57 = vpop.f32.mrb[5].mxu1  ;;  %v766_v52 = vld [vmem:[%s5608_s9 + $0x58] sm:$0xff] }
 0x190   : > { %v791_v58 = vadd.f32 %v759_v18, %v616_v56  ;;  %v807_v59 = vadd.f32 %v775_v19, %v696_v57  ;;  %v782_v53 = vld [vmem:[%s5608_s9 + $0xd8] sm:$0xff] }
 0x191   : > { %824 = vst.msk [vmem:[%s5608_s9 + $0x28] sm:$0xff] %vm433_vm2, %v792_v54  ;;  %840 = vst.msk [vmem:[%s5608_s9 + $0xa8] sm:$0xff] %vm433_vm2, %v808_v55  ;;  %v765_v54 = vld [vmem:[%s5608_s9 + $0x50] sm:$0xff] }
 0x192   : > { %823 = vst.msk [vmem:[%s5608_s9 + $0x20] sm:$0xff] %vm433_vm2, %v791_v58  ;;  %839 = vst.msk [vmem:[%s5608_s9 + $0xa0] sm:$0xff] %vm433_vm2, %v807_v59  ;;  %v4582_v0 = vpop.f32.mrb[6].mxu0  ;;  %v4606_v1 = vpop.f32.mrb[6].mxu1  ;;  %v781_v55 = vld [vmem:[%s5608_s9 + $0xd0] sm:$0xff] }
 0x193   : > { %v794_v2 = vadd.f32 %v4582_v0, %v762_v60  ;;  %v810_v3 = vadd.f32 %v4606_v1, %v778_v61  ;;  %v626_v4 = vpop.f32.mrb[7].mxu0  ;;  %v706_v5 = vpop.f32.mrb[7].mxu1  ;;  %v768_v0 = vld [vmem:[%s5608_s9 + $0x68] sm:$0xff] }
 0x194   : > { %v793_v6 = vadd.f32 %v761_v62, %v626_v4  ;;  %v809_v7 = vadd.f32 %v777_v63, %v706_v5  ;;  %v784_v1 = vld [vmem:[%s5608_s9 + $0xe8] sm:$0xff] }
 0x195   : > { %826 = vst.msk [vmem:[%s5608_s9 + $0x38] sm:$0xff] %vm433_vm2, %v794_v2  ;;  %842 = vst.msk [vmem:[%s5608_s9 + $0xb8] sm:$0xff] %vm433_vm2, %v810_v3  ;;  %v767_v2 = vld [vmem:[%s5608_s9 + $0x60] sm:$0xff] }
 0x196   : > { %825 = vst.msk [vmem:[%s5608_s9 + $0x30] sm:$0xff] %vm433_vm2, %v793_v6  ;;  %841 = vst.msk [vmem:[%s5608_s9 + $0xb0] sm:$0xff] %vm433_vm2, %v809_v7  ;;  %v4585_v12 = vpop.f32.mrb[8].mxu0  ;;  %v4609_v13 = vpop.f32.mrb[8].mxu1  ;;  %v783_v3 = vld [vmem:[%s5608_s9 + $0xe0] sm:$0xff] }
 0x197   : > { %v796_v14 = vadd.f32 %v4585_v12, %v764_v8  ;;  %v812_v15 = vadd.f32 %v4609_v13, %v780_v9  ;;  %v636_v16 = vpop.f32.mrb[9].mxu0  ;;  %v716_v17 = vpop.f32.mrb[9].mxu1  ;;  %v770_v12 = vld [vmem:[%s5608_s9 + $0x78] sm:$0xff] }
 0x198   : > { %v795_v18 = vadd.f32 %v763_v10, %v636_v16  ;;  %v811_v19 = vadd.f32 %v779_v11, %v716_v17  ;;  %v786_v13 = vld [vmem:[%s5608_s9 + $0xf8] sm:$0xff] }
 0x199   : > { %828 = vst.msk [vmem:[%s5608_s9 + $0x48] sm:$0xff] %vm433_vm2, %v796_v14  ;;  %844 = vst.msk [vmem:[%s5608_s9 + $0xc8] sm:$0xff] %vm433_vm2, %v812_v15  ;;  %v769_v14 = vld [vmem:[%s5608_s9 + $0x70] sm:$0xff] }
 0x19a   : > { %827 = vst.msk [vmem:[%s5608_s9 + $0x40] sm:$0xff] %vm433_vm2, %v795_v18  ;;  %843 = vst.msk [vmem:[%s5608_s9 + $0xc0] sm:$0xff] %vm433_vm2, %v811_v19  ;;  %v4588_v56 = vpop.f32.mrb[10].mxu0  ;;  %v4612_v57 = vpop.f32.mrb[10].mxu1  ;;  %v785_v15 = vld [vmem:[%s5608_s9 + $0xf0] sm:$0xff] }
 0x19b   : > { %v798_v58 = vadd.f32 %v4588_v56, %v766_v52  ;;  %v814_v59 = vadd.f32 %v4612_v57, %v782_v53  ;;  %v646_v60 = vpop.f32.mrb[11].mxu0  ;;  %v726_v61 = vpop.f32.mrb[11].mxu1 }
 0x19c   : > { %v797_v62 = vadd.f32 %v765_v54, %v646_v60  ;;  %v813_v63 = vadd.f32 %v781_v55, %v726_v61 }
 0x19d   : > { %830 = vst.msk [vmem:[%s5608_s9 + $0x58] sm:$0xff] %vm433_vm2, %v798_v58  ;;  %846 = vst.msk [vmem:[%s5608_s9 + $0xd8] sm:$0xff] %vm433_vm2, %v814_v59 }
 0x19e   : > { %829 = vst.msk [vmem:[%s5608_s9 + $0x50] sm:$0xff] %vm433_vm2, %v797_v62  ;;  %845 = vst.msk [vmem:[%s5608_s9 + $0xd0] sm:$0xff] %vm433_vm2, %v813_v63  ;;  %v4591_v4 = vpop.f32.mrb[12].mxu0  ;;  %v4615_v5 = vpop.f32.mrb[12].mxu1 }
 0x19f   : > { %v800_v6 = vadd.f32 %v4591_v4, %v768_v0  ;;  %v816_v7 = vadd.f32 %v4615_v5, %v784_v1  ;;  %v656_v8 = vpop.f32.mrb[13].mxu0  ;;  %v736_v9 = vpop.f32.mrb[13].mxu1 }
 0x1a0   : > { %v799_v10 = vadd.f32 %v767_v2, %v656_v8  ;;  %v815_v11 = vadd.f32 %v783_v3, %v736_v9 }
 0x1a1   : > { %832 = vst.msk [vmem:[%s5608_s9 + $0x68] sm:$0xff] %vm433_vm2, %v800_v6  ;;  %848 = vst.msk [vmem:[%s5608_s9 + $0xe8] sm:$0xff] %vm433_vm2, %v816_v7 }
 0x1a2   : > { %831 = vst.msk [vmem:[%s5608_s9 + $0x60] sm:$0xff] %vm433_vm2, %v799_v10  ;;  %847 = vst.msk [vmem:[%s5608_s9 + $0xe0] sm:$0xff] %vm433_vm2, %v815_v11  ;;  %v4594_v16 = vpop.f32.mrb[14].mxu0  ;;  %v4618_v17 = vpop.f32.mrb[14].mxu1 }
 0x1a3   : > { %v802_v18 = vadd.f32 %v4594_v16, %v770_v12  ;;  %v818_v19 = vadd.f32 %v4618_v17, %v786_v13  ;;  %v666_v52 = vpop.f32.mrb[15].mxu0  ;;  %v746_v53 = vpop.f32.mrb[15].mxu1 }
 0x1a4   : > { %v801_v54 = vadd.f32 %v769_v14, %v666_v52  ;;  %v817_v55 = vadd.f32 %v785_v15, %v746_v53 }
 0x1a5   : > { %834 = vst.msk [vmem:[%s5608_s9 + $0x78] sm:$0xff] %vm433_vm2, %v802_v18  ;;  %850 = vst.msk [vmem:[%s5608_s9 + $0xf8] sm:$0xff] %vm433_vm2, %v818_v19 }
 0x1a6   : > { %833 = vst.msk [vmem:[%s5608_s9 + $0x70] sm:$0xff] %vm433_vm2, %v801_v54  ;;  %849 = vst.msk [vmem:[%s5608_s9 + $0xf0] sm:$0xff] %vm433_vm2, %v817_v55 }
 0x1a7 PF: > { %s4482_s25 = sld [smem:[#allocation6 + $0x1]]  ;;  %s4483_s30 = sld [smem:[#allocation6 + $0x3]] }
 0x1a8   : > { %s4484_s12 = sld [smem:[#allocation6 + $0x4]] }
 0x1ad   : > { %p852_p0 = scmp.ne.s32.totalorder %s4482_s25, 0  ;;  %p854_p7 = scmp.ne.s32.totalorder %s4483_s30, 0 }
 0x1ae   : > { %p857_p5 = scmp.ne.s32.totalorder %s4484_s12, 0 }
 0x1af   : > { %p855_p12 = por %p854_p7, %p852_p0 }
 0x1b1   : > { %p858_p6 = por %p857_p5, %p855_p12 }
 0x1b3   : > { %861 = sbr.rel (!%p858_p6) target bundleno = 1316 (0x524), region = 128 }
 0x1ba   : > { %p8793_p13 = scmp.ne.s32.totalorder %s5485_s19, 0 }
 0x1bb   : > { %vm865_vm3 = vcmask (!%p8793_p13), 130048   ;;  %vm868_vm4 = vcmask (!%p8793_p13), 123904   ;;  %v5427_v56 = vmov (!%p8793_p13), 0.0  }
 0x1bc   : > { %864 = sbr.rel (%p8793_p13) target bundleno = 471 (0x1d7), region = 132  ;;  %866 = vst.msk [vmem:[#allocation2] sm:$0xff] (!%p8793_p13), %vm865_vm3, %v5427_v56  ;;  %867 = vst.msk [vmem:[#allocation2 + $0x8] sm:$0xff] (!%p8793_p13), %vm865_vm3, %v5427_v56 }
 0x1bd   : > { %870 = vst.msk [vmem:[#allocation2 + $0x18] sm:$0xff] (!%p8793_p13), %vm865_vm3, %v5427_v56  ;;  %871 = vst.msk [vmem:[#allocation2 + $0x20] sm:$0xff] (!%p8793_p13), %vm865_vm3, %v5427_v56 }
 0x1be   : > { %873 = vst.msk [vmem:[#allocation2 + $0x30] sm:$0xff] (!%p8793_p13), %vm865_vm3, %v5427_v56  ;;  %874 = vst.msk [vmem:[#allocation2 + $0x38] sm:$0xff] (!%p8793_p13), %vm865_vm3, %v5427_v56 }
 0x1bf   : > { %876 = vst.msk [vmem:[#allocation2 + $0x48] sm:$0xff] (!%p8793_p13), %vm865_vm3, %v5427_v56  ;;  %877 = vst.msk [vmem:[#allocation2 + $0x50] sm:$0xff] (!%p8793_p13), %vm865_vm3, %v5427_v56 }
 0x1c0   : > { %879 = vst.msk [vmem:[#allocation2 + $0x60] sm:$0xff] (!%p8793_p13), %vm865_vm3, %v5427_v56  ;;  %880 = vst.msk [vmem:[#allocation2 + $0x68] sm:$0xff] (!%p8793_p13), %vm865_vm3, %v5427_v56 }
 0x1c1   : > { %882 = vst.msk [vmem:[#allocation2 + $0x78] sm:$0xff] (!%p8793_p13), %vm865_vm3, %v5427_v56  ;;  %883 = vst.msk [vmem:[#allocation2 + $0x80] sm:$0xff] (!%p8793_p13), %vm865_vm3, %v5427_v56 }
 0x1c2   : > { %885 = vst.msk [vmem:[#allocation2 + $0x90] sm:$0xff] (!%p8793_p13), %vm865_vm3, %v5427_v56  ;;  %886 = vst.msk [vmem:[#allocation2 + $0x98] sm:$0xff] (!%p8793_p13), %vm865_vm3, %v5427_v56 }
 0x1c3   : > { %888 = vst.msk [vmem:[#allocation2 + $0xa8] sm:$0xff] %vm865_vm3, %v5427_v56  ;;  %889 = vst.msk [vmem:[#allocation2 + $0xb0] sm:$0xff] %vm865_vm3, %v5427_v56 }
 0x1c4   : > { %891 = vst.msk [vmem:[#allocation2 + $0xc0] sm:$0xff] %vm865_vm3, %v5427_v56  ;;  %892 = vst.msk [vmem:[#allocation2 + $0xc8] sm:$0xff] %vm865_vm3, %v5427_v56 }
 0x1c5   : > { %894 = vst.msk [vmem:[#allocation2 + $0xd8] sm:$0xff] %vm865_vm3, %v5427_v56  ;;  %895 = vst.msk [vmem:[#allocation2 + $0xe0] sm:$0xff] %vm865_vm3, %v5427_v56 }
 0x1c6   : > { %897 = vst.msk [vmem:[#allocation2 + $0xf0] sm:$0xff] %vm865_vm3, %v5427_v56  ;;  %898 = vst.msk [vmem:[#allocation2 + $0xf8] sm:$0xff] %vm865_vm3, %v5427_v56 }
 0x1c7   : > { %900 = vst.msk [vmem:[#allocation2 + $0x108] sm:$0xff] %vm865_vm3, %v5427_v56  ;;  %901 = vst.msk [vmem:[#allocation2 + $0x110] sm:$0xff] %vm865_vm3, %v5427_v56 }
 0x1c8   : > { %903 = vst.msk [vmem:[#allocation2 + $0x120] sm:$0xff] %vm865_vm3, %v5427_v56  ;;  %904 = vst.msk [vmem:[#allocation2 + $0x128] sm:$0xff] %vm865_vm3, %v5427_v56 }
 0x1c9   : > { %906 = vst.msk [vmem:[#allocation2 + $0x138] sm:$0xff] %vm865_vm3, %v5427_v56  ;;  %907 = vst.msk [vmem:[#allocation2 + $0x140] sm:$0xff] %vm865_vm3, %v5427_v56 }
 0x1ca   : > { %909 = vst.msk [vmem:[#allocation2 + $0x150] sm:$0xff] %vm865_vm3, %v5427_v56  ;;  %910 = vst.msk [vmem:[#allocation2 + $0x158] sm:$0xff] %vm865_vm3, %v5427_v56 }
 0x1cb   : > { %912 = vst.msk [vmem:[#allocation2 + $0x168] sm:$0xff] %vm865_vm3, %v5427_v56  ;;  %913 = vst.msk [vmem:[#allocation2 + $0x170] sm:$0xff] %vm865_vm3, %v5427_v56 }
 0x1cc   : > { %915 = vst.msk [vmem:[#allocation2 + $0x180] sm:$0xff] %vm865_vm3, %v5427_v56  ;;  %916 = vst.msk [vmem:[#allocation2 + $0x188] sm:$0xff] %vm865_vm3, %v5427_v56 }
 0x1cd   : > { %918 = vst.msk [vmem:[#allocation2 + $0x198] sm:$0xff] %vm865_vm3, %v5427_v56  ;;  %919 = vst.msk [vmem:[#allocation2 + $0x1a0] sm:$0xff] %vm865_vm3, %v5427_v56 }
 0x1ce   : > { %869 = vst.msk [vmem:[#allocation2 + $0x10] sm:$0x3] %vm868_vm4, %v5427_v56  ;;  %872 = vst.msk [vmem:[#allocation2 + $0x28] sm:$0x3] %vm868_vm4, %v5427_v56 }
 0x1cf   : > { %875 = vst.msk [vmem:[#allocation2 + $0x40] sm:$0x3] %vm868_vm4, %v5427_v56  ;;  %878 = vst.msk [vmem:[#allocation2 + $0x58] sm:$0x3] %vm868_vm4, %v5427_v56 }
 0x1d0   : > { %881 = vst.msk [vmem:[#allocation2 + $0x70] sm:$0x3] %vm868_vm4, %v5427_v56  ;;  %884 = vst.msk [vmem:[#allocation2 + $0x88] sm:$0x3] %vm868_vm4, %v5427_v56 }
 0x1d1   : > { %887 = vst.msk [vmem:[#allocation2 + $0xa0] sm:$0x3] %vm868_vm4, %v5427_v56  ;;  %890 = vst.msk [vmem:[#allocation2 + $0xb8] sm:$0x3] %vm868_vm4, %v5427_v56 }
 0x1d2   : > { %893 = vst.msk [vmem:[#allocation2 + $0xd0] sm:$0x3] %vm868_vm4, %v5427_v56  ;;  %896 = vst.msk [vmem:[#allocation2 + $0xe8] sm:$0x3] %vm868_vm4, %v5427_v56 }
 0x1d3   : > { %899 = vst.msk [vmem:[#allocation2 + $0x100] sm:$0x3] %vm868_vm4, %v5427_v56  ;;  %902 = vst.msk [vmem:[#allocation2 + $0x118] sm:$0x3] %vm868_vm4, %v5427_v56 }
 0x1d4   : > { %905 = vst.msk [vmem:[#allocation2 + $0x130] sm:$0x3] %vm868_vm4, %v5427_v56  ;;  %908 = vst.msk [vmem:[#allocation2 + $0x148] sm:$0x3] %vm868_vm4, %v5427_v56 }
 0x1d5   : > { %911 = vst.msk [vmem:[#allocation2 + $0x160] sm:$0x3] %vm868_vm4, %v5427_v56  ;;  %914 = vst.msk [vmem:[#allocation2 + $0x178] sm:$0x3] %vm868_vm4, %v5427_v56 }
 0x1d6   : > { %917 = vst.msk [vmem:[#allocation2 + $0x190] sm:$0x3] %vm868_vm4, %v5427_v56  ;;  %920 = vst.msk [vmem:[#allocation2 + $0x1a8] sm:$0x3] %vm868_vm4, %v5427_v56 }
 0x1d7 PF: > { %vm922_vm5 = vcmask 130048   ;;  %v6147_v57 = vld [vmem:[#allocation2] sm:$0xff]  ;;  %v6149_v58 = vld [vmem:[#allocation2 + $0x8] sm:$0xff]  ;;  %v6151_v59 = vld [vmem:[#allocation2 + $0x10] sm:$0x3]  ;;  %s6223_s8 = sld [smem:[#allocation6 + $0x1]] }
 0x1d8   : > { %8794 = vst [vmem:[#allocation19_spill] sm:$0xff] %v6147_v57  ;;  %8795 = vst [vmem:[#allocation20_spill] sm:$0xff] %v6149_v58 }
 0x1d9   : > { %8796 = vst [vmem:[#allocation21_spill] sm:$0xff] %v6151_v59  ;;  %923 = vst.msk [vmem:[#allocation2 + $0x19] sm:$0xff] %vm922_vm5, %v5673_v20  ;;  %v6217_v20 = vld [vmem:[#allocation2 + $0x198] sm:$0xff] }
 0x1da   : > { %924 = vst.msk [vmem:[#allocation2 + $0x21] sm:$0xff] %vm922_vm5, %v5676_v21  ;;  %925 = vst.msk [vmem:[#allocation2 + $0x31] sm:$0xff] %vm922_vm5, %v5679_v22  ;;  %v6219_v21 = vld [vmem:[#allocation2 + $0x1a0] sm:$0xff] }
 0x1db   : > { %926 = vst.msk [vmem:[#allocation2 + $0x39] sm:$0xff] %vm922_vm5, %v5684_v23  ;;  %927 = vst.msk [vmem:[#allocation2 + $0x49] sm:$0xff] %vm922_vm5, %v5687_v24 }
 0x1dc   : > { %928 = vst.msk [vmem:[#allocation2 + $0x51] sm:$0xff] %vm922_vm5, %v5690_v25  ;;  %929 = vst.msk [vmem:[#allocation2 + $0x61] sm:$0xff] %vm922_vm5, %v5693_v26 }
 0x1dd   : > { %930 = vst.msk [vmem:[#allocation2 + $0x69] sm:$0xff] %vm922_vm5, %v5696_v27  ;;  %931 = vst.msk [vmem:[#allocation2 + $0x79] sm:$0xff] %vm922_vm5, %v5699_v28  ;;  %v6221_v22 = vld [vmem:[#allocation2 + $0x1a8] sm:$0x3]  ;;  %p4487_p8 = scmp.eq.s32.totalorder %s6223_s8, 0 }
 0x1de   : > { %932 = vst.msk [vmem:[#allocation2 + $0x81] sm:$0xff] %vm922_vm5, %v5702_v29  ;;  %933 = vst.msk [vmem:[#allocation2 + $0x91] sm:$0xff] %vm922_vm5, %v5705_v30 }
 0x1df   : > { %934 = vst.msk [vmem:[#allocation2 + $0x99] sm:$0xff] %vm922_vm5, %v5708_v31  ;;  %935 = vst.msk [vmem:[#allocation2 + $0xa9] sm:$0xff] %vm922_vm5, %v5711_v32 }
 0x1e0   : > { %936 = vst.msk [vmem:[#allocation2 + $0xb1] sm:$0xff] %vm922_vm5, %v5714_v33  ;;  %937 = vst.msk [vmem:[#allocation2 + $0xc1] sm:$0xff] %vm922_vm5, %v5717_v34  ;;  %v6225_v23 = vld [vmem:[#allocation2 + $0x18] sm:$0xff] }
 0x1e1   : > { %938 = vst.msk [vmem:[#allocation2 + $0xc9] sm:$0xff] %vm922_vm5, %v5720_v35  ;;  %939 = vst.msk [vmem:[#allocation2 + $0xd9] sm:$0xff] %vm922_vm5, %v5723_v36  ;;  %v6227_v24 = vld [vmem:[#allocation2 + $0x20] sm:$0xff]  ;;  %v6229_v25 = vld [vmem:[#allocation2 + $0x28] sm:$0x3] }
 0x1e2   : > { %940 = vst.msk [vmem:[#allocation2 + $0xe1] sm:$0xff] %vm922_vm5, %v5726_v37  ;;  %941 = vst.msk [vmem:[#allocation2 + $0xf1] sm:$0xff] %vm922_vm5, %v5729_v38  ;;  %v6231_v26 = vld [vmem:[#allocation2 + $0x30] sm:$0xff]  ;;  %v6233_v27 = vld [vmem:[#allocation2 + $0x38] sm:$0xff] }
 0x1e3   : > { %942 = vst.msk [vmem:[#allocation2 + $0xf9] sm:$0xff] %vm922_vm5, %v5732_v39  ;;  %943 = vst.msk [vmem:[#allocation2 + $0x109] sm:$0xff] %vm922_vm5, %v5735_v40  ;;  %v6235_v28 = vld [vmem:[#allocation2 + $0x40] sm:$0x3]  ;;  %v6237_v29 = vld [vmem:[#allocation2 + $0x48] sm:$0xff] }
 0x1e4   : > { %944 = vst.msk [vmem:[#allocation2 + $0x111] sm:$0xff] %vm922_vm5, %v5738_v41  ;;  %945 = vst.msk [vmem:[#allocation2 + $0x121] sm:$0xff] %vm922_vm5, %v5741_v42  ;;  %v6239_v30 = vld [vmem:[#allocation2 + $0x50] sm:$0xff]  ;;  %v6241_v31 = vld [vmem:[#allocation2 + $0x58] sm:$0x3] }
 0x1e5   : > { %946 = vst.msk [vmem:[#allocation2 + $0x129] sm:$0xff] %vm922_vm5, %v5744_v43  ;;  %947 = vst.msk [vmem:[#allocation2 + $0x139] sm:$0xff] %vm922_vm5, %v5747_v44  ;;  %v6243_v32 = vld [vmem:[#allocation2 + $0x60] sm:$0xff]  ;;  %v6245_v33 = vld [vmem:[#allocation2 + $0x68] sm:$0xff] }
 0x1e6   : > { %948 = vst.msk [vmem:[#allocation2 + $0x141] sm:$0xff] %vm922_vm5, %v5750_v45  ;;  %949 = vst.msk [vmem:[#allocation2 + $0x151] sm:$0xff] %vm922_vm5, %v5753_v46  ;;  %v6247_v34 = vld [vmem:[#allocation2 + $0x70] sm:$0x3]  ;;  %v6249_v35 = vld [vmem:[#allocation2 + $0x78] sm:$0xff] }
 0x1e7   : > { %950 = vst.msk [vmem:[#allocation2 + $0x159] sm:$0xff] %vm922_vm5, %v5756_v47  ;;  %951 = vst.msk [vmem:[#allocation2 + $0x169] sm:$0xff] %vm922_vm5, %v5759_v48  ;;  %v6251_v36 = vld [vmem:[#allocation2 + $0x80] sm:$0xff]  ;;  %v6253_v37 = vld [vmem:[#allocation2 + $0x88] sm:$0x3] }
 0x1e8   : > { %952 = vst.msk [vmem:[#allocation2 + $0x171] sm:$0xff] %vm922_vm5, %v5762_v49  ;;  %953 = vst.msk [vmem:[#allocation2 + $0x181] sm:$0xff] %vm922_vm5, %v5765_v50  ;;  %v6255_v38 = vld [vmem:[#allocation2 + $0x90] sm:$0xff]  ;;  %v6257_v39 = vld [vmem:[#allocation2 + $0x98] sm:$0xff] }
 0x1e9   : > { %954 = vst.msk [vmem:[#allocation2 + $0x189] sm:$0xff] %vm922_vm5, %v5768_v51  ;;  %8797 = vst [vmem:[#allocation22_spill] sm:$0xff] %v6217_v20  ;;  %v6259_v40 = vld [vmem:[#allocation2 + $0xa0] sm:$0x3]  ;;  %v6261_v41 = vld [vmem:[#allocation2 + $0xa8] sm:$0xff] }
 0x1ea   : > { %8798 = vst [vmem:[#allocation23_spill] sm:$0xff] %v6219_v21  ;;  %8799 = vst [vmem:[#allocation24_spill] sm:$0xff] %v6221_v22  ;;  %v6263_v42 = vld [vmem:[#allocation2 + $0xb0] sm:$0xff]  ;;  %v6265_v43 = vld [vmem:[#allocation2 + $0xb8] sm:$0x3] }
 0x1eb   : > { %8800 = vst [vmem:[#allocation25_spill] sm:$0xff] %v6225_v23  ;;  %8801 = vst [vmem:[#allocation26_spill] sm:$0xff] %v6227_v24  ;;  %v6267_v44 = vld [vmem:[#allocation2 + $0xc0] sm:$0xff]  ;;  %v6269_v45 = vld [vmem:[#allocation2 + $0xc8] sm:$0xff] }
 0x1ec   : > { %8802 = vst [vmem:[#allocation27_spill] sm:$0xff] %v6229_v25  ;;  %8803 = vst [vmem:[#allocation28_spill] sm:$0xff] %v6231_v26  ;;  %v6271_v46 = vld [vmem:[#allocation2 + $0xd0] sm:$0x3]  ;;  %v6273_v47 = vld [vmem:[#allocation2 + $0xd8] sm:$0xff] }
 0x1ed   : > { %8804 = vst [vmem:[#allocation29_spill] sm:$0xff] %v6233_v27  ;;  %8805 = vst [vmem:[#allocation30_spill] sm:$0xff] %v6235_v28  ;;  %v6275_v48 = vld [vmem:[#allocation2 + $0xe0] sm:$0xff]  ;;  %v6277_v49 = vld [vmem:[#allocation2 + $0xe8] sm:$0x3] }
 0x1ee   : > { %8806 = vst [vmem:[#allocation31_spill] sm:$0xff] %v6237_v29  ;;  %8807 = vst [vmem:[#allocation32_spill] sm:$0xff] %v6239_v30  ;;  %v6279_v50 = vld [vmem:[#allocation2 + $0xf0] sm:$0xff]  ;;  %v6281_v51 = vld [vmem:[#allocation2 + $0xf8] sm:$0xff] }
 0x1ef   : > { %8808 = vst [vmem:[#allocation33_spill] sm:$0xff] %v6241_v31  ;;  %8809 = vst [vmem:[#allocation34_spill] sm:$0xff] %v6243_v32  ;;  %v6283_v60 = vld [vmem:[#allocation2 + $0x100] sm:$0x3]  ;;  %v6285_v61 = vld [vmem:[#allocation2 + $0x108] sm:$0xff] }
 0x1f0   : > { %8810 = vst [vmem:[#allocation35_spill] sm:$0xff] %v6245_v33  ;;  %8811 = vst [vmem:[#allocation36_spill] sm:$0xff] %v6247_v34  ;;  %v6287_v62 = vld [vmem:[#allocation2 + $0x110] sm:$0xff]  ;;  %v6289_v63 = vld [vmem:[#allocation2 + $0x118] sm:$0x3] }
 0x1f1   : > { %8812 = vst [vmem:[#allocation37_spill] sm:$0xff] %v6249_v35  ;;  %8813 = vst [vmem:[#allocation38_spill] sm:$0xff] %v6251_v36  ;;  %v6291_v0 = vld [vmem:[#allocation2 + $0x120] sm:$0xff]  ;;  %v6293_v1 = vld [vmem:[#allocation2 + $0x128] sm:$0xff] }
 0x1f2   : > { %8814 = vst [vmem:[#allocation39_spill] sm:$0xff] %v6253_v37  ;;  %8815 = vst [vmem:[#allocation40_spill] sm:$0xff] %v6255_v38  ;;  %v6295_v2 = vld [vmem:[#allocation2 + $0x130] sm:$0x3]  ;;  %v6297_v3 = vld [vmem:[#allocation2 + $0x138] sm:$0xff] }
 0x1f3   : > { %8816 = vst [vmem:[#allocation41_spill] sm:$0xff] %v6257_v39  ;;  %8817 = vst [vmem:[#allocation42_spill] sm:$0xff] %v6259_v40  ;;  %v6299_v4 = vld [vmem:[#allocation2 + $0x140] sm:$0xff]  ;;  %v6301_v5 = vld [vmem:[#allocation2 + $0x148] sm:$0x3] }
 0x1f4   : > { %8818 = vst [vmem:[#allocation43_spill] sm:$0xff] %v6261_v41  ;;  %8819 = vst [vmem:[#allocation44_spill] sm:$0xff] %v6263_v42  ;;  %v6303_v6 = vld [vmem:[#allocation2 + $0x150] sm:$0xff]  ;;  %v6305_v7 = vld [vmem:[#allocation2 + $0x158] sm:$0xff] }
 0x1f5   : > { %8820 = vst [vmem:[#allocation45_spill] sm:$0xff] %v6265_v43  ;;  %8821 = vst [vmem:[#allocation46_spill] sm:$0xff] %v6267_v44  ;;  %v6307_v8 = vld [vmem:[#allocation2 + $0x160] sm:$0x3]  ;;  %v6309_v9 = vld [vmem:[#allocation2 + $0x168] sm:$0xff] }
 0x1f6   : > { %8822 = vst [vmem:[#allocation47_spill] sm:$0xff] %v6269_v45  ;;  %8823 = vst [vmem:[#allocation48_spill] sm:$0xff] %v6271_v46  ;;  %v6311_v10 = vld [vmem:[#allocation2 + $0x170] sm:$0xff]  ;;  %v6313_v11 = vld [vmem:[#allocation2 + $0x178] sm:$0x3] }
 0x1f7   : > { %8824 = vst [vmem:[#allocation49_spill] sm:$0xff] %v6277_v49  ;;  %8825 = vst [vmem:[#allocation50_spill] sm:$0xff] %v6279_v50  ;;  %v6315_v12 = vld [vmem:[#allocation2 + $0x28] sm:$0x3]  ;;  %v6317_v13 = vld [vmem:[#allocation2 + $0x40] sm:$0x3] }
 0x1f8   : > { %8826 = vst [vmem:[#allocation51_spill] sm:$0xff] %v6281_v51  ;;  %8827 = vst [vmem:[#allocation52_spill] sm:$0xff] %v6283_v60  ;;  %v6319_v14 = vld [vmem:[#allocation2 + $0x58] sm:$0x3]  ;;  %v6321_v15 = vld [vmem:[#allocation2 + $0x70] sm:$0x3] }
 0x1f9   : > { %8828 = vst [vmem:[#allocation53_spill] sm:$0xff] %v6285_v61  ;;  %8829 = vst [vmem:[#allocation54_spill] sm:$0xff] %v6287_v62  ;;  %v6323_v16 = vld [vmem:[#allocation2 + $0x88] sm:$0x3]  ;;  %v6325_v17 = vld [vmem:[#allocation2 + $0xa0] sm:$0x3] }
 0x1fa   : > { %8830 = vst [vmem:[#allocation55_spill] sm:$0xff] %v6289_v63  ;;  %8831 = vst [vmem:[#allocation56_spill] sm:$0xff] %v6291_v0  ;;  %v6327_v18 = vld [vmem:[#allocation2 + $0xb8] sm:$0x3]  ;;  %v6329_v19 = vld [vmem:[#allocation2 + $0xd0] sm:$0x3] }
 0x1fb   : > { %8832 = vst [vmem:[#allocation57_spill] sm:$0xff] %v6293_v1  ;;  %8833 = vst [vmem:[#allocation58_spill] sm:$0xff] %v6295_v2  ;;  %v6331_v52 = vld [vmem:[#allocation2 + $0xe8] sm:$0x3]  ;;  %v6333_v53 = vld [vmem:[#allocation2 + $0x100] sm:$0x3] }
 0x1fc   : > { %8834 = vst [vmem:[#allocation59_spill] sm:$0xff] %v6297_v3  ;;  %8835 = vst [vmem:[#allocation60_spill] sm:$0xff] %v6299_v4  ;;  %v6335_v54 = vld [vmem:[#allocation2 + $0x118] sm:$0x3]  ;;  %v6337_v55 = vld [vmem:[#allocation2 + $0x130] sm:$0x3] }
 0x1fd   : > { %8836 = vst [vmem:[#allocation61_spill] sm:$0xff] %v6301_v5  ;;  %8837 = vst [vmem:[#allocation62_spill] sm:$0xff] %v6303_v6  ;;  %v6339_v56 = vld [vmem:[#allocation2 + $0x148] sm:$0x3]  ;;  %v6341_v22 = vld [vmem:[#allocation2 + $0x160] sm:$0x3] }
 0x1fe   : > { %8838 = vst [vmem:[#allocation63_spill] sm:$0xff] %v6305_v7  ;;  %8839 = vst [vmem:[#allocation64_spill] sm:$0xff] %v6307_v8  ;;  %v6343_v21 = vld [vmem:[#allocation2 + $0x178] sm:$0x3]  ;;  %v6345_v20 = vld [vmem:[#allocation2 + $0x180] sm:$0xff] }
 0x1ff   : > { %8840 = vst [vmem:[#allocation65_spill] sm:$0xff] %v6309_v9  ;;  %8841 = vst [vmem:[#allocation66_spill] sm:$0xff] %v6311_v10 }
 0x200   : > { %8842 = vst [vmem:[#allocation67_spill] sm:$0xff] %v6313_v11  ;;  %8843 = vst [vmem:[#allocation68_spill] sm:$0xff] %v6315_v12 }
 0x201   : > { %8844 = vst [vmem:[#allocation69_spill] sm:$0xff] %v6317_v13  ;;  %8845 = vst [vmem:[#allocation70_spill] sm:$0xff] %v6319_v14  ;;  %v6373_v14 = vld [vmem:[#allocation2 + $0x148] sm:$0x3] }
 0x202   : > { %8846 = vst [vmem:[#allocation71_spill] sm:$0xff] %v6321_v15  ;;  %8847 = vst [vmem:[#allocation72_spill] sm:$0xff] %v6323_v16  ;;  %v6353_v16 = vld [vmem:[#allocation2 + $0x58] sm:$0x3]  ;;  %v6355_v15 = vld [vmem:[#allocation2 + $0x70] sm:$0x3] }
 0x203   : > { %8848 = vst [vmem:[#allocation73_spill] sm:$0xff] %v6325_v17  ;;  %8849 = vst [vmem:[#allocation74_spill] sm:$0xff] %v6327_v18  ;;  %v6347_v17 = vld [vmem:[#allocation2 + $0x188] sm:$0xff]  ;;  %v6349_v18 = vld [vmem:[#allocation2 + $0x190] sm:$0x3] }
 0x204   : > { %8850 = vst [vmem:[#allocation75_spill] sm:$0xff] %v6329_v19  ;;  %8851 = vst [vmem:[#allocation76_spill] sm:$0xff] %v6331_v52  ;;  %v6351_v19 = vld [vmem:[#allocation2 + $0x40] sm:$0x3] }
 0x205   : > { %8852 = vst [vmem:[#allocation77_spill] sm:$0xff] %v6333_v53  ;;  %8853 = vst [vmem:[#allocation78_spill] sm:$0xff] %v6335_v54  ;;  %v6357_v54 = vld [vmem:[#allocation2 + $0x88] sm:$0x3] }
 0x206   : > { %8854 = vst [vmem:[#allocation79_spill] sm:$0xff] %v6337_v55  ;;  %8855 = vst [vmem:[#allocation80_spill] sm:$0xff] %v6339_v56  ;;  %v6359_v55 = vld [vmem:[#allocation2 + $0xa0] sm:$0x3]  ;;  %v6361_v56 = vld [vmem:[#allocation2 + $0xb8] sm:$0x3] }
 0x207   : > { %8856 = vst [vmem:[#allocation81_spill] sm:$0xff] %v6341_v22  ;;  %8857 = vst [vmem:[#allocation82_spill] sm:$0xff] %v6343_v21  ;;  %v6363_v22 = vld [vmem:[#allocation2 + $0xd0] sm:$0x3]  ;;  %v6365_v21 = vld [vmem:[#allocation2 + $0xe8] sm:$0x3] }
 0x208   : > { %8858 = vst [vmem:[#allocation83_spill] sm:$0xff] %v6345_v20  ;;  %8859 = vst [vmem:[#allocation84_spill] sm:$0xff] %v6347_v17  ;;  %v6367_v20 = vld [vmem:[#allocation2 + $0x100] sm:$0x3]  ;;  %v6369_v17 = vld [vmem:[#allocation2 + $0x118] sm:$0x3] }
 0x209   : > { %8860 = vst [vmem:[#allocation85_spill] sm:$0xff] %v6349_v18  ;;  %8861 = vst [vmem:[#allocation86_spill] sm:$0xff] %v6351_v19  ;;  %v6371_v18 = vld [vmem:[#allocation2 + $0x130] sm:$0x3] }
 0x20a   : > { %8862 = vst [vmem:[#allocation87_spill] sm:$0xff] %v6353_v16  ;;  %8863 = vst [vmem:[#allocation88_spill] sm:$0xff] %v6355_v15  ;;  %v6375_v16 = vld [vmem:[#allocation2 + $0x160] sm:$0x3]  ;;  %v6377_v15 = vld [vmem:[#allocation2 + $0x178] sm:$0x3] }
 0x20b   : > { %8864 = vst [vmem:[#allocation89_spill] sm:$0xff] %v6357_v54  ;;  %8865 = vst [vmem:[#allocation90_spill] sm:$0xff] %v6359_v55  ;;  %v6379_v54 = vld [vmem:[#allocation2 + $0x190] sm:$0x3]  ;;  %1104 = sbr.rel (%p4487_p8) target bundleno = 1090 (0x442), region = 136 }
 0x20c   : > { %8866 = vst [vmem:[#allocation91_spill] sm:$0xff] %v6361_v56  ;;  %8867 = vst [vmem:[#allocation92_spill] sm:$0xff] %v6363_v22 }
 0x20d   : > { %8868 = vst [vmem:[#allocation93_spill] sm:$0xff] %v6365_v21  ;;  %8869 = vst [vmem:[#allocation94_spill] sm:$0xff] %v6367_v20 }
 0x20e   : > { %8870 = vst [vmem:[#allocation95_spill] sm:$0xff] %v6369_v17  ;;  %8871 = vst [vmem:[#allocation96_spill] sm:$0xff] %v6371_v18 }
 0x20f   : > { %8872 = vst [vmem:[#allocation97_spill] sm:$0xff] %v6373_v14  ;;  %8873 = vst [vmem:[#allocation98_spill] sm:$0xff] %v6375_v16 }
 0x210   : > { %8874 = vst [vmem:[#allocation99_spill] sm:$0xff] %v6377_v15  ;;  %8875 = vst [vmem:[#allocation100_spill] sm:$0xff] %v6379_v54 }
 0x212   : > { %vm1153_vm6 = vcmask 1046528   ;;  %v1164_v21 = vrot.slane %v6231_v26, 1  ;;  %v6384_v22 = vrot.slane %v6233_v27, 1  ;;  %v1167_v56 = vrot.slane %v6235_v28, 1  ;;  %s5428_s26 = smov 16   ;;  %s5429_s13 = smov 32  }
 0x213   : > { %v1154_v55 = vrot.slane %v6147_v57, 1  ;;  %v1155_v14 = vrot.slane %v6149_v58, 1  ;;  %v1157_v16 = vrot.slane %v6151_v59, 1  ;;  %v1169_v15 = vrot.slane %v6237_v29, 1  ;;  %s5430_s14 = smov 64   ;;  %s5431_s22 = smov 48  }
 0x214   : > { %8876 = vst [vmem:[#allocation101_spill] sm:$0xff] %v6384_v22  ;;  %v6393_v54 = vsel %vm1153_vm6, %v1164_v21, %v6384_v22  ;;  %v1168_v18 = vsel %vm1153_vm6, %v6384_v22, %v1167_v56  ;;  %v6398_v17 = vrot.slane %v6239_v30, 1  ;;  %v1172_v53 = vrot.slane %v6241_v31, 1  ;;  %s5432_s23 = smov 96   ;;  %s5433_s5 = smov 80  }
 0x215   : > { %8877 = vst [vmem:[#allocation102_spill] sm:$0xff] %v6393_v54  ;;  %v4751_v13 = vpack.i.bf16 %v1168_v18, %v6393_v54  ;;  %v1156_v20 = vsel %vm1153_vm6, %v1154_v55, %v1155_v14  ;;  %v1158_v19 = vsel %vm1153_vm6, %v1155_v14, %v1157_v16  ;;  %v1159_v52 = vrot.slane %v6225_v23, 1  ;;  %s5434_s7 = smov 112  }
 0x216   : > { %8878 = vst [vmem:[#allocation103_spill] sm:$0xff] %v6398_v17  ;;  %v4741_v12 = vpack.i.bf16 %v1158_v19, %v1156_v20  ;;  %v6407_v21 = vsel %vm1153_vm6, %v1169_v15, %v6398_v17  ;;  %v1173_v56 = vsel %vm1153_vm6, %v6398_v17, %v1172_v53  ;;  %v6412_v22 = vrot.slane %v6227_v24, 1 }
 0x217   : > { %8879 = vst [vmem:[#allocation104_spill] sm:$0xff] %v6407_v21  ;;  %4752 = vrot.lane.b32.xlu1 %v4751_v13, %s5428_s26  ;;  %v4756_v18 = vpack.i.bf16 %v1173_v56, %v6407_v21  ;;  %v1162_v14 = vrot.slane %v6229_v25, 1  ;;  %v1179_v16 = vrot.slane %v6249_v35, 1  ;;  %v6419_v20 = vrot.slane %v6251_v36, 1 }
 0x218   : > { %8880 = vst [vmem:[#allocation105_spill] sm:$0xff] %v6412_v22  ;;  %4742 = vrot.lane.b32.xlu0 %v4741_v12, %s5428_s26  ;;  %v6424_v15 = vsel %vm1153_vm6, %v1159_v52, %v6412_v22  ;;  %v1182_v19 = vrot.slane %v6253_v37, 1  ;;  %v1174_v53 = vrot.slane %v6243_v32, 1  ;;  %v6429_v13 = vrot.slane %v6245_v33, 1 }
 0x219   : > { %8881 = vst [vmem:[#allocation106_spill] sm:$0xff] %v6419_v20  ;;  %8882 = vst [vmem:[#allocation107_spill] sm:$0xff] %v6424_v15  ;;  %v1163_v55 = vsel %vm1153_vm6, %v6412_v22, %v1162_v14  ;;  %v6435_v56 = vsel %vm1153_vm6, %v1179_v16, %v6419_v20  ;;  %v1177_v12 = vrot.slane %v6247_v34, 1  ;;  %v1189_v17 = vrot.slane %v6261_v41, 1 }
 0x21a   : > { %8883 = vst [vmem:[#allocation108_spill] sm:$0xff] %v6429_v13  ;;  %8884 = vst [vmem:[#allocation109_spill] sm:$0xff] %v6435_v56  ;;  %v4746_v52 = vpack.i.bf16 %v1163_v55, %v6424_v15  ;;  %v1183_v21 = vsel %vm1153_vm6, %v6419_v20, %v1182_v19  ;;  %v6444_v54 = vsel %vm1153_vm6, %v1174_v53, %v6429_v13  ;;  %v6447_v33 = vrot.slane %v6263_v42, 1 }
 0x21b   : > { %8885 = vst [vmem:[#allocation110_spill] sm:$0xff] %v6444_v54  ;;  %4757 = vrot.lane.b32.xlu1 %v4756_v18, %s5428_s26  ;;  %v4766_v14 = vpack.i.bf16 %v1183_v21, %v6435_v56  ;;  %v1178_v16 = vsel %vm1153_vm6, %v6429_v13, %v1177_v12  ;;  %v1192_v22 = vrot.slane %v6265_v43, 1  ;;  %v1184_v55 = vrot.slane %v6255_v38, 1 }
 0x21c   : > { %8886 = vst [vmem:[#allocation111_spill] sm:$0xff] %v6447_v33  ;;  %4747 = vrot.lane.b32.xlu0 %v4746_v52, %s5428_s26  ;;  %v4761_v19 = vpack.i.bf16 %v1178_v16, %v6444_v54  ;;  %v6459_v53 = vsel %vm1153_vm6, %v1189_v17, %v6447_v33  ;;  %v6462_v20 = vrot.slane %v6257_v39, 1  ;;  %v1187_v21 = vrot.slane %v6259_v40, 1 }
 0x21d   : > { %8887 = vst [vmem:[#allocation112_spill] sm:$0xff] %v6459_v53  ;;  %v1193_v18 = vsel %vm1153_vm6, %v6447_v33, %v1192_v22  ;;  %v1199_v12 = vrot.slane %v6273_v47, 1  ;;  %v6469_v56 = vrot.slane %v6275_v48, 1  ;;  %v1202_v52 = vrot.slane %v6277_v49, 1 }
 0x21e   : > { %8888 = vst [vmem:[#allocation113_spill] sm:$0xff] %v6462_v20  ;;  %v6474_v16 = vsel %vm1153_vm6, %v1184_v55, %v6462_v20  ;;  %v1188_v17 = vsel %vm1153_vm6, %v6462_v20, %v1187_v21  ;;  %v1194_v13 = vrot.slane %v6267_v44, 1  ;;  %v4776_v22 = vpack.i.bf16 %v1193_v18, %v6459_v53 }
 0x21f   : > { %8889 = vst [vmem:[#allocation114_spill] sm:$0xff] %v6469_v56  ;;  %8890 = vst [vmem:[#allocation115_spill] sm:$0xff] %v6474_v16  ;;  %4767 = vrot.lane.b32.xlu1 %v4766_v14, %s5428_s26  ;;  %v6483_v33 = vsel %vm1153_vm6, %v1199_v12, %v6469_v56  ;;  %v1203_v54 = vsel %vm1153_vm6, %v6469_v56, %v1202_v52  ;;  %v6488_v15 = vrot.slane %v6269_v45, 1  ;;  %v1197_v21 = vrot.slane %v6271_v46, 1 }
 0x220   : > { %8891 = vst [vmem:[#allocation116_spill] sm:$0xff] %v6483_v33  ;;  %4762 = vrot.lane.b32.xlu0 %v4761_v19, %s5428_s26  ;;  %v4771_v55 = vpack.i.bf16 %v1188_v17, %v6474_v16  ;;  %v1209_v14 = vrot.slane %v6285_v61, 1  ;;  %v6495_v18 = vrot.slane %v6287_v62, 1  ;;  %v1212_v52 = vrot.slane %v6289_v63, 1 }
 0x221   : > { %8892 = vst [vmem:[#allocation117_spill] sm:$0xff] %v6488_v15  ;;  %v6499_v12 = vsel %vm1153_vm6, %v1194_v13, %v6488_v15  ;;  %v1204_v53 = vrot.slane %v6279_v50, 1  ;;  %v6504_v20 = vrot.slane %v6281_v51, 1  ;;  %v4786_v19 = vpack.i.bf16 %v1203_v54, %v6483_v33 }
 0x222   : > { %8893 = vst [vmem:[#allocation118_spill] sm:$0xff] %v6499_v12  ;;  %v1198_v17 = vsel %vm1153_vm6, %v6488_v15, %v1197_v21  ;;  %v1207_v16 = vrot.slane %v6283_v60, 1  ;;  %v1219_v56 = vrot.slane %v6297_v3, 1  ;;  %v6514_v13 = vsel %vm1153_vm6, %v1209_v14, %v6495_v18 }
 0x223   : > { %4777 = vrot.lane.b32.xlu1 %v4776_v22, %s5428_s26  ;;  %v1213_v50 = vsel %vm1153_vm6, %v6495_v18, %v1212_v52  ;;  %v6520_v51 = vsel %vm1153_vm6, %v1204_v53, %v6504_v20  ;;  %v6523_v54 = vrot.slane %v6299_v4, 1  ;;  %v4781_v21 = vpack.i.bf16 %v1198_v17, %v6499_v12 }
 0x224   : > { %4772 = vrot.lane.b32.xlu0 %v4771_v55, %s5428_s26  ;;  %v1208_v22 = vsel %vm1153_vm6, %v6504_v20, %v1207_v16  ;;  %v1222_v14 = vrot.slane %v6301_v5, 1  ;;  %v1214_v15 = vrot.slane %v6291_v0, 1  ;;  %v6532_v52 = vrot.slane %v6293_v1, 1 }
 0x225   : > { %v1217_v53 = vrot.slane %v6295_v2, 1  ;;  %v4796_v3 = vpack.i.bf16 %v1213_v50, %v6514_v13  ;;  %v4791_v4 = vpack.i.bf16 %v1208_v22, %v6520_v51  ;;  %v6539_v55 = vsel %vm1153_vm6, %v1219_v56, %v6523_v54 }
 0x226   : > { %v1223_v16 = vsel %vm1153_vm6, %v6523_v54, %v1222_v14  ;;  %v1229_v17 = vrot.slane %v6309_v9, 1  ;;  %v6546_v12 = vrot.slane %v6311_v10, 1  ;;  %v1232_v5 = vrot.slane %v6313_v11, 1 }
 0x227   : > { %4787 = vrot.lane.b32.xlu1 %v4786_v19, %s5428_s26  ;;  %v6552_v50 = vsel %vm1153_vm6, %v1214_v15, %v6532_v52  ;;  %v1218_v56 = vsel %vm1153_vm6, %v6532_v52, %v1217_v53  ;;  %v1224_v19 = vrot.slane %v6303_v6, 1  ;;  %v6558_v22 = vrot.slane %v6305_v7, 1 }
 0x228   : > { %8894 = vst [vmem:[#allocation119_spill] sm:$0xff] %v6546_v12  ;;  %4782 = vrot.lane.b32.xlu0 %v4781_v21, %s5428_s26  ;;  %v1227_v14 = vrot.slane %v6307_v8, 1  ;;  %v1240_v10 = vrot.slane %v6225_v23, 2  ;;  %vm1234_vm7 = vcmask 1045504   ;;  %v6563_v11 = vrot.slane %v6227_v24, 2 }
 0x229   : > { %8895 = vst [vmem:[#allocation120_spill] sm:$0xff] %v6558_v22  ;;  %v1243_v21 = vrot.slane %v6229_v25, 2  ;;  %v4806_v15 = vpack.i.bf16 %v1223_v16, %v6539_v55  ;;  %v4801_v53 = vpack.i.bf16 %v1218_v56, %v6552_v50  ;;  %v6571_v9 = vsel %vm1153_vm6, %v1229_v17, %v6546_v12 }
 0x22a   : > { %8896 = vst [vmem:[#allocation121_spill] sm:$0xff] %v6571_v9  ;;  %v1233_v8 = vsel %vm1153_vm6, %v6546_v12, %v1232_v5  ;;  %v6578_v7 = vsel %vm1153_vm6, %v1224_v19, %v6558_v22  ;;  %v1235_v25 = vrot.slane %v6147_v57, 2  ;;  %v1228_v16 = vsel %vm1153_vm6, %v6558_v22, %v1227_v14 }
 0x22b   : > { %4797 = vrot.lane.b32.xlu1 %v4796_v3, %s5428_s26  ;;  %8897 = vst [vmem:[#allocation122_spill] sm:$0xff] %v6578_v7  ;;  %v1236_v3 = vrot.slane %v6149_v58, 2  ;;  %v6586_v17 = vsel %vm1234_vm7, %v1240_v10, %v6563_v11  ;;  %v1238_v5 = vrot.slane %v6151_v59, 2  ;;  %v1250_v56 = vrot.slane %v6237_v29, 2 }
 0x22c   : > { %4792 = vrot.lane.b32.xlu0 %v4791_v4, %s5428_s26  ;;  %v1244_v4 = vsel %vm1234_vm7, %v6563_v11, %v1243_v21  ;;  %v6593_v19 = vrot.slane %v6239_v30, 2  ;;  %v4816_v57 = vpack.i.bf16 %v1233_v8, %v6571_v9  ;;  %v1253_v14 = vrot.slane %v6241_v31, 2 }
 0x22d   : > { %v4811_v10 = vpack.i.bf16 %v1228_v16, %v6578_v7  ;;  %v4826_v58 = vpack.i.bf16 %v1244_v4, %v6586_v17  ;;  %v1237_v21 = vsel %vm1234_vm7, %v1235_v25, %v1236_v3  ;;  %v1239_v59 = vsel %vm1234_vm7, %v1236_v3, %v1238_v5  ;;  %v8899_v5 = vld [vmem:[#allocation35_spill] sm:$0xff] }
 0x22e   : > { %v1245_v12 = vrot.slane %v6231_v26, 2  ;;  %v6605_v22 = vrot.slane %v6233_v27, 2  ;;  %v6610_v8 = vsel %vm1234_vm7, %v1250_v56, %v6593_v19  ;;  %v6614_v16 = vrot.slane %v6251_v36, 2 }
 0x22f   : > { %4807 = vrot.lane.b32.xlu1 %v4806_v15, %s5428_s26  ;;  %v1248_v15 = vrot.slane %v6235_v28, 2  ;;  %v1263_v25 = vrot.slane %v6253_v37, 2  ;;  %v1254_v3 = vsel %vm1234_vm7, %v6593_v19, %v1253_v14  ;;  %v1255_v4 = vrot.slane %v6243_v32, 2 }
 0x230   : > { %4802 = vrot.lane.b32.xlu0 %v4801_v53, %s5428_s26  ;;  %v1260_v53 = vrot.slane %v6249_v35, 2  ;;  %8898 = vst [vmem:[#allocation123_spill] sm:$0xff] %v6614_v16  ;;  %v6622_v31 = vrot.slane %v8899_v5, 2  ;;  %v1258_v56 = vrot.slane %v6247_v34, 2  ;;  %v4821_v28 = vpack.i.bf16 %v1239_v59, %v1237_v21 }
 0x231   : > { %v6628_v9 = vsel %vm1234_vm7, %v1245_v12, %v6605_v22  ;;  %v4836_v37 = vpack.i.bf16 %v1254_v3, %v6610_v8  ;;  %v1264_v7 = vsel %vm1234_vm7, %v6614_v16, %v1263_v25  ;;  %v1270_v34 = vrot.slane %v6261_v41, 2 }
 0x232   : > { %8900 = vst [vmem:[#allocation124_spill] sm:$0xff] %v6622_v31  ;;  %v6635_v14 = vsel %vm1234_vm7, %v1260_v53, %v6614_v16  ;;  %v6643_v59 = vsel %vm1234_vm7, %v1255_v4, %v6622_v31  ;;  %v1259_v12 = vsel %vm1234_vm7, %v6622_v31, %v1258_v56  ;;  %v1273_v21 = vrot.slane %v6265_v43, 2  ;;  %4488 = vmatprep.mubr.msk.f32.mxu0 %vm922_vm5, %v6628_v9 }
 0x233   : > { %4817 = vrot.lane.b32.xlu1 %v4816_v57, %s5428_s26  ;;  %v1249_v57 = vsel %vm1234_vm7, %v6605_v22, %v1248_v15  ;;  %8901 = vst [vmem:[#allocation125_spill] sm:$0xff] %v6635_v14  ;;  %8902 = vst [vmem:[#allocation126_spill] sm:$0xff] %v6643_v59  ;;  %v1265_v53 = vrot.slane %v6255_v38, 2  ;;  %v1268_v25 = vrot.slane %v6259_v40, 2  ;;  %v4846_v3 = vpack.i.bf16 %v1264_v7, %v6635_v14 }
 0x234   : > { %4812 = vrot.lane.b32.xlu0 %v4811_v10, %s5428_s26  ;;  %v6648_v10 = vrot.slane %v6263_v42, 2  ;;  %v4831_v15 = vpack.i.bf16 %v1249_v57, %v6628_v9  ;;  %v4841_v4 = vpack.i.bf16 %v1259_v12, %v6643_v59  ;;  %v1280_v57 = vrot.slane %v6273_v47, 2 }
 0x235   : > { %v6669_v43 = vrot.slane %v6275_v48, 2  ;;  %v1283_v7 = vrot.slane %v6277_v49, 2  ;;  %v1275_v12 = vrot.slane %v6267_v44, 2  ;;  %v1290_v49 = vrot.slane %v6285_v61, 2  ;;  %v8911_v44 = vld [vmem:[#allocation51_spill] sm:$0xff] }
 0x236   : > { %8903 = vst [vmem:[#allocation127_spill] sm:$0xff] %v6648_v10  ;;  %v6663_v56 = vsel %vm1234_vm7, %v1270_v34, %v6648_v10  ;;  %v1278_v34 = vrot.slane %v6271_v46, 2  ;;  %v1293_v46 = vrot.slane %v6289_v63, 2  ;;  %v6707_v42 = vrot.slane %v8911_v44, 2 }
 0x237   : > { %4827 = vrot.lane.b32.xlu1 %v4826_v58, %s5429_s13  ;;  %v6655_v58 = vrot.slane %v6257_v39, 2  ;;  %8905 = vst [vmem:[#allocation129_spill] sm:$0xff] %v6663_v56  ;;  %8906 = vst [vmem:[#allocation130_spill] sm:$0xff] %v6669_v43  ;;  %v1288_v63 = vrot.slane %v6283_v60, 2  ;;  %v8916_v60 = vld [vmem:[#allocation105_spill] sm:$0xff]  ;;  %vm2435_vm8 = vcmask 261120  }
 0x238   : > { %4822 = vrot.lane.b32.xlu0 %v4821_v28, %s5429_s13  ;;  %v1274_v28 = vsel %vm1234_vm7, %v6648_v10, %v1273_v21  ;;  %vm2468_vm9 = vcmask 392192   ;;  %vm2501_vm10 = vcmask 523264   ;;  %vm2534_vm11 = vcmask 654336  }
 0x239   : > { %8904 = vst [vmem:[#allocation128_spill] sm:$0xff] %v6655_v58  ;;  %v6680_v40 = vsel %vm1234_vm7, %v1265_v53, %v6655_v58  ;;  %v1269_v21 = vsel %vm1234_vm7, %v6655_v58, %v1268_v25  ;;  %v4856_v10 = vpack.i.bf16 %v1274_v28, %v6663_v56  ;;  %v1284_v25 = vsel %vm1234_vm7, %v6669_v43, %v1283_v7 }
 0x23a   : > { %8908 = vst [vmem:[#allocation132_spill] sm:$0xff] %v6680_v40  ;;  %v4851_v53 = vpack.i.bf16 %v1269_v21, %v6680_v40  ;;  %vm2567_vm12 = vcmask 785408   ;;  %vm2600_vm13 = vcmask 916480  }
 0x23b   : > { %4837 = vrot.lane.b32.xlu1 %v4836_v37, %s5429_s13  ;;  %v6675_v37 = vrot.slane %v6269_v45, 2  ;;  %v6692_v45 = vrot.slane %v6287_v62, 2 }
 0x23c   : > { %4832 = vrot.lane.b32.xlu0 %v4831_v15, %s5429_s13  ;;  %v6688_v15 = vsel %vm1234_vm7, %v1280_v57, %v6669_v43  ;;  %v8910_v57 = vld [vmem:[#allocation50_spill] sm:$0xff] }
 0x23d   : > { %8907 = vst [vmem:[#allocation131_spill] sm:$0xff] %v6675_v37  ;;  %8909 = vst [vmem:[#allocation133_spill] sm:$0xff] %v6688_v15  ;;  %v1279_v28 = vsel %vm1234_vm7, %v6675_v37, %v1278_v34  ;;  %v1285_v56 = vrot.slane %v8910_v57, 2  ;;  %v1294_v34 = vsel %vm1234_vm7, %v6692_v45, %v1293_v46  ;;  %v8912_v46 = vld [vmem:[#allocation107_spill] sm:$0xff] }
 0x23f   : > { %4847 = vrot.lane.b32.xlu1 %v4846_v3, %s5429_s13  ;;  %v6701_v3 = vsel %vm1234_vm7, %v1275_v12, %v6675_v37  ;;  %v6715_v12 = vsel %vm1234_vm7, %v1290_v49, %v6692_v45  ;;  %v6722_v21 = vsel %vm1234_vm7, %v1285_v56, %v6707_v42  ;;  %v4881_v56 = vpack.i.bf16 %v6273_v47, %v6225_v23  ;;  %v8919_v37 = vld [vmem:[#allocation94_spill] sm:$0xff] }
 0x240   : > { %4842 = vrot.lane.b32.xlu0 %v4841_v4, %s5429_s13  ;;  %v4866_v4 = vpack.i.bf16 %v1284_v25, %v6688_v15  ;;  %v4861_v7 = vpack.i.bf16 %v1279_v28, %v6701_v3  ;;  %v4876_v25 = vpack.i.bf16 %v1294_v34, %v6715_v12  ;;  %v8913_v28 = vld [vmem:[#allocation68_spill] sm:$0xff]  ;;  %4504 = vmatprep.mubr.msk.f32.mxu1 %vm922_vm5, %v6722_v21 }
 0x241   : > { %v8914_v34 = vld [vmem:[#allocation76_spill] sm:$0xff] }
 0x243   : > { %4857 = vrot.lane.b32.xlu1 %v4856_v10, %s5429_s13  ;;  %v1289_v10 = vsel %vm1234_vm7, %v6707_v42, %v1288_v63  ;;  %v4896_v63 = vpack.i.bf16 %v8910_v57, %v6231_v26 }
 0x244   : > { %4852 = vrot.lane.b32.xlu0 %v4851_v53, %s5429_s13  ;;  %v4871_v49 = vpack.i.bf16 %v1289_v10, %v6722_v21  ;;  %v4886_v53 = vpack.i.bf16 %v6483_v33, %v8912_v46  ;;  %v1486_v10 = vrot.slane %v8914_v34, 2  ;;  %v8915_v46 = vld [vmem:[#allocation102_spill] sm:$0xff] }
 0x247   : > { %4867 = vrot.lane.b32.xlu1 %v4866_v4, %s5429_s13  ;;  %v1446_v4 = vrot.slane %v8913_v28, 2 }
 0x248   : > { %4862 = vrot.lane.b32.xlu0 %v4861_v7, %s5429_s13  ;;  %v4891_v7 = vpack.i.bf16 %v6688_v15, %v6586_v17  ;;  %v8917_v15 = vld [vmem:[#allocation114_spill] sm:$0xff] }
 0x249   : > { %v1447_v17 = vsel %vm1234_vm7, %v6563_v11, %v1446_v4  ;;  %v1614_v11 = vrot.slane %v8919_v37, 1  ;;  %v4921_v4 = vpack.i.bf16 %v8911_v44, %v6233_v27  ;;  %v2638_v44 = vld [vmem:[#allocation3 + $0x28] sm:$0xff] }
 0x24b   : > { %4877 = vrot.lane.b32.xlu1 %v4876_v25, %s5429_s13  ;;  %v1366_v25 = vrot.slane %v8913_v28, 1  ;;  %v1487_v28 = vsel %vm1234_vm7, %v6669_v43, %v1486_v10  ;;  %v2635_v43 = vld [vmem:[#allocation3 + $0x10] sm:$0xff] }
 0x24c   : > { %4872 = vrot.lane.b32.xlu0 %v4871_v49, %s5429_s13  ;;  %v1406_v49 = vrot.slane %v8914_v34, 1 }
 0x24d   : > { %v1367_v34 = vsel %vm1153_vm6, %v8916_v60, %v1366_v25  ;;  %v8920_v60 = vld [vmem:[#allocation101_spill] sm:$0xff]  ;;  %v1615_v25 = vsel %vm1153_vm6, %v6504_v20, %v1614_v11  ;;  %v2633_v11 = vld [vmem:[#allocation3] sm:$0xff] }
 0x24e   : > { %v1407_v33 = vsel %vm1153_vm6, %v8917_v15, %v1406_v49  ;;  %v4946_v49 = vpack.i.bf16 %v6285_v61, %v6237_v29  ;;  %v2636_v61 = vld [vmem:[#allocation3 + $0x18] sm:$0xff]  ;;  %v5435_v29 = vmov 0.0|0.0  }
 0x24f   : > { %4887 = vrot.lane.b32.xlu1 %v4886_v53, %s5430_s14  ;;  %v4906_v53 = vpack.i.bf16 %v6520_v51, %v8915_v46  ;;  %v4916_v51 = vpack.i.bf16 %v1487_v28, %v1447_v17  ;;  %v8918_v46 = vld [vmem:[#allocation86_spill] sm:$0xff]  ;;  %v8922_v28 = vld [vmem:[#allocation77_spill] sm:$0xff]  ;;  %4623 = vmatprep.subr.bf16.mxu0 %v5435_v29 }
 0x250   : > { %4882 = vrot.lane.b32.xlu0 %v4881_v56, %s5431_s22  ;;  %v4901_v56 = vpack.i.bf16 %v6275_v48, %v6227_v24  ;;  %v1574_v57 = vrot.slane %v8918_v46, 1  ;;  %4652 = vmatprep.subr.bf16.mxu1 %v5435_v29 }
 0x252   : > { %v1575_v10 = vsel %vm1153_vm6, %v8920_v60, %v1574_v57  ;;  %v4941_v57 = vpack.i.bf16 %v6722_v21, %v6628_v9  ;;  %v1498_v9 = vrot.slane %v6291_v0, 2  ;;  %v2650_v21 = vld [vmem:[#allocation3 + $0x88] sm:$0xff] }
 0x253   : > { %4897 = vrot.lane.b32.xlu1 %v4896_v63, %s5432_s23 }
 0x254   : > { %4892 = vrot.lane.b32.xlu0 %v4891_v7, %s5433_s5  ;;  %v4911_v7 = vpack.i.bf16 %v1407_v33, %v1367_v34  ;;  %v4931_v33 = vpack.i.bf16 %v1615_v25, %v1575_v10  ;;  %v1491_v34 = vrot.slane %v8922_v28, 2  ;;  %v2634_v10 = vld [vmem:[#allocation3 + $0x8] sm:$0xff] }
 0x257   : > { %4907 = vrot.lane.b32.xlu1 %v4906_v53, %s5434_s7 }
 0x258   : > { %4902 = vrot.lane.b32.xlu0 %v4901_v56, %s5431_s22  ;;  %v8921_v56 = vld [vmem:[#allocation69_spill] sm:$0xff] }
 0x259   : > { %v1451_v17 = vrot.slane %v8921_v56, 2 }
 0x25b   : > { %4917 = vrot.lane.b32.xlu1 %v4916_v51, %s5433_s5  ;;  %v1371_v51 = vrot.slane %v8921_v56, 1  ;;  %v1452_v25 = vsel %vm1234_vm7, %v6605_v22, %v1451_v17 }
 0x25c   : > { %4912 = vrot.lane.b32.xlu0 %v4911_v7, %s5430_s14  ;;  %v8923_v7 = vld [vmem:[#allocation104_spill] sm:$0xff] }
 0x25d   : > { %v1372_v56 = vsel %vm1153_vm6, %v8920_v60, %v1371_v51  ;;  %v8925_v60 = vld [vmem:[#allocation95_spill] sm:$0xff] }
 0x25e   : > { %v1619_v51 = vrot.slane %v8925_v60, 1 }
 0x25f   : > { %4927 = vrot.lane.b32.xlu1 %v4896_v63, %s5431_s22  ;;  %v1411_v63 = vrot.slane %v8922_v28, 1 }
 0x260   : > { %4922 = vrot.lane.b32.xlu0 %v4921_v4, %s5432_s23 }
 0x261   : > { %v1412_v28 = vsel %vm1153_vm6, %v6504_v20, %v1411_v63  ;;  %v4627_v20 = vpack.c.bf16 %v2636_v61, %v2635_v43  ;;  %v2637_v63 = vld [vmem:[#allocation3 + $0x20] sm:$0xff]  ;;  %v1620_v43 = vsel %vm1153_vm6, %v6495_v18, %v1619_v51 }
 0x262   : > { %v4630_v61 = vpack.c.bf16 %v2638_v44, %v2637_v63  ;;  %v8927_v44 = vld [vmem:[#allocation70_spill] sm:$0xff] }
 0x263   : > { %4937 = vrot.lane.b32.xlu1 %v4906_v53, %s5430_s14  ;;  %v4956_v53 = vpack.i.bf16 %v6514_v13, %v8923_v7  ;;  %v4624_v13 = vpack.c.bf16 %v2634_v10, %v2633_v11  ;;  %v4971_v11 = vpack.i.bf16 %v6287_v62, %v6239_v30  ;;  %v8926_v10 = vld [vmem:[#allocation103_spill] sm:$0xff]  ;;  %v1376_v63 = vrot.slane %v8927_v44, 1  ;;  %v8968_v30 = vld [vmem:[#allocation81_spill] sm:$0xff] }
 0x264   : > { %4932 = vrot.lane.b32.xlu0 %v4931_v33, %s5434_s7  ;;  %v1492_v33 = vsel %vm1234_vm7, %v6707_v42, %v1491_v34  ;;  %v4961_v34 = vpack.i.bf16 %v1412_v28, %v1372_v56 }
 0x265   : > { %v4966_v17 = vpack.i.bf16 %v1492_v33, %v1452_v25  ;;  %4625 = vmatpush1.bf16.msra.mxu0 %v4624_v13  ;;  %4661 = vmatpush1.bf16.msra.mxu1 %v4624_v13  ;;  %v2639_v25 = vld [vmem:[#allocation3 + $0x30] sm:$0xff]  ;;  %v2640_v33 = vld [vmem:[#allocation3 + $0x38] sm:$0xff]  ;;  %v2641_v13 = vld [vmem:[#allocation3 + $0x40] sm:$0xff] }
 0x266   : > { %4626 = vmatprep.subr.bf16.mxu0 %v5435_v29  ;;  %4653 = vmatprep.subr.bf16.mxu1 %v5435_v29  ;;  %v4633_v28 = vpack.c.bf16 %v2640_v33, %v2639_v25  ;;  %v2644_v25 = vld [vmem:[#allocation3 + $0x58] sm:$0xff] }
 0x267   : > { %4947 = vrot.lane.b32.xlu1 %v4946_v49, %s5432_s23 }
 0x268   : > { %4942 = vrot.lane.b32.xlu0 %v4941_v57, %s5433_s5  ;;  %v8924_v57 = vld [vmem:[#allocation87_spill] sm:$0xff] }
 0x269   : > { %v1579_v7 = vrot.slane %v8924_v57, 1  ;;  %4628 = vmatpush1.bf16.msra.mxu0 %v4627_v20  ;;  %4662 = vmatpush1.bf16.msra.mxu1 %v4627_v20  ;;  %v4991_v20 = vpack.i.bf16 %v6715_v12, %v6610_v8 }
 0x26a   : > { %4629 = vmatprep.subr.bf16.mxu0 %v5435_v29  ;;  %4654 = vmatprep.subr.bf16.mxu1 %v5435_v29 }
 0x26b   : > { %4957 = vrot.lane.b32.xlu1 %v4956_v53, %s5434_s7 }
 0x26c   : > { %4952 = vrot.lane.b32.xlu0 %v4921_v4, %s5431_s22  ;;  %v1580_v4 = vsel %vm1153_vm6, %v8926_v10, %v1579_v7  ;;  %v1456_v7 = vrot.slane %v8927_v44, 2  ;;  %v8929_v44 = vld [vmem:[#allocation110_spill] sm:$0xff] }
 0x26d   : > { %v4981_v56 = vpack.i.bf16 %v1620_v43, %v1580_v4  ;;  %4631 = vmatpush1.bf16.msra.mxu0 %v4630_v61  ;;  %4663 = vmatpush1.bf16.msra.mxu1 %v4630_v61  ;;  %v2643_v61 = vld [vmem:[#allocation3 + $0x50] sm:$0xff] }
 0x26e   : > { %4632 = vmatprep.subr.bf16.mxu0 %v5435_v29  ;;  %4655 = vmatprep.subr.bf16.mxu1 %v5435_v29 }
 0x26f   : > { %4967 = vrot.lane.b32.xlu1 %v4966_v17, %s5433_s5  ;;  %v2642_v17 = vld [vmem:[#allocation3 + $0x48] sm:$0xff] }
 0x270   : > { %4962 = vrot.lane.b32.xlu0 %v4961_v34, %s5430_s14  ;;  %v8928_v34 = vld [vmem:[#allocation78_spill] sm:$0xff]  ;;  %v4636_v43 = vpack.c.bf16 %v2642_v17, %v2641_v13  ;;  %v4639_v17 = vpack.c.bf16 %v2644_v25, %v2643_v61  ;;  %v8932_v61 = vld [vmem:[#allocation108_spill] sm:$0xff] }
 0x271   : > { %v1496_v51 = vrot.slane %v8928_v34, 2  ;;  %v1416_v4 = vrot.slane %v8928_v34, 1  ;;  %4634 = vmatpush1.bf16.msra.mxu0 %v4633_v28  ;;  %4664 = vmatpush1.bf16.msra.mxu1 %v4633_v28  ;;  %v1377_v28 = vsel %vm1153_vm6, %v8926_v10, %v1376_v63  ;;  %v2645_v34 = vld [vmem:[#allocation3 + $0x60] sm:$0xff] }
 0x272   : > { %4635 = vmatprep.subr.bf16.mxu0 %v5435_v29  ;;  %4656 = vmatprep.subr.bf16.mxu1 %v5435_v29 }
 0x273   : > { %4977 = vrot.lane.b32.xlu1 %v4946_v49, %s5431_s22  ;;  %v4996_v49 = vpack.i.bf16 %v6291_v0, %v6243_v32  ;;  %v1497_v33 = vsel %vm1234_vm7, %v6692_v45, %v1496_v51  ;;  %v1417_v13 = vsel %vm1153_vm6, %v6495_v18, %v1416_v4  ;;  %v2646_v51 = vld [vmem:[#allocation3 + $0x68] sm:$0xff]  ;;  %v2647_v4 = vld [vmem:[#allocation3 + $0x70] sm:$0xff] }
 0x274   : > { %4972 = vrot.lane.b32.xlu0 %v4971_v11, %s5432_s23  ;;  %v5011_v32 = vpack.i.bf16 %v1417_v13, %v1377_v28  ;;  %v8931_v18 = vld [vmem:[#allocation96_spill] sm:$0xff]  ;;  %v2649_v28 = vld [vmem:[#allocation3 + $0x80] sm:$0xff] }
 0x275   : > { %4637 = vmatpush1.bf16.msra.mxu0 %v4636_v43  ;;  %4665 = vmatpush1.bf16.msra.mxu1 %v4636_v43  ;;  %v1624_v63 = vrot.slane %v8931_v18, 1  ;;  %v2648_v43 = vld [vmem:[#allocation3 + $0x78] sm:$0xff]  ;;  %v4648_v13 = vpack.c.bf16 %v2650_v21, %v2649_v28 }
 0x276   : > { %4638 = vmatprep.subr.bf16.mxu0 %v5435_v29  ;;  %4657 = vmatprep.subr.bf16.mxu1 %v5435_v29 }
 0x277   : > { %4987 = vrot.lane.b32.xlu1 %v4956_v53, %s5430_s14  ;;  %v1457_v53 = vsel %vm1234_vm7, %v6593_v19, %v1456_v7 }
 0x278   : > { %4982 = vrot.lane.b32.xlu0 %v4981_v56, %s5434_s7  ;;  %v5006_v56 = vpack.i.bf16 %v6552_v50, %v8929_v44  ;;  %v5016_v7 = vpack.i.bf16 %v1497_v33, %v1457_v53  ;;  %v8930_v50 = vld [vmem:[#allocation88_spill] sm:$0xff]  ;;  %v1625_v53 = vsel %vm1153_vm6, %v6532_v52, %v1624_v63  ;;  %v4645_v33 = vpack.c.bf16 %v2648_v43, %v2647_v4 }
 0x279   : > { %v1584_v10 = vrot.slane %v8930_v50, 1  ;;  %4640 = vmatpush1.bf16.msra.mxu0 %v4639_v17  ;;  %4666 = vmatpush1.bf16.msra.mxu1 %v4639_v17  ;;  %v6864_v44 = vrot.slane %v6293_v1, 2 }
 0x27a   : > { %4641 = vmatprep.subr.bf16.mxu0 %v5435_v29  ;;  %4658 = vmatprep.subr.bf16.mxu1 %v5435_v29 }
 0x27b   : > { %4997 = vrot.lane.b32.xlu1 %v4996_v49, %s5432_s23  ;;  %v1585_v25 = vsel %vm1153_vm6, %v8932_v61, %v1584_v10  ;;  %8933 = vst [vmem:[#allocation107_spill] sm:$0xff] %v6864_v44  ;;  %v8937_v10 = vld [vmem:[#allocation71_spill] sm:$0xff] }
 0x27c   : > { %4992 = vrot.lane.b32.xlu0 %v4991_v20, %s5433_s5  ;;  %v4642_v20 = vpack.c.bf16 %v2646_v51, %v2645_v34  ;;  %v1461_v63 = vrot.slane %v8937_v10, 2 }
 0x27e   : > { %4643 = vmatpush1.bf16.msra.mxu0 %v4642_v20  ;;  %4667 = vmatpush1.bf16.msra.mxu1 %v4642_v20  ;;  %v8938_v20 = vld [vmem:[#allocation79_spill] sm:$0xff]  ;;  %v1462_v28 = vsel %vm1234_vm7, %v6622_v31, %v1461_v63 }
 0x27f   : > { %5007 = vrot.lane.b32.xlu1 %v5006_v56, %s5434_s7  ;;  %4644 = vmatprep.subr.bf16.mxu0 %v5435_v29  ;;  %v1501_v4 = vrot.slane %v8938_v20, 2 }
 0x280   : > { %5002 = vrot.lane.b32.xlu0 %v4971_v11, %s5431_s22  ;;  %v5021_v11 = vpack.i.bf16 %v6293_v1, %v8899_v5  ;;  %4659 = vmatprep.subr.bf16.mxu1 %v5435_v29 }
 0x281   : > { %v1502_v21 = vsel %vm1234_vm7, %v6864_v44, %v1501_v4 }
 0x282   : > { %4646 = vmatpush1.bf16.msra.mxu0 %v4645_v33  ;;  %4668 = vmatpush1.bf16.msra.mxu1 %v4645_v33  ;;  %v8940_v33 = vld [vmem:[#allocation109_spill] sm:$0xff] }
 0x283   : > { %5017 = vrot.lane.b32.xlu1 %v5016_v7, %s5433_s5  ;;  %v6874_v7 = vsel %vm1234_vm7, %v1498_v9, %v6864_v44  ;;  %4647 = vmatprep.subr.bf16.mxu0 %v5435_v29  ;;  %v5056_v9 = vpack.i.bf16 %v6539_v55, %v8940_v33  ;;  %v5066_v55 = vpack.i.bf16 %v1502_v21, %v1462_v28  ;;  %v8944_v33 = vld [vmem:[#allocation97_spill] sm:$0xff] }
 0x284   : > { %5012 = vrot.lane.b32.xlu0 %v5011_v32, %s5430_s14  ;;  %v5031_v32 = vpack.i.bf16 %v1625_v53, %v1585_v25  ;;  %8935 = vst [vmem:[#allocation105_spill] sm:$0xff] %v6874_v7  ;;  %4660 = vmatprep.subr.bf16.mxu1 %v5435_v29  ;;  %v5041_v43 = vpack.i.bf16 %v6874_v7, %v6643_v59  ;;  %v1381_v25 = vrot.slane %v8937_v10, 1  ;;  %v1421_v29 = vrot.slane %v8938_v20, 1 }
 0x285   : > { %v1298_v20 = vrot.slane %v6295_v2, 2  ;;  %v1629_v5 = vrot.slane %v8944_v33, 1 }
 0x286   : > { %4649 = vmatpush1.bf16.msra.mxu0 %v4648_v13  ;;  %4669 = vmatpush1.bf16.msra.mxu1 %v4648_v13  ;;  %v1422_v13 = vsel %vm1153_vm6, %v6532_v52, %v1421_v29  ;;  %v8947_v29 = vld [vmem:[#allocation60_spill] sm:$0xff] }
 0x287   : > { %5027 = vrot.lane.b32.xlu1 %v4996_v49, %s5431_s22  ;;  %v8936_v49 = vld [vmem:[#allocation59_spill] sm:$0xff]  ;;  %v5076_v2 = vpack.i.bf16 %v8947_v29, %v6251_v36 }
 0x288   : > { %5022 = vrot.lane.b32.xlu0 %v5021_v11, %s5432_s23  ;;  %v5046_v51 = vpack.i.bf16 %v8936_v49, %v6249_v35  ;;  %v1503_v28 = vrot.slane %v8936_v49, 2  ;;  %v8953_v49 = vld [vmem:[#allocation80_spill] sm:$0xff] }
 0x289   : > { %v6870_v17 = vpop.permute.xlu1 %4752  ;;  %v1426_v35 = vrot.slane %v8953_v49, 1 }
 0x28a   : > { %8934 = vst [vmem:[#allocation102_spill] sm:$0xff] %v6870_v17  ;;  %v6877_v34 = vpop.permute.xlu0 %4742 }
 0x28b   : > { %5037 = vrot.lane.b32.xlu1 %v5006_v56, %s5430_s14  ;;  %v4744_v50 = vunpack.i.l.bf16 %v6877_v34 }
 0x28c   : > { %5032 = vrot.lane.b32.xlu0 %v5031_v32, %s5434_s7  ;;  %v1382_v32 = vsel %vm1153_vm6, %v8932_v61, %v1381_v25  ;;  %v1299_v25 = vsel %vm1234_vm7, %v6864_v44, %v1298_v20  ;;  %v1630_v20 = vsel %vm1153_vm6, %v6523_v54, %v1629_v5 }
 0x28d   : > { %v6889_v53 = vpop.permute.xlu1 %4757  ;;  %v5061_v63 = vpack.i.bf16 %v1422_v13, %v1382_v32  ;;  %v5071_v21 = vpack.i.bf16 %v1299_v25, %v6874_v7  ;;  %v8949_v32 = vld [vmem:[#allocation106_spill] sm:$0xff]  ;;  %v1654_v7 = vrot.slane %v8918_v46, 2  ;;  %v4754_v46 = vunpack.i.l.bf16 %v6870_v17 }
 0x28e   : > { %8939 = vst [vmem:[#allocation101_spill] sm:$0xff] %v6889_v53  ;;  %v6892_v56 = vpop.permute.xlu0 %4747 }
 0x28f   : > { %5047 = vrot.lane.b32.xlu1 %v5046_v51, %s5432_s23 }
 0x290   : > { %5042 = vrot.lane.b32.xlu0 %v5041_v43, %s5433_s5  ;;  %v8943_v43 = vld [vmem:[#allocation89_spill] sm:$0xff] }
 0x291   : > { %v6904_v10 = vpop.permute.xlu1 %4767  ;;  %v1589_v4 = vrot.slane %v8943_v43, 1 }
 0x292   : > { %8941 = vst [vmem:[#allocation104_spill] sm:$0xff] %v6904_v10  ;;  %v6909_v1 = vpop.permute.xlu0 %4762  ;;  %v5101_v10 = vpack.i.bf16 %v6303_v6, %v6255_v38  ;;  %v8958_v38 = vld [vmem:[#allocation90_spill] sm:$0xff] }
 0x293   : > { %8942 = vst [vmem:[#allocation103_spill] sm:$0xff] %v6909_v1  ;;  %5057 = vrot.lane.b32.xlu1 %v5056_v9, %s5434_s7  ;;  %v1590_v13 = vsel %vm1153_vm6, %v8949_v32, %v1589_v4  ;;  %v8952_v4 = vld [vmem:[#allocation72_spill] sm:$0xff]  ;;  %v1427_v1 = vsel %vm1153_vm6, %v6523_v54, %v1426_v35  ;;  %v8961_v54 = vld [vmem:[#allocation115_spill] sm:$0xff] }
 0x294   : > { %5052 = vrot.lane.b32.xlu0 %v5021_v11, %s5431_s22  ;;  %v6926_v11 = vrot.slane %v8947_v29, 2  ;;  %v1386_v36 = vrot.slane %v8952_v4, 1 }
 0x295   : > { %v6915_v61 = vpop.permute.xlu1 %4777 }
 0x296   : > { %8945 = vst [vmem:[#allocation110_spill] sm:$0xff] %v6915_v61  ;;  %v6919_v52 = vpop.permute.xlu0 %4772  ;;  %8948 = vst [vmem:[#allocation109_spill] sm:$0xff] %v6926_v11  ;;  %v6941_v29 = vsel %vm1234_vm7, %v1503_v28, %v6926_v11  ;;  %v8955_v28 = vld [vmem:[#allocation61_spill] sm:$0xff]  ;;  %v1387_v0 = vsel %vm1153_vm6, %v8949_v32, %v1386_v36  ;;  %v8960_v36 = vld [vmem:[#allocation98_spill] sm:$0xff] }
 0x297   : > { %8946 = vst [vmem:[#allocation108_spill] sm:$0xff] %v6919_v52  ;;  %5067 = vrot.lane.b32.xlu1 %v5066_v55, %s5433_s5  ;;  %v5086_v55 = vpack.i.bf16 %v1630_v20, %v1590_v13  ;;  %8950 = vst [vmem:[#allocation106_spill] sm:$0xff] %v6941_v29  ;;  %v5096_v5 = vpack.i.bf16 %v6941_v29, %v6635_v14  ;;  %v1303_v20 = vrot.slane %v8955_v28, 2  ;;  %v1634_v32 = vrot.slane %v8960_v36, 1 }
 0x298   : > { %5062 = vrot.lane.b32.xlu0 %v5061_v63, %s5430_s14  ;;  %v5116_v35 = vpack.i.bf16 %v1427_v1, %v1387_v0  ;;  %v8964_v0 = vld [vmem:[#allocation120_spill] sm:$0xff] }
 0x299   : > { %v6934_v61 = vpop.permute.xlu1 %4787  ;;  %v1635_v1 = vsel %vm1153_vm6, %v8964_v0, %v1634_v32 }
 0x29a   : > { %v6936_v52 = vpop.permute.xlu0 %4782 }
 0x29b   : > { %5077 = vrot.lane.b32.xlu1 %v5076_v2, %s5432_s23 }
 0x29c   : > { %5072 = vrot.lane.b32.xlu0 %v5071_v21, %s5429_s13 }
 0x29d   : > { %v6944_v63 = vpop.permute.xlu1 %4797 }
 0x29e   : > { %8951 = vst [vmem:[#allocation134_spill] sm:$0xff] %v6944_v63  ;;  %v6946_v25 = vpop.permute.xlu0 %4792  ;;  %v8992_v63 = vld [vmem:[#allocation67_spill] sm:$0xff] }
 0x29f   : > { %5087 = vrot.lane.b32.xlu1 %v5086_v55, %s5434_s7  ;;  %v1466_v55 = vrot.slane %v8952_v4, 2  ;;  %v1313_v59 = vrot.slane %v8992_v63, 2  ;;  %v1694_v63 = vrot.slane %v8919_v37, 2  ;;  %v8995_v37 = vld [vmem:[#allocation118_spill] sm:$0xff] }
 0x2a0   : > { %5082 = vrot.lane.b32.xlu0 %v5046_v51, %s5431_s22  ;;  %v1506_v51 = vrot.slane %v8953_v49, 2 }
 0x2a1   : > { %v6954_v13 = vpop.permute.xlu1 %4807 }
 0x2a2   : > { %8954 = vst [vmem:[#allocation135_spill] sm:$0xff] %v6954_v13  ;;  %v6957_v21 = vpop.permute.xlu0 %4802  ;;  %v1304_v13 = vsel %vm1234_vm7, %v6926_v11, %v1303_v20  ;;  %v1507_v20 = vsel %vm1234_vm7, %v6926_v11, %v1506_v51  ;;  %v1511_v11 = vrot.slane %v8968_v30, 2 }
 0x2a3   : > { %8956 = vst [vmem:[#allocation136_spill] sm:$0xff] %v6957_v21  ;;  %5097 = vrot.lane.b32.xlu1 %v5096_v5, %s5433_s5  ;;  %v1594_v21 = vrot.slane %v8958_v38, 1  ;;  %v8962_v5 = vld [vmem:[#allocation122_spill] sm:$0xff]  ;;  %v5126_v49 = vpack.i.bf16 %v1304_v13, %v6941_v29 }
 0x2a4   : > { %5092 = vrot.lane.b32.xlu0 %v5056_v9, %s5430_s14  ;;  %v5111_v4 = vpack.i.bf16 %v8962_v5, %v8961_v54  ;;  %v1467_v9 = vsel %vm1234_vm7, %v6614_v16, %v1466_v55  ;;  %v1508_v54 = vrot.slane %v6303_v6, 2  ;;  %v8965_v5 = vld [vmem:[#allocation63_spill] sm:$0xff]  ;;  %v8967_v55 = vld [vmem:[#allocation73_spill] sm:$0xff]  ;;  %v1431_v16 = vrot.slane %v8968_v30, 1 }
 0x2a5   : > { %v6969_v28 = vpop.permute.xlu1 %4817  ;;  %v6996_v13 = vrot.slane %v8965_v5, 2  ;;  %v1471_v38 = vrot.slane %v8967_v55, 2  ;;  %v5121_v51 = vpack.i.bf16 %v1507_v20, %v1467_v9  ;;  %v7008_v32 = vpack.i.bf16 %v8965_v5, %v6257_v39  ;;  %v8970_v6 = vld [vmem:[#allocation65_spill] sm:$0xff]  ;;  %v8975_v39 = vld [vmem:[#allocation99_spill] sm:$0xff] }
 0x2a6   : > { %8957 = vst [vmem:[#allocation137_spill] sm:$0xff] %v6969_v28  ;;  %v6974_v62 = vpop.permute.xlu0 %4812 }
 0x2a7   : > { %8959 = vst [vmem:[#allocation138_spill] sm:$0xff] %v6974_v62  ;;  %5107 = vrot.lane.b32.xlu1 %v5076_v2, %s5431_s22  ;;  %v8963_v62 = vld [vmem:[#allocation113_spill] sm:$0xff]  ;;  %8966 = vst [vmem:[#allocation115_spill] sm:$0xff] %v6996_v13  ;;  %v7018_v9 = vsel %vm1234_vm7, %v1508_v54, %v6996_v13  ;;  %v7023_v30 = vsel %vm1234_vm7, %v6655_v58, %v1471_v38  ;;  %v7028_v20 = vsel %vm1234_vm7, %v6996_v13, %v1511_v11  ;;  %v8974_v38 = vld [vmem:[#allocation91_spill] sm:$0xff] }
 0x2a8   : > { %5102 = vrot.lane.b32.xlu0 %v5101_v10, %s5432_s23  ;;  %v1595_v36 = vsel %vm1153_vm6, %v8963_v62, %v1594_v21  ;;  %v1391_v21 = vrot.slane %v8967_v55, 1  ;;  %v1599_v5 = vrot.slane %v8974_v38, 1  ;;  %v1513_v11 = vrot.slane %v8970_v6, 2  ;;  %v8977_v58 = vld [vmem:[#allocation66_spill] sm:$0xff] }
 0x2a9   : > { %v6986_v28 = vpop.permute.xlu1 %4827  ;;  %v5141_v33 = vpack.i.bf16 %v1635_v1, %v1595_v36  ;;  %v7036_v36 = vsel %vm1153_vm6, %v8964_v0, %v1431_v16  ;;  %v7047_v43 = vrot.slane %v8977_v58, 2  ;;  %v8979_v16 = vld [vmem:[#allocation112_spill] sm:$0xff]  ;;  %v8980_v0 = vld [vmem:[#allocation121_spill] sm:$0xff] }
 0x2aa   : > { %v6990_v2 = vpop.permute.xlu0 %4822  ;;  %v7032_v55 = vsel %vm1153_vm6, %v8963_v62, %v1391_v21  ;;  %v5151_v62 = vpack.i.bf16 %v7018_v9, %v6680_v40  ;;  %v7056_v21 = vpack.i.bf16 %v8980_v0, %v8979_v16  ;;  %v8984_v16 = vld [vmem:[#allocation111_spill] sm:$0xff] }
 0x2ab   : > { %5117 = vrot.lane.b32.xlu1 %v5116_v35, %s5430_s14  ;;  %v7012_v35 = vpack.i.bf16 %v8970_v6, %v6261_v41  ;;  %8978 = vst [vmem:[#allocation140_spill] sm:$0xff] %v7047_v43  ;;  %v7076_v0 = vsel %vm1153_vm6, %v8984_v16, %v1599_v5  ;;  %v8989_v5 = vld [vmem:[#allocation84_spill] sm:$0xff] }
 0x2ac   : > { %5112 = vrot.lane.b32.xlu0 %v5111_v4, %s5434_s7 }
 0x2ad   : > { %v7004_v29 = vpop.permute.xlu1 %4837 }
 0x2ae   : > { %8969 = vst [vmem:[#allocation122_spill] sm:$0xff] %v7004_v29  ;;  %v7014_v14 = vpop.permute.xlu0 %4832  ;;  %v7092_v29 = vrot.slane %v8989_v5, 1 }
 0x2af   : > { %8971 = vst [vmem:[#allocation113_spill] sm:$0xff] %v7014_v14  ;;  %5127 = vrot.lane.b32.xlu1 %v5126_v49, %s5429_s13  ;;  %v8973_v49 = vld [vmem:[#allocation64_spill] sm:$0xff] }
 0x2b0   : > { %5122 = vrot.lane.b32.xlu0 %v5121_v51, %s5433_s5  ;;  %v1308_v54 = vrot.slane %v8973_v49, 2  ;;  %v1639_v51 = vrot.slane %v8975_v39, 1  ;;  %v8981_v39 = vld [vmem:[#allocation44_spill] sm:$0xff]  ;;  %v8985_v49 = vld [vmem:[#allocation119_spill] sm:$0xff] }
 0x2b1   : > { %v7038_v1 = vpop.permute.xlu1 %4847  ;;  %v7062_v6 = vpack.i.bf16 %v8977_v58, %v8981_v39  ;;  %v8986_v58 = vld [vmem:[#allocation74_spill] sm:$0xff] }
 0x2b2   : > { %8972 = vst [vmem:[#allocation120_spill] sm:$0xff] %v7038_v1  ;;  %v7043_v41 = vpop.permute.xlu0 %4842  ;;  %v7070_v1 = vsel %vm1234_vm7, %v6996_v13, %v1308_v54  ;;  %v1396_v39 = vrot.slane %v8986_v58, 1  ;;  %v8987_v54 = vld [vmem:[#allocation82_spill] sm:$0xff]  ;;  %v1476_v18 = vrot.slane %v8986_v58, 2 }
 0x2b3   : > { %8976 = vst [vmem:[#allocation139_spill] sm:$0xff] %v7043_v41  ;;  %5137 = vrot.lane.b32.xlu1 %v5101_v10, %s5431_s22  ;;  %v7080_v41 = vsel %vm1153_vm6, %v8985_v49, %v1639_v51  ;;  %v7086_v10 = vsel %vm1234_vm7, %v1513_v11, %v7047_v43  ;;  %v8990_v11 = vld [vmem:[#allocation46_spill] sm:$0xff] }
 0x2b4   : > { %5132 = vrot.lane.b32.xlu0 %v7008_v32, %s5432_s23  ;;  %v7110_v31 = vsel %vm1153_vm6, %v8984_v16, %v1396_v39  ;;  %v1516_v39 = vrot.slane %v8987_v54, 2  ;;  %v4745_v16 = vunpack.i.h.bf16 %v6877_v34  ;;  %v4784_v34 = vunpack.i.l.bf16 %v6936_v52 }
 0x2b5   : > { %v7064_v38 = vpop.permute.xlu1 %4857 }
 0x2b6   : > { %8982 = vst [vmem:[#allocation112_spill] sm:$0xff] %v7064_v38  ;;  %v7072_v40 = vpop.permute.xlu0 %4852  ;;  %v1436_v38 = vrot.slane %v8987_v54, 1 }
 0x2b7   : > { %8983 = vst [vmem:[#allocation121_spill] sm:$0xff] %v7072_v40  ;;  %5147 = vrot.lane.b32.xlu1 %v5111_v4, %s5430_s14  ;;  %v8988_v40 = vld [vmem:[#allocation83_spill] sm:$0xff] }
 0x2b8   : > { %5142 = vrot.lane.b32.xlu0 %v5141_v33, %s5434_s7  ;;  %v1641_v13 = vrot.slane %v8988_v40, 1  ;;  %v7102_v53 = vpack.i.bf16 %v8988_v40, %v8990_v11  ;;  %v8991_v33 = vld [vmem:[#allocation129_spill] sm:$0xff]  ;;  %v7117_v4 = vsel %vm1153_vm6, %v8985_v49, %v1436_v38  ;;  %v4750_v38 = vunpack.i.h.bf16 %v6892_v56 }
 0x2b9   : > { %v7094_v51 = vpop.permute.xlu1 %4867  ;;  %v7139_v49 = vsel %vm1234_vm7, %v6605_v22, %v1654_v7  ;;  %v8996_v22 = vld [vmem:[#allocation127_spill] sm:$0xff] }
 0x2ba   : > { %v7104_v27 = vpop.permute.xlu0 %4862  ;;  %v1643_v44 = vsel %vm1153_vm6, %v1641_v13, %v7092_v29  ;;  %v7157_v7 = vsel %vm1234_vm7, %v8996_v22, %v1476_v18  ;;  %v1695_v18 = vsel %vm1234_vm7, %v6707_v42, %v1694_v63  ;;  %v8999_v42 = vpack.i.bf16 %v7028_v20, %v7023_v30 }
 0x2bb   : > { %5157 = vrot.lane.b32.xlu1 %v7012_v35, %s5432_s23  ;;  %v7145_v54 = vpack.i.bf16 %v1643_v44, %v8995_v37  ;;  %v4864_v58 = vunpack.i.l.bf16 %v7104_v27  ;;  %v7161_v44 = vsel %vm1234_vm7, %v7047_v43, %v1516_v39  ;;  %v8997_v37 = vld [vmem:[#allocation20_spill] sm:$0xff]  ;;  %v7177_v39 = vsel %vm922_vm5, %v6227_v24, %v4750_v38 }
 0x2bc   : > { %5152 = vrot.lane.b32.xlu0 %v5151_v62, %s5433_s5  ;;  %v4749_v62 = vunpack.i.l.bf16 %v6892_v56  ;;  %v7149_v56 = vsel %vm1234_vm7, %v7047_v43, %v1313_v59  ;;  %v7165_v59 = vsel %vm922_vm5, %v6231_v26, %v4754_v46  ;;  %v7169_v17 = vsel %vm922_vm5, %v8997_v37, %v4745_v16 }
 0x2bd   : > { %v7128_v14 = vpop.permute.xlu1 %4877 }
 0x2be   : > { %8993 = vst [vmem:[#allocation111_spill] sm:$0xff] %v7128_v14  ;;  %v7133_v13 = vpop.permute.xlu0 %4872  ;;  %v4824_v14 = vunpack.i.l.bf16 %v6990_v2  ;;  %v7181_v46 = vsel %vm922_vm5, %v6225_v23, %v4749_v62 }
 0x2bf   : > { %8994 = vst [vmem:[#allocation119_spill] sm:$0xff] %v7133_v13  ;;  %5167 = vrot.lane.b32.xlu1 %v7056_v21, %s5434_s7  ;;  %v8998_v13 = vld [vmem:[#allocation19_spill] sm:$0xff] }
 0x2c0   : > { %5162 = vrot.lane.b32.xlu0 %v7008_v32, %s5431_s22  ;;  %v2403_v32 = vsel %vm922_vm5, %v8998_v13, %v4744_v50  ;;  %v2419_v50 = vsel %vm922_vm5, %v8990_v11, %v4784_v34  ;;  %v9000_v11 = vpack.i.bf16 %v7036_v36, %v7032_v55 }
 0x2c1   : > { %v4888_v15 = vpop.permute.xlu1 %4887  ;;  %v2436_v38 = vsel %vm2435_vm8, %v2403_v32, %v4824_v14  ;;  %v2452_v62 = vsel %vm2435_vm8, %v2419_v50, %v4864_v58  ;;  %v9001_v14 = vpack.i.bf16 %v7070_v1, %v7018_v9  ;;  %v9002_v50 = vld [vmem:[#allocation92_spill] sm:$0xff] }
 0x2c2   : > { %v4883_v26 = vpop.permute.xlu0 %4882  ;;  %v4890_v24 = vunpack.i.h.bf16 %v4888_v15  ;;  %v4889_v23 = vunpack.i.l.bf16 %v4888_v15 }
 0x2c3   : > { %v4885_v13 = vunpack.i.h.bf16 %v4883_v26  ;;  %v4884_v37 = vunpack.i.l.bf16 %v4883_v26  ;;  %5177 = vrot.lane.b32.xlu1 %v8999_v42, %s5433_s5 }
 0x2c4   : > { %5172 = vrot.lane.b32.xlu0 %v9000_v11, %s5430_s14 }
 0x2c5   : > { %v2469_v26 = vsel %vm2468_vm9, %v2436_v38, %v4884_v37  ;;  %v2485_v34 = vsel %vm2468_vm9, %v2452_v62, %v4885_v13  ;;  %v4898_v30 = vpop.permute.xlu1 %4897  ;;  %v1604_v13 = vrot.slane %v9002_v50, 1  ;;  %v9003_v37 = vld [vmem:[#allocation100_spill] sm:$0xff] }
 0x2c6   : > { %v4893_v20 = vpop.permute.xlu0 %4892  ;;  %v4900_v42 = vunpack.i.h.bf16 %v4898_v30  ;;  %v4899_v16 = vunpack.i.l.bf16 %v4898_v30  ;;  %v2502_v15 = vsel %vm2501_vm10, %v2469_v26, %v4889_v23  ;;  %v2518_v55 = vsel %vm2501_vm10, %v2485_v34, %v4890_v24 }
 0x2c7   : > { %v4895_v63 = vunpack.i.h.bf16 %v4893_v20  ;;  %v4894_v43 = vunpack.i.l.bf16 %v4893_v20  ;;  %5187 = vrot.lane.b32.xlu1 %v7062_v6, %s5432_s23  ;;  %v1644_v38 = vrot.slane %v9003_v37, 1  ;;  %v9004_v20 = vld [vmem:[#allocation47_spill] sm:$0xff]  ;;  %v9005_v23 = vpack.i.bf16 %v7080_v41, %v7076_v0  ;;  %v9006_v41 = vld [vmem:[#allocation117_spill] sm:$0xff] }
 0x2c8   : > { %5182 = vrot.lane.b32.xlu0 %v9001_v14, %s5429_s13  ;;  %v7215_v1 = vpack.i.bf16 %v8989_v5, %v9004_v20  ;;  %v4789_v14 = vunpack.i.l.bf16 %v6934_v61  ;;  %v7232_v0 = vsel %vm1153_vm6, %v9006_v41, %v1604_v13 }
 0x2c9   : > { %v4908_v36 = vpop.permute.xlu1 %4907  ;;  %v2535_v58 = vsel %vm2534_vm11, %v2502_v15, %v4894_v43  ;;  %v2551_v32 = vsel %vm2534_vm11, %v2518_v55, %v4895_v63  ;;  %v4790_v63 = vunpack.i.h.bf16 %v6934_v61  ;;  %v4785_v15 = vunpack.i.h.bf16 %v6936_v52 }
 0x2ca   : > { %v4910_v62 = vunpack.i.h.bf16 %v4908_v36  ;;  %v4909_v11 = vunpack.i.l.bf16 %v4908_v36  ;;  %v4903_v30 = vpop.permute.xlu0 %4902  ;;  %v2568_v24 = vsel %vm2567_vm12, %v2535_v58, %v4899_v16  ;;  %v2584_v43 = vsel %vm2567_vm12, %v2551_v32, %v4900_v42  ;;  %v9008_v32 = vld [vmem:[#allocation22_spill] sm:$0xff] }
 0x2cb   : > { %5197 = vrot.lane.b32.xlu1 %v9005_v23, %s5434_s7  ;;  %v7236_v16 = vsel %vm1153_vm6, %v7092_v29, %v1644_v38  ;;  %v4865_v42 = vunpack.i.h.bf16 %v7104_v27  ;;  %v4905_v61 = vunpack.i.h.bf16 %v4903_v30  ;;  %v4904_v52 = vunpack.i.l.bf16 %v4903_v30 }
 0x2cc   : > { %5192 = vrot.lane.b32.xlu0 %v7012_v35, %s5431_s22  ;;  %v2601_v26 = vsel %vm2600_vm13, %v2568_v24, %v4909_v11  ;;  %v2617_v34 = vsel %vm2600_vm13, %v2584_v43, %v4910_v62  ;;  %v4825_v35 = vunpack.i.h.bf16 %v6990_v2  ;;  %v9007_v58 = vpack.i.bf16 %v7086_v10, %v8991_v33 }
 0x2cd   : > { %v4918_v55 = vpop.permute.xlu1 %4917  ;;  %2780 = vmatmul.mubr.f32.vlgmr.msra.gmra.mrb[0].mxu0 %v2601_v26  ;;  %2860 = vmatmul.mubr.f32.vlgmr.msra.gmra.mrb[0].mxu1 %v2617_v34  ;;  %v5266_v13 = vpack.i.bf16 %v9008_v32, %v6273_v47  ;;  %v7251_v2 = vsel %vm922_vm5, %v6275_v48, %v4790_v63  ;;  %v2420_v62 = vsel %vm922_vm5, %v9004_v20, %v4785_v15  ;;  %v1518_v30 = vrot.slane %v8988_v40, 2 }
 0x2ce   : > { %v4913_v36 = vpop.permute.xlu0 %4912  ;;  %4489 = vmatprep.mubr.msk.f32.mxu0 %vm922_vm5, %v7139_v49  ;;  %4505 = vmatprep.mubr.msk.f32.mxu1 %vm922_vm5, %v1695_v18  ;;  %v5251_v49 = vpack.i.bf16 %v7236_v16, %v7232_v0  ;;  %v2421_v18 = vsel %vm922_vm5, %v6273_v47, %v4789_v14  ;;  %v7263_v23 = vrot.slane %v8989_v5, 2  ;;  %v2437_v24 = vsel %vm2435_vm8, %v7169_v17, %v4825_v35 }
 0x2cf   : > { %5207 = vrot.lane.b32.xlu1 %v9007_v58, %s5433_s5  ;;  %v4915_v27 = vunpack.i.h.bf16 %v4913_v36  ;;  %v4914_v38 = vunpack.i.l.bf16 %v4913_v36  ;;  %v2470_v63 = vsel %vm2468_vm9, %v2437_v24, %v4904_v52  ;;  %v4920_v34 = vunpack.i.h.bf16 %v4918_v55 }
 0x2d0   : > { %5202 = vrot.lane.b32.xlu0 %v7056_v21, %s5430_s14  ;;  %v2453_v21 = vsel %vm2435_vm8, %v2420_v62, %v4865_v42  ;;  %v4919_v14 = vunpack.i.l.bf16 %v4918_v55  ;;  %v4794_v17 = vunpack.i.l.bf16 %v6946_v25  ;;  %v4829_v35 = vunpack.i.l.bf16 %v6986_v28 }
 0x2d1   : > { %v4928_v11 = vpop.permute.xlu1 %4927  ;;  %v2486_v26 = vsel %vm2468_vm9, %v2453_v21, %v4905_v61  ;;  %v2503_v40 = vsel %vm2501_vm10, %v2470_v63, %v4914_v38  ;;  %v4869_v42 = vunpack.i.l.bf16 %v7094_v51  ;;  %v1646_v58 = vrot.slane %v9008_v32, 1 }
 0x2d2   : > { %v4923_v43 = vpop.permute.xlu0 %4922  ;;  %v2519_v5 = vsel %vm2501_vm10, %v2486_v26, %v4915_v27  ;;  %v4930_v55 = vunpack.i.h.bf16 %v4928_v11  ;;  %v4929_v61 = vunpack.i.l.bf16 %v4928_v11  ;;  %v9009_v62 = vpack.i.bf16 %v7117_v4, %v7110_v31 }
 0x2d3   : > { %5217 = vrot.lane.b32.xlu1 %v7062_v6, %s5431_s22  ;;  %v4925_v20 = vunpack.i.h.bf16 %v4923_v43  ;;  %v4924_v15 = vunpack.i.l.bf16 %v4923_v43  ;;  %v7281_v6 = vsel %vm1234_vm7, %v1518_v30, %v7263_v23  ;;  %v2536_v24 = vsel %vm2534_vm11, %v2503_v40, %v4919_v14 }
 0x2d4   : > { %5212 = vrot.lane.b32.xlu0 %v7102_v53, %s5432_s23  ;;  %v2552_v21 = vsel %vm2534_vm11, %v2519_v5, %v4920_v34  ;;  %v2438_v26 = vsel %vm2435_vm8, %v7181_v46, %v4829_v35 }
 0x2d5   : > { %v4938_v36 = vpop.permute.xlu1 %4937  ;;  %v2569_v30 = vsel %vm2567_vm12, %v2536_v24, %v4924_v15  ;;  %v2585_v63 = vsel %vm2567_vm12, %v2552_v21, %v4925_v20  ;;  %v2471_v34 = vsel %vm2468_vm9, %v2438_v26, %v4929_v61  ;;  %v1659_v15 = vrot.slane %v8924_v57, 2  ;;  %v9013_v24 = vld [vmem:[#allocation75_spill] sm:$0xff] }
 0x2d6   : > { %v4933_v52 = vpop.permute.xlu0 %4932  ;;  %v4940_v43 = vunpack.i.h.bf16 %v4938_v36  ;;  %v4939_v11 = vunpack.i.l.bf16 %v4938_v36  ;;  %v1699_v20 = vrot.slane %v8925_v60, 2  ;;  %v9011_v57 = vpack.i.bf16 %v7161_v44, %v7157_v7 }
 0x2d7   : > { %v4935_v27 = vunpack.i.h.bf16 %v4933_v52  ;;  %v4934_v38 = vunpack.i.l.bf16 %v4933_v52  ;;  %5227 = vrot.lane.b32.xlu1 %v9009_v62, %s5430_s14  ;;  %v2454_v52 = vsel %vm2435_vm8, %v2421_v18, %v4869_v42  ;;  %v9010_v42 = vpack.i.bf16 %v7149_v56, %v7086_v10  ;;  %v9012_v56 = vld [vmem:[#allocation23_spill] sm:$0xff] }
 0x2d8   : > { %5222 = vrot.lane.b32.xlu0 %v7145_v54, %s5434_s7  ;;  %v2487_v40 = vsel %vm2468_vm9, %v2454_v52, %v4930_v55  ;;  %v2504_v55 = vsel %vm2501_vm10, %v2471_v34, %v4939_v11  ;;  %v5261_v60 = vpack.i.bf16 %v7281_v6, %v6701_v3  ;;  %v1401_v21 = vrot.slane %v9013_v24, 1 }
 0x2d9   : > { %v4948_v31 = vpop.permute.xlu1 %4947  ;;  %v2602_v4 = vsel %vm2600_vm13, %v2569_v30, %v4934_v38  ;;  %v2618_v14 = vsel %vm2600_vm13, %v2585_v63, %v4935_v27  ;;  %v2520_v61 = vsel %vm2501_vm10, %v2487_v40, %v4940_v43  ;;  %v1647_v27 = vrot.slane %v9012_v56, 1  ;;  %v9014_v43 = vld [vmem:[#allocation85_spill] sm:$0xff] }
 0x2da   : > { %v4943_v5 = vpop.permute.xlu0 %4942  ;;  %2785 = vmatmul.mubr.f32.gmra.mrb[2].mxu0 %v2602_v4  ;;  %2865 = vmatmul.mubr.f32.gmra.mrb[2].mxu1 %v2618_v14  ;;  %v4950_v36 = vunpack.i.h.bf16 %v4948_v31  ;;  %v4949_v46 = vunpack.i.l.bf16 %v4948_v31  ;;  %v1441_v11 = vrot.slane %v9014_v43, 1  ;;  %v1481_v63 = vrot.slane %v9013_v24, 2 }
 0x2db   : > { %v4945_v35 = vunpack.i.h.bf16 %v4943_v5  ;;  %v4944_v18 = vunpack.i.l.bf16 %v4943_v5  ;;  %5237 = vrot.lane.b32.xlu1 %v9010_v42, %s5429_s13  ;;  %4490 = vmatprep.mubr.msk.f32.mxu0 %vm922_vm5, %v6610_v8  ;;  %v1660_v31 = vsel %vm1234_vm7, %v6593_v19, %v1659_v15  ;;  %v1700_v4 = vsel %vm1234_vm7, %v6692_v45, %v1699_v20  ;;  %v9015_v15 = vld [vmem:[#allocation93_spill] sm:$0xff] }
 0x2dc   : > { %5232 = vrot.lane.b32.xlu0 %v9011_v57, %s5433_s5  ;;  %4506 = vmatprep.mubr.msk.f32.mxu1 %vm922_vm5, %v6715_v12  ;;  %v1521_v12 = vrot.slane %v9014_v43, 2  ;;  %v1648_v40 = vsel %vm1153_vm6, %v1646_v58, %v1647_v27  ;;  %v7342_v19 = vsel %vm1153_vm6, %v9006_v41, %v1401_v21  ;;  %v7346_v45 = vsel %vm1153_vm6, %v7092_v29, %v1441_v11  ;;  %v9018_v29 = vld [vmem:[#allocation50_spill] sm:$0xff]  ;;  %v9021_v11 = vld [vmem:[#allocation113_spill] sm:$0xff] }
 0x2dd   : > { %v4958_v38 = vpop.permute.xlu1 %4957  ;;  %v2537_v8 = vsel %vm2534_vm11, %v2504_v55, %v4944_v18  ;;  %v2553_v62 = vsel %vm2534_vm11, %v2520_v61, %v4945_v35  ;;  %v1609_v20 = vrot.slane %v9015_v15, 1  ;;  %v9017_v35 = vld [vmem:[#allocation24_spill] sm:$0xff]  ;;  %v2423_v42 = vsel %vm922_vm5, %v9018_v29, %v4794_v17  ;;  %v9020_v43 = vld [vmem:[#allocation114_spill] sm:$0xff] }
 0x2de   : > { %v4960_v30 = vunpack.i.h.bf16 %v4958_v38  ;;  %v4959_v7 = vunpack.i.l.bf16 %v4958_v38  ;;  %v4953_v44 = vpop.permute.xlu0 %4952  ;;  %v2570_v26 = vsel %vm2567_vm12, %v2537_v8, %v4949_v46  ;;  %v2586_v52 = vsel %vm2567_vm12, %v2553_v62, %v4950_v36  ;;  %v9019_v38 = vld [vmem:[#allocation116_spill] sm:$0xff] }
 0x2df   : > { %5247 = vrot.lane.b32.xlu1 %v7102_v53, %s5431_s22  ;;  %v4830_v53 = vunpack.i.h.bf16 %v6986_v28  ;;  %v4870_v36 = vunpack.i.h.bf16 %v7094_v51  ;;  %v9016_v28 = vld [vmem:[#allocation131_spill] sm:$0xff]  ;;  %v1522_v41 = vsel %vm1234_vm7, %v7263_v23, %v1521_v12  ;;  %v1649_v18 = vrot.slane %v9017_v35, 1 }
 0x2e0   : > { %5242 = vrot.lane.b32.xlu0 %v7215_v1, %s5432_s23  ;;  %v2603_v14 = vsel %vm2600_vm13, %v2570_v26, %v4959_v7  ;;  %v2619_v34 = vsel %vm2600_vm13, %v2586_v52, %v4960_v30  ;;  %v1482_v58 = vsel %vm1234_vm7, %v9016_v28, %v1481_v63  ;;  %v4955_v55 = vunpack.i.h.bf16 %v4953_v44 }
 0x2e1   : > { %v4968_v5 = vpop.permute.xlu1 %4967  ;;  %2790 = vmatmul.mubr.f32.gmra.mrb[4].mxu0 %v2603_v14  ;;  %2870 = vmatmul.mubr.f32.gmra.mrb[4].mxu1 %v2619_v34  ;;  %v4954_v51 = vunpack.i.l.bf16 %v4953_v44  ;;  %v5276_v8 = vpack.i.bf16 %v1648_v40, %v9019_v38  ;;  %v5281_v62 = vpack.i.bf16 %v7346_v45, %v7342_v19  ;;  %v2439_v17 = vsel %vm2435_vm8, %v7177_v39, %v4830_v53  ;;  %v9024_v38 = vld [vmem:[#allocation96_spill] sm:$0xff] }
 0x2e2   : > { %v4963_v46 = vpop.permute.xlu0 %4962  ;;  %4491 = vmatprep.mubr.msk.f32.mxu0 %vm922_vm5, %v1660_v31  ;;  %4507 = vmatprep.mubr.msk.f32.mxu1 %vm922_vm5, %v1700_v4  ;;  %v5286_v21 = vpack.i.bf16 %v1522_v41, %v1482_v58  ;;  %v4834_v30 = vunpack.i.l.bf16 %v9021_v11  ;;  %v2455_v7 = vsel %vm2435_vm8, %v7251_v2, %v4870_v36  ;;  %v1650_v16 = vsel %vm1153_vm6, %v1647_v27, %v1649_v18  ;;  %v9022_v27 = vld [vmem:[#allocation119_spill] sm:$0xff] }
 0x2e3   : > { %5257 = vrot.lane.b32.xlu1 %v7145_v54, %s5430_s14  ;;  %v4965_v61 = vunpack.i.h.bf16 %v4963_v46  ;;  %v4964_v57 = vunpack.i.l.bf16 %v4963_v46  ;;  %v1610_v54 = vsel %vm1153_vm6, %v9020_v43, %v1609_v20  ;;  %v2472_v44 = vsel %vm2468_vm9, %v2439_v17, %v4954_v51 }
 0x2e4   : > { %5252 = vrot.lane.b32.xlu0 %v5251_v49, %s5434_s7  ;;  %v2488_v49 = vsel %vm2468_vm9, %v2455_v7, %v4955_v55  ;;  %v4970_v63 = vunpack.i.h.bf16 %v4968_v5  ;;  %v4969_v12 = vunpack.i.l.bf16 %v4968_v5  ;;  %v4874_v31 = vunpack.i.l.bf16 %v9022_v27 }
 0x2e5   : > { %v4978_v24 = vpop.permute.xlu1 %4977  ;;  %v2505_v39 = vsel %vm2501_vm10, %v2472_v44, %v4964_v57  ;;  %v2521_v26 = vsel %vm2501_vm10, %v2488_v49, %v4965_v61  ;;  %v5296_v14 = vpack.i.bf16 %v1650_v16, %v1610_v54  ;;  %v2440_v34 = vsel %vm2435_vm8, %v7165_v59, %v4834_v30  ;;  %v9023_v57 = vld [vmem:[#allocation88_spill] sm:$0xff]  ;;  %v9025_v54 = vld [vmem:[#allocation126_spill] sm:$0xff]  ;;  %v9026_v16 = vld [vmem:[#allocation105_spill] sm:$0xff] }
 0x2e6   : > { %v4973_v0 = vpop.permute.xlu0 %4972  ;;  %v4980_v40 = vunpack.i.h.bf16 %v4978_v24  ;;  %v4979_v53 = vunpack.i.l.bf16 %v4978_v24  ;;  %v2538_v45 = vsel %vm2534_vm11, %v2505_v39, %v4969_v12  ;;  %v2554_v20 = vsel %vm2534_vm11, %v2521_v26, %v4970_v63 }
 0x2e7   : > { %5267 = vrot.lane.b32.xlu1 %v5266_v13, %s5432_s23  ;;  %v4975_v52 = vunpack.i.h.bf16 %v4973_v0  ;;  %v4974_v2 = vunpack.i.l.bf16 %v4973_v0  ;;  %v2456_v58 = vsel %vm2435_vm8, %v2423_v42, %v4874_v31  ;;  %v5291_v0 = vpack.i.bf16 %v9012_v56, %v6275_v48  ;;  %v9028_v31 = vld [vmem:[#allocation107_spill] sm:$0xff] }
 0x2e8   : > { %5262 = vrot.lane.b32.xlu0 %v5261_v60, %s5433_s5  ;;  %v2473_v55 = vsel %vm2468_vm9, %v2440_v34, %v4979_v53  ;;  %v2489_v51 = vsel %vm2468_vm9, %v2456_v58, %v4980_v40  ;;  %v9029_v34 = vld [vmem:[#allocation102_spill] sm:$0xff]  ;;  %v9031_v58 = vld [vmem:[#allocation101_spill] sm:$0xff] }
 0x2e9   : > { %v4988_v4 = vpop.permute.xlu1 %4987  ;;  %v2571_v46 = vsel %vm2567_vm12, %v2538_v45, %v4974_v2  ;;  %v2587_v59 = vsel %vm2567_vm12, %v2554_v20, %v4975_v52  ;;  %v9027_v52 = vld [vmem:[#allocation124_spill] sm:$0xff]  ;;  %v4755_v40 = vunpack.i.h.bf16 %v9029_v34  ;;  %v4875_v45 = vunpack.i.h.bf16 %v9022_v27 }
 0x2ea   : > { %v4983_v5 = vpop.permute.xlu0 %4982  ;;  %v4990_v36 = vunpack.i.h.bf16 %v4988_v4  ;;  %v4989_v60 = vunpack.i.l.bf16 %v4988_v4 }
 0x2eb   : > { %v4985_v19 = vunpack.i.h.bf16 %v4983_v5  ;;  %v4984_v13 = vunpack.i.l.bf16 %v4983_v5  ;;  %5277 = vrot.lane.b32.xlu1 %v5276_v8, %s5434_s7  ;;  %v1704_v8 = vrot.slane %v9024_v38, 2 }
 0x2ec   : > { %5272 = vrot.lane.b32.xlu0 %v7215_v1, %s5431_s22  ;;  %v1664_v1 = vrot.slane %v9023_v57, 2  ;;  %v2506_v30 = vsel %vm2501_vm10, %v2473_v55, %v4989_v60  ;;  %v2522_v7 = vsel %vm2501_vm10, %v2489_v51, %v4990_v36  ;;  %v9033_v55 = vld [vmem:[#allocation51_spill] sm:$0xff] }
 0x2ed   : > { %v4998_v41 = vpop.permute.xlu1 %4997  ;;  %v2604_v18 = vsel %vm2600_vm13, %v2571_v46, %v4984_v13  ;;  %v2620_v29 = vsel %vm2600_vm13, %v2587_v59, %v4985_v19  ;;  %v1705_v4 = vsel %vm1234_vm7, %v9028_v31, %v1704_v8  ;;  %v4835_v19 = vunpack.i.h.bf16 %v9021_v11  ;;  %v9030_v46 = vld [vmem:[#allocation29_spill] sm:$0xff]  ;;  %v9032_v11 = vld [vmem:[#allocation134_spill] sm:$0xff] }
 0x2ee   : > { %v4993_v61 = vpop.permute.xlu0 %4992  ;;  %2795 = vmatmul.mubr.f32.gmra.mrb[6].mxu0 %v2604_v18  ;;  %2875 = vmatmul.mubr.f32.gmra.mrb[6].mxu1 %v2620_v29  ;;  %v5000_v17 = vunpack.i.h.bf16 %v4998_v41  ;;  %v4999_v24 = vunpack.i.l.bf16 %v4998_v41  ;;  %v1665_v2 = vsel %vm1234_vm7, %v9027_v52, %v1664_v1  ;;  %v2408_v59 = vsel %vm922_vm5, %v9030_v46, %v4755_v40 }
 0x2ef   : > { %v4995_v43 = vunpack.i.h.bf16 %v4993_v61  ;;  %v4994_v42 = vunpack.i.l.bf16 %v4993_v61  ;;  %5287 = vrot.lane.b32.xlu1 %v5286_v21, %s5433_s5  ;;  %4492 = vmatprep.mubr.msk.f32.mxu0 %vm922_vm5, %v9025_v54  ;;  %v4759_v41 = vunpack.i.l.bf16 %v9031_v58  ;;  %v4799_v29 = vunpack.i.l.bf16 %v9032_v11 }
 0x2f0   : > { %5282 = vrot.lane.b32.xlu0 %v5281_v62, %s5430_s14  ;;  %4508 = vmatprep.mubr.msk.f32.mxu1 %vm922_vm5, %v9026_v16  ;;  %v2441_v27 = vsel %vm2435_vm8, %v2408_v59, %v4835_v19  ;;  %v9035_v16 = vld [vmem:[#allocation53_spill] sm:$0xff] }
 0x2f1   : > { %v5008_v49 = vpop.permute.xlu1 %5007  ;;  %v2539_v44 = vsel %vm2534_vm11, %v2506_v30, %v4994_v42  ;;  %v2555_v21 = vsel %vm2534_vm11, %v2522_v7, %v4995_v43  ;;  %v9034_v7 = vld [vmem:[#allocation31_spill] sm:$0xff] }
 0x2f2   : > { %v5010_v63 = vunpack.i.h.bf16 %v5008_v49  ;;  %v5009_v12 = vunpack.i.l.bf16 %v5008_v49  ;;  %v5003_v39 = vpop.permute.xlu0 %5002  ;;  %v2572_v26 = vsel %vm2567_vm12, %v2539_v44, %v4999_v24  ;;  %v2588_v62 = vsel %vm2567_vm12, %v2555_v21, %v5000_v17  ;;  %v9036_v44 = vld [vmem:[#allocation122_spill] sm:$0xff] }
 0x2f3   : > { %5297 = vrot.lane.b32.xlu1 %v5296_v14, %s5434_s7  ;;  %v4795_v14 = vunpack.i.h.bf16 %v6946_v25  ;;  %v5005_v36 = vunpack.i.h.bf16 %v5003_v39  ;;  %v5004_v60 = vunpack.i.l.bf16 %v5003_v39  ;;  %v2425_v49 = vsel %vm922_vm5, %v9035_v16, %v4799_v29 }
 0x2f4   : > { %5292 = vrot.lane.b32.xlu0 %v5291_v0, %s5432_s23  ;;  %v2605_v53 = vsel %vm2600_vm13, %v2572_v26, %v5009_v12  ;;  %v2621_v5 = vsel %vm2600_vm13, %v2588_v62, %v5010_v63  ;;  %v2409_v0 = vsel %vm922_vm5, %v9034_v7, %v4759_v41  ;;  %v4839_v21 = vunpack.i.l.bf16 %v9036_v44  ;;  %v9037_v63 = vld [vmem:[#allocation111_spill] sm:$0xff]  ;;  %v9038_v41 = vld [vmem:[#allocation89_spill] sm:$0xff] }
 0x2f5   : > { %v5018_v13 = vpop.permute.xlu1 %5017  ;;  %2800 = vmatmul.mubr.f32.gmra.mrb[8].mxu0 %v2605_v53  ;;  %2880 = vmatmul.mubr.f32.gmra.mrb[8].mxu1 %v2621_v5  ;;  %v2424_v51 = vsel %vm922_vm5, %v9033_v55, %v4795_v14  ;;  %v2474_v38 = vsel %vm2468_vm9, %v2441_v27, %v5004_v60  ;;  %v4879_v12 = vunpack.i.l.bf16 %v9037_v63 }
 0x2f6   : > { %v5013_v20 = vpop.permute.xlu0 %5012  ;;  %4493 = vmatprep.mubr.msk.f32.mxu0 %vm922_vm5, %v1665_v2  ;;  %4509 = vmatprep.mubr.msk.f32.mxu1 %vm922_vm5, %v1705_v4  ;;  %v2457_v57 = vsel %vm2435_vm8, %v2424_v51, %v4875_v45  ;;  %v5020_v17 = vunpack.i.h.bf16 %v5018_v13  ;;  %v5019_v24 = vunpack.i.l.bf16 %v5018_v13  ;;  %v2442_v19 = vsel %vm2435_vm8, %v2409_v0, %v4839_v21 }
 0x2f7   : > { %v5015_v25 = vunpack.i.h.bf16 %v5013_v20  ;;  %v5014_v18 = vunpack.i.l.bf16 %v5013_v20  ;;  %v2490_v8 = vsel %vm2468_vm9, %v2457_v57, %v5005_v36  ;;  %v2458_v13 = vsel %vm2435_vm8, %v2425_v49, %v4879_v12  ;;  %v9040_v57 = vld [vmem:[#allocation125_spill] sm:$0xff]  ;;  %v9042_v49 = vld [vmem:[#allocation123_spill] sm:$0xff] }
 0x2f8   : > { %v9043_v12 = vld [vmem:[#allocation109_spill] sm:$0xff] }
 0x2f9   : > { %v5028_v61 = vpop.permute.xlu1 %5027  ;;  %v2507_v43 = vsel %vm2501_vm10, %v2474_v38, %v5014_v18  ;;  %v2523_v42 = vsel %vm2501_vm10, %v2490_v8, %v5015_v25  ;;  %v1669_v25 = vrot.slane %v9038_v41, 2  ;;  %v9039_v18 = vld [vmem:[#allocation97_spill] sm:$0xff] }
 0x2fa   : > { %v5023_v1 = vpop.permute.xlu0 %5022  ;;  %v5030_v26 = vunpack.i.h.bf16 %v5028_v61  ;;  %v5029_v62 = vunpack.i.l.bf16 %v5028_v61  ;;  %v2540_v4 = vsel %vm2534_vm11, %v2507_v43, %v5019_v24  ;;  %v2556_v34 = vsel %vm2534_vm11, %v2523_v42, %v5020_v17 }
 0x2fb   : > { %v5025_v54 = vunpack.i.h.bf16 %v5023_v1  ;;  %v5024_v30 = vunpack.i.l.bf16 %v5023_v1  ;;  %v1709_v29 = vrot.slane %v9039_v18, 2  ;;  %v9041_v1 = vld [vmem:[#allocation106_spill] sm:$0xff]  ;;  %v4760_v42 = vunpack.i.h.bf16 %v9031_v58 }
 0x2fc   : > { %v2475_v60 = vsel %vm2468_vm9, %v2442_v19, %v5029_v62  ;;  %v2491_v46 = vsel %vm2468_vm9, %v2458_v13, %v5030_v26  ;;  %v1670_v21 = vsel %vm1234_vm7, %v9042_v49, %v1669_v25  ;;  %v4800_v26 = vunpack.i.h.bf16 %v9032_v11 }
 0x2fd   : > { %v5038_v39 = vpop.permute.xlu1 %5037  ;;  %v2573_v5 = vsel %vm2567_vm12, %v2540_v4, %v5024_v30  ;;  %v2589_v14 = vsel %vm2567_vm12, %v2556_v34, %v5025_v54  ;;  %v4840_v62 = vunpack.i.h.bf16 %v9036_v44 }
 0x2fe   : > { %v5033_v52 = vpop.permute.xlu0 %5032  ;;  %v5040_v40 = vunpack.i.h.bf16 %v5038_v39  ;;  %v5039_v53 = vunpack.i.l.bf16 %v5038_v39  ;;  %v1710_v39 = vsel %vm1234_vm7, %v9043_v12, %v1709_v29  ;;  %v9049_v12 = vld [vmem:[#allocation132_spill] sm:$0xff] }
 0x2ff   : > { %v5035_v2 = vunpack.i.h.bf16 %v5033_v52  ;;  %v5034_v31 = vunpack.i.l.bf16 %v5033_v52 }
 0x300   : > { %v2508_v38 = vsel %vm2501_vm10, %v2475_v60, %v5039_v53  ;;  %v2524_v8 = vsel %vm2501_vm10, %v2491_v46, %v5040_v40  ;;  %v9044_v53 = vld [vmem:[#allocation32_spill] sm:$0xff] }
 0x301   : > { %v5048_v45 = vpop.permute.xlu1 %5047  ;;  %v2606_v20 = vsel %vm2600_vm13, %v2573_v5, %v5034_v31  ;;  %v2622_v36 = vsel %vm2600_vm13, %v2589_v14, %v5035_v2  ;;  %v4880_v2 = vunpack.i.h.bf16 %v9037_v63  ;;  %v2410_v11 = vsel %vm922_vm5, %v9044_v53, %v4760_v42  ;;  %v9045_v14 = vld [vmem:[#allocation54_spill] sm:$0xff] }
 0x302   : > { %v5043_v59 = vpop.permute.xlu0 %5042  ;;  %2805 = vmatmul.mubr.f32.gmra.mrb[10].mxu0 %v2606_v20  ;;  %2885 = vmatmul.mubr.f32.gmra.mrb[10].mxu1 %v2622_v36  ;;  %v5050_v55 = vunpack.i.h.bf16 %v5048_v45  ;;  %v5049_v51 = vunpack.i.l.bf16 %v5048_v45  ;;  %v2426_v19 = vsel %vm922_vm5, %v9045_v14, %v4800_v26  ;;  %v2443_v63 = vsel %vm2435_vm8, %v2410_v11, %v4840_v62  ;;  %v9053_v14 = vld [vmem:[#allocation98_spill] sm:$0xff] }
 0x303   : > { %v5045_v27 = vunpack.i.h.bf16 %v5043_v59  ;;  %v5044_v61 = vunpack.i.l.bf16 %v5043_v59  ;;  %4494 = vmatprep.mubr.msk.f32.mxu0 %vm922_vm5, %v9040_v57  ;;  %4510 = vmatprep.mubr.msk.f32.mxu1 %vm922_vm5, %v9041_v1  ;;  %v2459_v13 = vsel %vm2435_vm8, %v2426_v19, %v4880_v2 }
 0x305   : > { %v5058_v17 = vpop.permute.xlu1 %5057  ;;  %v2541_v24 = vsel %vm2534_vm11, %v2508_v38, %v5044_v61  ;;  %v2557_v43 = vsel %vm2534_vm11, %v2524_v8, %v5045_v27 }
 0x306   : > { %v5060_v54 = vunpack.i.h.bf16 %v5058_v17  ;;  %v5059_v30 = vunpack.i.l.bf16 %v5058_v17  ;;  %v5053_v7 = vpop.permute.xlu0 %5052  ;;  %v2574_v0 = vsel %vm2567_vm12, %v2541_v24, %v5049_v51  ;;  %v2590_v16 = vsel %vm2567_vm12, %v2557_v43, %v5050_v55  ;;  %v9046_v43 = vld [vmem:[#allocation103_spill] sm:$0xff] }
 0x307   : > { %v5055_v4 = vunpack.i.h.bf16 %v5053_v7  ;;  %v5054_v34 = vunpack.i.l.bf16 %v5053_v7  ;;  %v4764_v42 = vunpack.i.l.bf16 %v9046_v43 }
 0x308   : > { %v2607_v52 = vsel %vm2600_vm13, %v2574_v0, %v5059_v30  ;;  %v2623_v58 = vsel %vm2600_vm13, %v2590_v16, %v5060_v54  ;;  %v9047_v54 = vld [vmem:[#allocation136_spill] sm:$0xff]  ;;  %v9048_v0 = vld [vmem:[#allocation139_spill] sm:$0xff] }
 0x309   : > { %v5068_v31 = vpop.permute.xlu1 %5067  ;;  %2810 = vmatmul.mubr.f32.gmra.mrb[12].mxu0 %v2607_v52  ;;  %2890 = vmatmul.mubr.f32.gmra.mrb[12].mxu1 %v2623_v58  ;;  %v2492_v20 = vsel %vm2468_vm9, %v2459_v13, %v5055_v4  ;;  %v2476_v36 = vsel %vm2468_vm9, %v2443_v63, %v5054_v34  ;;  %v4804_v30 = vunpack.i.l.bf16 %v9047_v54  ;;  %v4844_v16 = vunpack.i.l.bf16 %v9048_v0  ;;  %v9050_v58 = vld [vmem:[#allocation34_spill] sm:$0xff] }
 0x30a   : > { %v5063_v40 = vpop.permute.xlu0 %5062  ;;  %4495 = vmatprep.mubr.msk.f32.mxu0 %vm922_vm5, %v1670_v21  ;;  %4511 = vmatprep.mubr.msk.f32.mxu1 %vm922_vm5, %v1710_v39  ;;  %v5070_v60 = vunpack.i.h.bf16 %v5068_v31  ;;  %v5069_v46 = vunpack.i.l.bf16 %v5068_v31  ;;  %v2411_v2 = vsel %vm922_vm5, %v9050_v58, %v4764_v42  ;;  %v9051_v31 = vld [vmem:[#allocation56_spill] sm:$0xff] }
 0x30b   : > { %v5065_v44 = vunpack.i.h.bf16 %v5063_v40  ;;  %v5064_v5 = vunpack.i.l.bf16 %v5063_v40  ;;  %v2427_v4 = vsel %vm922_vm5, %v9051_v31, %v4804_v30  ;;  %v2444_v40 = vsel %vm2435_vm8, %v2411_v2, %v4844_v16  ;;  %v9057_v16 = vld [vmem:[#allocation135_spill] sm:$0xff] }
 0x30d   : > { %v5078_v45 = vpop.permute.xlu1 %5077  ;;  %v2509_v41 = vsel %vm2501_vm10, %v2476_v36, %v5064_v5  ;;  %v2525_v25 = vsel %vm2501_vm10, %v2492_v20, %v5065_v44  ;;  %v9052_v44 = vld [vmem:[#allocation90_spill] sm:$0xff] }
 0x30e   : > { %v7492_v59 = vpop.permute.xlu0 %5072  ;;  %v5080_v18 = vunpack.i.h.bf16 %v5078_v45  ;;  %v5079_v29 = vunpack.i.l.bf16 %v5078_v45  ;;  %v2542_v57 = vsel %vm2534_vm11, %v2509_v41, %v5069_v46  ;;  %v2558_v1 = vsel %vm2534_vm11, %v2525_v25, %v5070_v60  ;;  %v9054_v25 = vld [vmem:[#allocation104_spill] sm:$0xff] }
 0x30f   : > { %v5074_v49 = vunpack.i.l.bf16 %v7492_v59  ;;  %v1674_v5 = vrot.slane %v9052_v44, 2  ;;  %v5075_v2 = vunpack.i.h.bf16 %v7492_v59 }
 0x310   : > { %v2575_v38 = vsel %vm2567_vm12, %v2542_v57, %v5079_v29  ;;  %v2591_v8 = vsel %vm2567_vm12, %v2558_v1, %v5080_v18  ;;  %v4769_v18 = vunpack.i.l.bf16 %v9054_v25  ;;  %v4765_v29 = vunpack.i.h.bf16 %v9046_v43 }
 0x311   : > { %v5088_v55 = vpop.permute.xlu1 %5087  ;;  %v2460_v53 = vsel %vm2435_vm8, %v2427_v4, %v5074_v49  ;;  %v4809_v49 = vunpack.i.l.bf16 %v9057_v16 }
 0x312   : > { %v5090_v51 = vunpack.i.h.bf16 %v5088_v55  ;;  %v5089_v27 = vunpack.i.l.bf16 %v5088_v55  ;;  %v5083_v61 = vpop.permute.xlu0 %5082 }
 0x313   : > { %v5085_v39 = vunpack.i.h.bf16 %v5083_v61  ;;  %v5084_v26 = vunpack.i.l.bf16 %v5083_v61 }
 0x314   : > { %v2608_v17 = vsel %vm2600_vm13, %v2575_v38, %v5089_v27  ;;  %v2624_v24 = vsel %vm2600_vm13, %v2591_v8, %v5090_v51  ;;  %v9055_v8 = vld [vmem:[#allocation128_spill] sm:$0xff] }
 0x315   : > { %v5098_v7 = vpop.permute.xlu1 %5097  ;;  %2815 = vmatmul.mubr.f32.gmra.mrb[14].mxu0 %v2608_v17  ;;  %2895 = vmatmul.mubr.f32.gmra.mrb[14].mxu1 %v2624_v24  ;;  %v2477_v19 = vsel %vm2468_vm9, %v2444_v40, %v5084_v26  ;;  %v2493_v63 = vsel %vm2468_vm9, %v2460_v53, %v5085_v39  ;;  %v1675_v17 = vsel %vm1234_vm7, %v9055_v8, %v1674_v5  ;;  %v9056_v24 = vld [vmem:[#allocation115_spill] sm:$0xff]  ;;  %v9058_v39 = vld [vmem:[#allocation37_spill] sm:$0xff] }
 0x316   : > { %v5093_v21 = vpop.permute.xlu0 %5092  ;;  %4496 = vmatprep.mubr.msk.f32.mxu0 %vm922_vm5, %v9049_v12  ;;  %4512 = vmatprep.mubr.msk.f32.mxu1 %vm922_vm5, %v7018_v9  ;;  %v1714_v9 = vrot.slane %v9053_v14, 2  ;;  %v5100_v13 = vunpack.i.h.bf16 %v5098_v7  ;;  %v5099_v45 = vunpack.i.l.bf16 %v5098_v7  ;;  %v2413_v26 = vsel %vm922_vm5, %v9058_v39, %v4769_v18  ;;  %v9060_v40 = vld [vmem:[#allocation59_spill] sm:$0xff] }
 0x317   : > { %v5095_v62 = vunpack.i.h.bf16 %v5093_v21  ;;  %v5094_v52 = vunpack.i.l.bf16 %v5093_v21  ;;  %v4805_v21 = vunpack.i.h.bf16 %v9047_v54  ;;  %v2429_v53 = vsel %vm922_vm5, %v9060_v40, %v4809_v49 }
 0x318   : > { %v1715_v42 = vsel %vm1234_vm7, %v9056_v24, %v1714_v9  ;;  %v9062_v9 = vld [vmem:[#allocation120_spill] sm:$0xff] }
 0x319   : > { %v5108_v34 = vpop.permute.xlu1 %5107  ;;  %v2510_v20 = vsel %vm2501_vm10, %v2477_v19, %v5094_v52  ;;  %v2526_v36 = vsel %vm2501_vm10, %v2493_v63, %v5095_v62  ;;  %v4845_v62 = vunpack.i.h.bf16 %v9048_v0  ;;  %v9059_v52 = vld [vmem:[#allocation35_spill] sm:$0xff]  ;;  %v4849_v19 = vunpack.i.l.bf16 %v9062_v9 }
 0x31a   : > { %v5103_v11 = vpop.permute.xlu0 %5102  ;;  %v2543_v61 = vsel %vm2534_vm11, %v2510_v20, %v5099_v45  ;;  %v2559_v57 = vsel %vm2534_vm11, %v2526_v36, %v5100_v13  ;;  %v2412_v58 = vsel %vm922_vm5, %v9059_v52, %v4765_v29  ;;  %v5110_v31 = vunpack.i.h.bf16 %v5108_v34 }
 0x31b   : > { %v5105_v60 = vunpack.i.h.bf16 %v5103_v11  ;;  %v5104_v46 = vunpack.i.l.bf16 %v5103_v11  ;;  %v5109_v4 = vunpack.i.l.bf16 %v5108_v34  ;;  %v9061_v11 = vld [vmem:[#allocation57_spill] sm:$0xff]  ;;  %v2445_v63 = vsel %vm2435_vm8, %v2412_v58, %v4845_v62  ;;  %v9063_v58 = vld [vmem:[#allocation91_spill] sm:$0xff] }
 0x31c   : > { %v2428_v44 = vsel %vm922_vm5, %v9061_v11, %v4805_v21 }
 0x31d   : > { %v5118_v41 = vpop.permute.xlu1 %5117  ;;  %v2576_v1 = vsel %vm2567_vm12, %v2543_v61, %v5104_v46  ;;  %v2592_v38 = vsel %vm2567_vm12, %v2559_v57, %v5105_v60  ;;  %v2461_v59 = vsel %vm2435_vm8, %v2428_v44, %v5075_v2  ;;  %v2478_v36 = vsel %vm2468_vm9, %v2445_v63, %v5109_v4 }
 0x31e   : > { %v5113_v55 = vpop.permute.xlu0 %5112  ;;  %v5120_v5 = vunpack.i.h.bf16 %v5118_v41  ;;  %v5119_v0 = vunpack.i.l.bf16 %v5118_v41  ;;  %v2494_v60 = vsel %vm2468_vm9, %v2461_v59, %v5110_v31  ;;  %v1679_v2 = vrot.slane %v9063_v58, 2  ;;  %v9064_v31 = vld [vmem:[#allocation99_spill] sm:$0xff] }
 0x31f   : > { %v5115_v51 = vunpack.i.h.bf16 %v5113_v55  ;;  %v5114_v27 = vunpack.i.l.bf16 %v5113_v55  ;;  %v1719_v4 = vrot.slane %v9064_v31, 2 }
 0x320   : > { %v2511_v41 = vsel %vm2501_vm10, %v2478_v36, %v5119_v0  ;;  %v2527_v29 = vsel %vm2501_vm10, %v2494_v60, %v5120_v5  ;;  %v4810_v36 = vunpack.i.h.bf16 %v9057_v16  ;;  %v4850_v60 = vunpack.i.h.bf16 %v9062_v9 }
 0x321   : > { %v7532_v30 = vpop.permute.xlu1 %5127  ;;  %v2609_v43 = vsel %vm2600_vm13, %v2576_v1, %v5114_v27  ;;  %v2625_v7 = vsel %vm2600_vm13, %v2592_v38, %v5115_v51 }
 0x322   : > { %v5123_v12 = vpop.permute.xlu0 %5122  ;;  %2820 = vmatmul.mubr.f32.gmra.mrb[16].mxu0 %v2609_v43  ;;  %2900 = vmatmul.mubr.f32.gmra.mrb[16].mxu1 %v2625_v7  ;;  %v5129_v46 = vunpack.i.l.bf16 %v7532_v30  ;;  %v2446_v43 = vsel %vm2435_vm8, %v2413_v26, %v4849_v19  ;;  %v4770_v19 = vunpack.i.h.bf16 %v9054_v25 }
 0x323   : > { %4497 = vmatprep.mubr.msk.f32.mxu0 %vm922_vm5, %v1675_v17  ;;  %4513 = vmatprep.mubr.msk.f32.mxu1 %vm922_vm5, %v1715_v42  ;;  %v5125_v13 = vunpack.i.h.bf16 %v5123_v12  ;;  %v5124_v45 = vunpack.i.l.bf16 %v5123_v12 }
 0x324   : > { %v2462_v7 = vsel %vm2435_vm8, %v2429_v53, %v5129_v46 }
 0x325   : > { %v5138_v54 = vpop.permute.xlu1 %5137  ;;  %v2544_v1 = vsel %vm2534_vm11, %v2511_v41, %v5124_v45  ;;  %v2560_v38 = vsel %vm2534_vm11, %v2527_v29, %v5125_v13 }
 0x326   : > { %v5133_v14 = vpop.permute.xlu0 %5132  ;;  %v5140_v55 = vunpack.i.h.bf16 %v5138_v54  ;;  %v5139_v51 = vunpack.i.l.bf16 %v5138_v54 }
 0x327   : > { %v5135_v20 = vunpack.i.h.bf16 %v5133_v14  ;;  %v5134_v34 = vunpack.i.l.bf16 %v5133_v14 }
 0x328   : > { %v2479_v39 = vsel %vm2468_vm9, %v2446_v43, %v5139_v51  ;;  %v2495_v62 = vsel %vm2468_vm9, %v2462_v7, %v5140_v55 }
 0x329   : > { %v5148_v18 = vpop.permute.xlu1 %5147  ;;  %v2577_v24 = vsel %vm2567_vm12, %v2544_v1, %v5134_v34  ;;  %v2593_v42 = vsel %vm2567_vm12, %v2560_v38, %v5135_v20  ;;  %v9065_v20 = vld [vmem:[#allocation140_spill] sm:$0xff] }
 0x32a   : > { %v5143_v27 = vpop.permute.xlu0 %5142  ;;  %v5150_v8 = vunpack.i.h.bf16 %v5148_v18  ;;  %v5149_v17 = vunpack.i.l.bf16 %v5148_v18  ;;  %v1720_v34 = vsel %vm1234_vm7, %v9065_v20, %v1719_v4  ;;  %v5130_v18 = vunpack.i.h.bf16 %v7532_v30  ;;  %v9071_v20 = vld [vmem:[#allocation40_spill] sm:$0xff] }
 0x32b   : > { %v5145_v61 = vunpack.i.h.bf16 %v5143_v27  ;;  %v5144_v57 = vunpack.i.l.bf16 %v5143_v27 }
 0x32c   : > { %v2512_v11 = vsel %vm2501_vm10, %v2479_v39, %v5149_v17  ;;  %v2528_v44 = vsel %vm2501_vm10, %v2495_v62, %v5150_v8 }
 0x32d   : > { %v5158_v49 = vpop.permute.xlu1 %5157  ;;  %v2610_v21 = vsel %vm2600_vm13, %v2577_v24, %v5144_v57  ;;  %v2626_v12 = vsel %vm2600_vm13, %v2593_v42, %v5145_v61  ;;  %v9067_v61 = vld [vmem:[#allocation60_spill] sm:$0xff] }
 0x32e   : > { %v5153_v52 = vpop.permute.xlu0 %5152  ;;  %2825 = vmatmul.mubr.f32.gmra.mrb[18].mxu0 %v2610_v21  ;;  %2905 = vmatmul.mubr.f32.gmra.mrb[18].mxu1 %v2626_v12  ;;  %v5160_v54 = vunpack.i.h.bf16 %v5158_v49  ;;  %v5159_v26 = vunpack.i.l.bf16 %v5158_v49  ;;  %v2430_v57 = vsel %vm922_vm5, %v9067_v61, %v4810_v36  ;;  %v9072_v36 = vld [vmem:[#allocation62_spill] sm:$0xff] }
 0x32f   : > { %v5155_v40 = vunpack.i.h.bf16 %v5153_v52  ;;  %v5154_v53 = vunpack.i.l.bf16 %v5153_v52  ;;  %4498 = vmatprep.mubr.msk.f32.mxu0 %vm922_vm5, %v8991_v33  ;;  %4514 = vmatprep.mubr.msk.f32.mxu1 %vm922_vm5, %v7086_v10  ;;  %v1680_v10 = vsel %vm1234_vm7, %v8996_v22, %v1679_v2  ;;  %v9066_v22 = vld [vmem:[#allocation38_spill] sm:$0xff]  ;;  %v2463_v1 = vsel %vm2435_vm8, %v2430_v57, %v5130_v18 }
 0x330   : > { %v2414_v16 = vsel %vm922_vm5, %v9066_v22, %v4770_v19 }
 0x331   : > { %v5168_v5 = vpop.permute.xlu1 %5167  ;;  %v2545_v0 = vsel %vm2534_vm11, %v2512_v11, %v5154_v53  ;;  %v2561_v14 = vsel %vm2534_vm11, %v2528_v44, %v5155_v40  ;;  %v2447_v30 = vsel %vm2435_vm8, %v2414_v16, %v4850_v60  ;;  %v9068_v53 = vld [vmem:[#allocation108_spill] sm:$0xff]  ;;  %v9069_v44 = vld [vmem:[#allocation138_spill] sm:$0xff] }
 0x332   : > { %v5170_v63 = vunpack.i.h.bf16 %v5168_v5  ;;  %v5169_v13 = vunpack.i.l.bf16 %v5168_v5  ;;  %v5163_v45 = vpop.permute.xlu0 %5162  ;;  %v2578_v59 = vsel %vm2567_vm12, %v2545_v0, %v5159_v26  ;;  %v2594_v33 = vsel %vm2567_vm12, %v2561_v14, %v5160_v54  ;;  %v9070_v14 = vld [vmem:[#allocation121_spill] sm:$0xff] }
 0x333   : > { %v5165_v29 = vunpack.i.h.bf16 %v5163_v45  ;;  %v5164_v55 = vunpack.i.l.bf16 %v5163_v45  ;;  %v4774_v11 = vunpack.i.l.bf16 %v9068_v53  ;;  %v4814_v5 = vunpack.i.l.bf16 %v9069_v44 }
 0x334   : > { %v2611_v46 = vsel %vm2600_vm13, %v2578_v59, %v5169_v13  ;;  %v2627_v25 = vsel %vm2600_vm13, %v2594_v33, %v5170_v63  ;;  %v4854_v19 = vunpack.i.l.bf16 %v9070_v14 }
 0x335   : > { %v5178_v41 = vpop.permute.xlu1 %5177  ;;  %2830 = vmatmul.mubr.f32.gmra.mrb[20].mxu0 %v2611_v46  ;;  %2910 = vmatmul.mubr.f32.gmra.mrb[20].mxu1 %v2627_v25  ;;  %v2496_v8 = vsel %vm2468_vm9, %v2463_v1, %v5165_v29  ;;  %v2480_v17 = vsel %vm2468_vm9, %v2447_v30, %v5164_v55  ;;  %v2431_v60 = vsel %vm922_vm5, %v9072_v36, %v4814_v5  ;;  %v9073_v30 = vld [vmem:[#allocation110_spill] sm:$0xff]  ;;  %v1726_v5 = vrot.slane %v9008_v32, 2 }
 0x336   : > { %v5173_v51 = vpop.permute.xlu0 %5172  ;;  %4499 = vmatprep.mubr.msk.f32.mxu0 %vm922_vm5, %v1680_v10  ;;  %4515 = vmatprep.mubr.msk.f32.mxu1 %vm922_vm5, %v1720_v34  ;;  %v5180_v24 = vunpack.i.h.bf16 %v5178_v41  ;;  %v5179_v42 = vunpack.i.l.bf16 %v5178_v41  ;;  %v2415_v34 = vsel %vm922_vm5, %v9071_v20, %v4774_v11  ;;  %v4779_v1 = vunpack.i.l.bf16 %v9073_v30 }
 0x337   : > { %v5175_v9 = vunpack.i.h.bf16 %v5173_v51  ;;  %v5174_v27 = vunpack.i.l.bf16 %v5173_v51  ;;  %v2448_v25 = vsel %vm2435_vm8, %v2415_v34, %v4854_v19  ;;  %v9077_v19 = vld [vmem:[#allocation65_spill] sm:$0xff] }
 0x339   : > { %v5188_v38 = vpop.permute.xlu1 %5187  ;;  %v2513_v7 = vsel %vm2501_vm10, %v2480_v17, %v5174_v27  ;;  %v2529_v49 = vsel %vm2501_vm10, %v2496_v8, %v5175_v9 }
 0x33a   : > { %v7600_v43 = vpop.permute.xlu0 %5182  ;;  %v5190_v21 = vunpack.i.h.bf16 %v5188_v38  ;;  %v5189_v12 = vunpack.i.l.bf16 %v5188_v38  ;;  %v2546_v2 = vsel %vm2534_vm11, %v2513_v7, %v5179_v42  ;;  %v2562_v31 = vsel %vm2534_vm11, %v2529_v49, %v5180_v24 }
 0x33b   : > { %v5184_v63 = vunpack.i.l.bf16 %v7600_v43  ;;  %v4775_v38 = vunpack.i.h.bf16 %v9068_v53 }
 0x33c   : > { %v2579_v4 = vsel %vm2567_vm12, %v2546_v2, %v5189_v12  ;;  %v2595_v54 = vsel %vm2567_vm12, %v2562_v31, %v5190_v21  ;;  %v4815_v2 = vunpack.i.h.bf16 %v9069_v44 }
 0x33d   : > { %v5198_v39 = vpop.permute.xlu1 %5197  ;;  %v2464_v18 = vsel %vm2435_vm8, %v2431_v60, %v5184_v63 }
 0x33e   : > { %v5200_v62 = vunpack.i.h.bf16 %v5198_v39  ;;  %v5199_v52 = vunpack.i.l.bf16 %v5198_v39  ;;  %v5193_v58 = vpop.permute.xlu0 %5192 }
 0x33f   : > { %v5195_v45 = vunpack.i.h.bf16 %v5193_v58  ;;  %v5194_v59 = vunpack.i.l.bf16 %v5193_v58 }
 0x340   : > { %v2612_v26 = vsel %vm2600_vm13, %v2579_v4, %v5199_v52  ;;  %v2628_v40 = vsel %vm2600_vm13, %v2595_v54, %v5200_v62  ;;  %v9074_v52 = vld [vmem:[#allocation137_spill] sm:$0xff]  ;;  %v9075_v4 = vld [vmem:[#allocation43_spill] sm:$0xff] }
 0x341   : > { %v5208_v0 = vpop.permute.xlu1 %5207  ;;  %2835 = vmatmul.mubr.f32.gmra.mrb[22].mxu0 %v2612_v26  ;;  %2915 = vmatmul.mubr.f32.gmra.mrb[22].mxu1 %v2628_v40  ;;  %v2481_v29 = vsel %vm2468_vm9, %v2448_v25, %v5194_v59  ;;  %v2497_v55 = vsel %vm2468_vm9, %v2464_v18, %v5195_v45  ;;  %v4819_v58 = vunpack.i.l.bf16 %v9074_v52  ;;  %v2417_v54 = vsel %vm922_vm5, %v9075_v4, %v4779_v1 }
 0x342   : > { %v5203_v13 = vpop.permute.xlu0 %5202  ;;  %4500 = vmatprep.mubr.msk.f32.mxu0 %vm922_vm5, %v6701_v3  ;;  %4516 = vmatprep.mubr.msk.f32.mxu1 %vm922_vm5, %v7281_v6  ;;  %v1684_v3 = vrot.slane %v9002_v50, 2  ;;  %v1724_v6 = vrot.slane %v9003_v37, 2  ;;  %v5210_v51 = vunpack.i.h.bf16 %v5208_v0  ;;  %v5209_v22 = vunpack.i.l.bf16 %v5208_v0 }
 0x343   : > { %v5205_v33 = vunpack.i.h.bf16 %v5203_v13  ;;  %v5204_v10 = vunpack.i.l.bf16 %v5203_v13  ;;  %v5185_v40 = vunpack.i.h.bf16 %v7600_v43  ;;  %v1727_v0 = vrot.slane %v9012_v56, 2 }
 0x344   : > { %v1685_v49 = vsel %vm1234_vm7, %v9016_v28, %v1684_v3  ;;  %v1725_v21 = vsel %vm1234_vm7, %v7263_v23, %v1724_v6  ;;  %v4855_v28 = vunpack.i.h.bf16 %v9070_v14  ;;  %v9076_v23 = vld [vmem:[#allocation41_spill] sm:$0xff]  ;;  %v2433_v63 = vsel %vm922_vm5, %v9077_v19, %v4819_v58  ;;  %v9078_v14 = vld [vmem:[#allocation63_spill] sm:$0xff] }
 0x345   : > { %v5218_v46 = vpop.permute.xlu1 %5217  ;;  %v2514_v16 = vsel %vm2501_vm10, %v2481_v29, %v5204_v10  ;;  %v2530_v9 = vsel %vm2501_vm10, %v2497_v55, %v5205_v33  ;;  %v2416_v26 = vsel %vm922_vm5, %v9076_v23, %v4775_v38  ;;  %v2432_v13 = vsel %vm922_vm5, %v9078_v14, %v4815_v2  ;;  %v9079_v10 = vld [vmem:[#allocation112_spill] sm:$0xff]  ;;  %v9081_v14 = vld [vmem:[#allocation130_spill] sm:$0xff] }
 0x346   : > { %v5213_v41 = vpop.permute.xlu0 %5212  ;;  %v2547_v17 = vsel %vm2534_vm11, %v2514_v16, %v5209_v22  ;;  %v2563_v24 = vsel %vm2534_vm11, %v2530_v9, %v5210_v51  ;;  %v5220_v53 = vunpack.i.h.bf16 %v5218_v46  ;;  %v5219_v11 = vunpack.i.l.bf16 %v5218_v46 }
 0x347   : > { %v5215_v27 = vunpack.i.h.bf16 %v5213_v41  ;;  %v5214_v61 = vunpack.i.l.bf16 %v5213_v41  ;;  %v4859_v20 = vunpack.i.l.bf16 %v9079_v10  ;;  %v2449_v43 = vsel %vm2435_vm8, %v2416_v26, %v4855_v28  ;;  %v9080_v28 = vld [vmem:[#allocation133_spill] sm:$0xff] }
 0x348   : > { %v2465_v60 = vsel %vm2435_vm8, %v2432_v13, %v5185_v40  ;;  %v2482_v25 = vsel %vm2468_vm9, %v2449_v43, %v5219_v11  ;;  %v1728_v6 = vsel %vm1234_vm7, %v1726_v5, %v1727_v0  ;;  %v1729_v58 = vrot.slane %v9017_v35, 2 }
 0x349   : > { %v5228_v57 = vpop.permute.xlu1 %5227  ;;  %v2580_v42 = vsel %vm2567_vm12, %v2547_v17, %v5214_v61  ;;  %v2596_v7 = vsel %vm2567_vm12, %v2563_v24, %v5215_v27  ;;  %v2498_v18 = vsel %vm2468_vm9, %v2465_v60, %v5220_v53  ;;  %v4780_v40 = vunpack.i.h.bf16 %v9073_v30  ;;  %v9083_v60 = vld [vmem:[#allocation66_spill] sm:$0xff] }
 0x34a   : > { %v5223_v50 = vpop.permute.xlu0 %5222  ;;  %v5230_v45 = vunpack.i.h.bf16 %v5228_v57  ;;  %v5229_v59 = vunpack.i.l.bf16 %v5228_v57  ;;  %v4820_v53 = vunpack.i.h.bf16 %v9074_v52  ;;  %v1730_v52 = vsel %vm1234_vm7, %v1727_v0, %v1729_v58 }
 0x34b   : > { %v5225_v8 = vunpack.i.h.bf16 %v5223_v50  ;;  %v5224_v37 = vunpack.i.l.bf16 %v5223_v50 }
 0x34c   : > { %v2515_v29 = vsel %vm2501_vm10, %v2482_v25, %v5229_v59  ;;  %v2531_v55 = vsel %vm2501_vm10, %v2498_v18, %v5230_v45 }
 0x34d   : > { %v7640_v12 = vpop.permute.xlu1 %5237  ;;  %v2613_v39 = vsel %vm2600_vm13, %v2580_v42, %v5224_v37  ;;  %v2629_v62 = vsel %vm2600_vm13, %v2596_v7, %v5225_v8  ;;  %v2450_v37 = vsel %vm2435_vm8, %v2417_v54, %v4859_v20 }
 0x34e   : > { %v5233_v31 = vpop.permute.xlu0 %5232  ;;  %2840 = vmatmul.mubr.f32.gmra.mrb[24].mxu0 %v2613_v39  ;;  %2920 = vmatmul.mubr.f32.gmra.mrb[24].mxu1 %v2629_v62  ;;  %v5239_v41 = vunpack.i.l.bf16 %v7640_v12  ;;  %v1689_v62 = vrot.slane %v9015_v15, 2  ;;  %v5240_v45 = vunpack.i.h.bf16 %v7640_v12 }
 0x34f   : > { %4501 = vmatprep.mubr.msk.f32.mxu0 %vm922_vm5, %v1685_v49  ;;  %4517 = vmatprep.mubr.msk.f32.mxu1 %vm922_vm5, %v1725_v21  ;;  %v5235_v34 = vunpack.i.h.bf16 %v5233_v31  ;;  %v5234_v36 = vunpack.i.l.bf16 %v5233_v31 }
 0x350   : > { %v2466_v17 = vsel %vm2435_vm8, %v2433_v63, %v5239_v41  ;;  %v1690_v13 = vsel %vm1234_vm7, %v9081_v14, %v1689_v62  ;;  %v2943_v14 = vld [vmem:[%s5608_s9 + $0x18] sm:$0xff] }
 0x351   : > { %v5248_v44 = vpop.permute.xlu1 %5247  ;;  %v2548_v61 = vsel %vm2534_vm11, %v2515_v29, %v5234_v36  ;;  %v2564_v57 = vsel %vm2534_vm11, %v2531_v55, %v5235_v34  ;;  %v9082_v36 = vld [vmem:[#allocation44_spill] sm:$0xff] }
 0x352   : > { %v5243_v33 = vpop.permute.xlu0 %5242  ;;  %v5250_v51 = vunpack.i.h.bf16 %v5248_v44  ;;  %v5249_v22 = vunpack.i.l.bf16 %v5248_v44  ;;  %v4860_v44 = vunpack.i.h.bf16 %v9079_v10  ;;  %v2418_v12 = vsel %vm922_vm5, %v9082_v36, %v4780_v40 }
 0x353   : > { %v5245_v32 = vunpack.i.h.bf16 %v5243_v33  ;;  %v5244_v46 = vunpack.i.l.bf16 %v5243_v33 }
 0x354   : > { %v2483_v49 = vsel %vm2468_vm9, %v2450_v37, %v5249_v22  ;;  %v2499_v21 = vsel %vm2468_vm9, %v2466_v17, %v5250_v51  ;;  %v2451_v56 = vsel %vm2435_vm8, %v2418_v12, %v4860_v44 }
 0x355   : > { %v5258_v3 = vpop.permute.xlu1 %5257  ;;  %v2581_v50 = vsel %vm2567_vm12, %v2548_v61, %v5244_v46  ;;  %v2597_v8 = vsel %vm2567_vm12, %v2564_v57, %v5245_v32  ;;  %v2434_v32 = vsel %vm922_vm5, %v9083_v60, %v4820_v53  ;;  %v2942_v53 = vld [vmem:[%s5608_s9 + $0x10] sm:$0xff] }
 0x356   : > { %v5253_v16 = vpop.permute.xlu0 %5252  ;;  %v5260_v1 = vunpack.i.h.bf16 %v5258_v3  ;;  %v5259_v38 = vunpack.i.l.bf16 %v5258_v3  ;;  %v2467_v0 = vsel %vm2435_vm8, %v2434_v32, %v5240_v45 }
 0x357   : > { %v5255_v9 = vunpack.i.h.bf16 %v5253_v16  ;;  %v5254_v27 = vunpack.i.l.bf16 %v5253_v16 }
 0x358   : > { %v2516_v23 = vsel %vm2501_vm10, %v2483_v49, %v5259_v38  ;;  %v2532_v26 = vsel %vm2501_vm10, %v2499_v21, %v5260_v1 }
 0x359   : > { %v5268_v24 = vpop.permute.xlu1 %5267  ;;  %v2614_v42 = vsel %vm2600_vm13, %v2581_v50, %v5254_v27  ;;  %v2630_v7 = vsel %vm2600_vm13, %v2597_v8, %v5255_v9 }
 0x35a   : > { %v5263_v39 = vpop.permute.xlu0 %5262  ;;  %2845 = vmatmul.mubr.f32.gmra.mrb[26].mxu0 %v2614_v42  ;;  %2925 = vmatmul.mubr.f32.gmra.mrb[26].mxu1 %v2630_v7  ;;  %v5270_v2 = vunpack.i.h.bf16 %v5268_v24  ;;  %v5269_v31 = vunpack.i.l.bf16 %v5268_v24  ;;  %v2940_v24 = vld [vmem:[%s5608_s9] sm:$0xff] }
 0x35b   : > { %v5265_v4 = vunpack.i.h.bf16 %v5263_v39  ;;  %v5264_v54 = vunpack.i.l.bf16 %v5263_v39  ;;  %4502 = vmatprep.mubr.msk.f32.mxu0 %vm922_vm5, %v9080_v28  ;;  %4518 = vmatprep.mubr.msk.f32.mxu1 %vm922_vm5, %v1728_v6  ;;  %v2956_v42 = vld [vmem:[%s5608_s9 + $0x80] sm:$0xff] }
 0x35d   : > { %v5278_v15 = vpop.permute.xlu1 %5277  ;;  %v2549_v35 = vsel %vm2534_vm11, %v2516_v23, %v5264_v54  ;;  %v2565_v11 = vsel %vm2534_vm11, %v2532_v26, %v5265_v4 }
 0x35e   : > { %v5280_v5 = vunpack.i.h.bf16 %v5278_v15  ;;  %v5279_v19 = vunpack.i.l.bf16 %v5278_v15  ;;  %v5273_v63 = vpop.permute.xlu0 %5272  ;;  %v2582_v59 = vsel %vm2567_vm12, %v2549_v35, %v5269_v31  ;;  %v2598_v30 = vsel %vm2567_vm12, %v2565_v11, %v5270_v2  ;;  %v2941_v2 = vld [vmem:[%s5608_s9 + $0x8] sm:$0xff]  ;;  %v2958_v15 = vld [vmem:[%s5608_s9 + $0x90] sm:$0xff] }
 0x35f   : > { %v5275_v33 = vunpack.i.h.bf16 %v5273_v63  ;;  %v5274_v20 = vunpack.i.l.bf16 %v5273_v63  ;;  %v2957_v31 = vld [vmem:[%s5608_s9 + $0x88] sm:$0xff] }
 0x360   : > { %v2615_v10 = vsel %vm2600_vm13, %v2582_v59, %v5279_v19  ;;  %v2631_v43 = vsel %vm2600_vm13, %v2598_v30, %v5280_v5 }
 0x361   : > { %2850 = vmatmul.mubr.f32.gmra.mrb[28].mxu0 %v2615_v10  ;;  %2930 = vmatmul.mubr.f32.gmra.mrb[28].mxu1 %v2631_v43  ;;  %v5288_v34 = vpop.permute.xlu1 %5287  ;;  %v2500_v41 = vsel %vm2468_vm9, %v2467_v0, %v5275_v33  ;;  %v2484_v3 = vsel %vm2468_vm9, %v2451_v56, %v5274_v20  ;;  %v2944_v10 = vld [vmem:[%s5608_s9 + $0x20] sm:$0xff]  ;;  %v2945_v56 = vld [vmem:[%s5608_s9 + $0x28] sm:$0xff] }
 0x362   : > { %v5283_v46 = vpop.permute.xlu0 %5282  ;;  %4503 = vmatprep.mubr.msk.f32.mxu0 %vm922_vm5, %v1690_v13  ;;  %4519 = vmatprep.mubr.msk.f32.mxu1 %vm922_vm5, %v1730_v52  ;;  %v5290_v6 = vunpack.i.h.bf16 %v5288_v34  ;;  %v5289_v29 = vunpack.i.l.bf16 %v5288_v34  ;;  %v2959_v13 = vld [vmem:[%s5608_s9 + $0x98] sm:$0xff]  ;;  %v2960_v43 = vld [vmem:[%s5608_s9 + $0xa0] sm:$0xff]  ;;  %v2961_v0 = vld [vmem:[%s5608_s9 + $0xa8] sm:$0xff] }
 0x363   : > { %v5285_v25 = vunpack.i.h.bf16 %v5283_v46  ;;  %v5284_v18 = vunpack.i.l.bf16 %v5283_v46 }
 0x365   : > { %v2517_v55 = vsel %vm2501_vm10, %v2484_v3, %v5284_v18  ;;  %v2533_v51 = vsel %vm2501_vm10, %v2500_v41, %v5285_v25  ;;  %v5298_v22 = vpop.permute.xlu1 %5297 }
 0x366   : > { %v5293_v16 = vpop.permute.xlu0 %5292  ;;  %v5300_v9 = vunpack.i.h.bf16 %v5298_v22  ;;  %v5299_v27 = vunpack.i.l.bf16 %v5298_v22  ;;  %v2550_v1 = vsel %vm2534_vm11, %v2517_v55, %v5289_v29  ;;  %v2566_v38 = vsel %vm2534_vm11, %v2533_v51, %v5290_v6  ;;  %v2946_v55 = vld [vmem:[%s5608_s9 + $0x30] sm:$0xff] }
 0x367   : > { %v5295_v61 = vunpack.i.h.bf16 %v5293_v16  ;;  %v5294_v57 = vunpack.i.l.bf16 %v5293_v16  ;;  %v2962_v51 = vld [vmem:[%s5608_s9 + $0xb0] sm:$0xff] }
 0x369   : > { %v2583_v50 = vsel %vm2567_vm12, %v2550_v1, %v5294_v57  ;;  %v2599_v8 = vsel %vm2567_vm12, %v2566_v38, %v5295_v61  ;;  %v2947_v1 = vld [vmem:[%s5608_s9 + $0x38] sm:$0xff] }
 0x36a   : > { %v2616_v37 = vsel %vm2600_vm13, %v2583_v50, %v5299_v27  ;;  %v2632_v17 = vsel %vm2600_vm13, %v2599_v8, %v5300_v9  ;;  %v2963_v38 = vld [vmem:[%s5608_s9 + $0xb8] sm:$0xff] }
 0x36b   : > { %2855 = vmatmul.mubr.f32.gmra.mrb[30].mxu0 %v2616_v37  ;;  %2935 = vmatmul.mubr.f32.gmra.mrb[30].mxu1 %v2632_v17 }
 0x3a0   : > { %v2781_v7 = vpop.f32.mrb[0].mxu0  ;;  %v2861_v49 = vpop.f32.mrb[0].mxu1 }
 0x3a1   : > { %v2972_v21 = vadd.f32 %v2940_v24, %v2781_v7  ;;  %v2988_v39 = vadd.f32 %v2956_v42, %v2861_v49  ;;  %v2783_v62 = vpop.f32.mrb[1].mxu0  ;;  %v2863_v58 = vpop.f32.mrb[1].mxu1  ;;  %v2948_v7 = vld [vmem:[%s5608_s9 + $0x40] sm:$0xff] }
 0x3a2   : > { %v2964_v49 = vld [vmem:[%s5608_s9 + $0xc0] sm:$0xff] }
 0x3a3   : > { %3004 = vst.msk [vmem:[%s5608_s9] sm:$0xff] %vm922_vm5, %v2972_v21  ;;  %3020 = vst.msk [vmem:[%s5608_s9 + $0x80] sm:$0xff] %vm922_vm5, %v2988_v39 }
 0x3ad   : > { %v2786_v4 = vpop.f32.mrb[2].mxu0  ;;  %v2866_v54 = vpop.f32.mrb[2].mxu1 }
 0x3ae   : > { %v2973_v28 = vadd.f32 %v2941_v2, %v2786_v4  ;;  %v2989_v23 = vadd.f32 %v2957_v31, %v2866_v54  ;;  %v2788_v26 = vpop.f32.mrb[3].mxu0  ;;  %v2868_v40 = vpop.f32.mrb[3].mxu1  ;;  %v2949_v4 = vld [vmem:[%s5608_s9 + $0x48] sm:$0xff] }
 0x3af   : > { %v2965_v54 = vld [vmem:[%s5608_s9 + $0xc8] sm:$0xff] }
 0x3b0   : > { %3005 = vst.msk [vmem:[%s5608_s9 + $0x8] sm:$0xff] %vm922_vm5, %v2973_v28  ;;  %3021 = vst.msk [vmem:[%s5608_s9 + $0x88] sm:$0xff] %vm922_vm5, %v2989_v23 }
 0x3b4   : > { %v2791_v35 = vpop.f32.mrb[4].mxu0  ;;  %v2871_v11 = vpop.f32.mrb[4].mxu1 }
 0x3b5   : > { %v2974_v44 = vadd.f32 %v2942_v53, %v2791_v35  ;;  %v2990_v5 = vadd.f32 %v2958_v15, %v2871_v11  ;;  %v2793_v19 = vpop.f32.mrb[5].mxu0  ;;  %v2873_v63 = vpop.f32.mrb[5].mxu1  ;;  %v2950_v35 = vld [vmem:[%s5608_s9 + $0x50] sm:$0xff] }
 0x3b6   : > { %v2966_v11 = vld [vmem:[%s5608_s9 + $0xd0] sm:$0xff] }
 0x3b7   : > { %3006 = vst.msk [vmem:[%s5608_s9 + $0x10] sm:$0xff] %vm922_vm5, %v2974_v44  ;;  %3022 = vst.msk [vmem:[%s5608_s9 + $0x90] sm:$0xff] %vm922_vm5, %v2990_v5 }
 0x3c1   : > { %v2796_v45 = vpop.f32.mrb[6].mxu0  ;;  %v2876_v59 = vpop.f32.mrb[6].mxu1 }
 0x3c2   : > { %v2975_v30 = vadd.f32 %v2943_v14, %v2796_v45  ;;  %v2991_v52 = vadd.f32 %v2959_v13, %v2876_v59  ;;  %v2798_v33 = vpop.f32.mrb[7].mxu0  ;;  %v2878_v20 = vpop.f32.mrb[7].mxu1  ;;  %v2951_v45 = vld [vmem:[%s5608_s9 + $0x58] sm:$0xff] }
 0x3c3   : > { %v2967_v59 = vld [vmem:[%s5608_s9 + $0xd8] sm:$0xff] }
 0x3c4   : > { %3007 = vst.msk [vmem:[%s5608_s9 + $0x18] sm:$0xff] %vm922_vm5, %v2975_v30  ;;  %3023 = vst.msk [vmem:[%s5608_s9 + $0x98] sm:$0xff] %vm922_vm5, %v2991_v52 }
 0x3c8   : > { %v2801_v34 = vpop.f32.mrb[8].mxu0  ;;  %v2881_v36 = vpop.f32.mrb[8].mxu1 }
 0x3c9   : > { %v2976_v12 = vadd.f32 %v2944_v10, %v2801_v34  ;;  %v2992_v60 = vadd.f32 %v2960_v43, %v2881_v36  ;;  %v2803_v32 = vpop.f32.mrb[9].mxu0  ;;  %v2883_v46 = vpop.f32.mrb[9].mxu1  ;;  %v2952_v34 = vld [vmem:[%s5608_s9 + $0x60] sm:$0xff] }
 0x3ca   : > { %v2968_v36 = vld [vmem:[%s5608_s9 + $0xe0] sm:$0xff] }
 0x3cb   : > { %3008 = vst.msk [vmem:[%s5608_s9 + $0x20] sm:$0xff] %vm922_vm5, %v2976_v12  ;;  %3024 = vst.msk [vmem:[%s5608_s9 + $0xa0] sm:$0xff] %vm922_vm5, %v2992_v60 }
 0x3d5   : > { %v2806_v25 = vpop.f32.mrb[10].mxu0  ;;  %v2886_v18 = vpop.f32.mrb[10].mxu1 }
 0x3d6   : > { %v2977_v41 = vadd.f32 %v2945_v56, %v2806_v25  ;;  %v2993_v3 = vadd.f32 %v2961_v0, %v2886_v18  ;;  %v2808_v6 = vpop.f32.mrb[11].mxu0  ;;  %v2888_v29 = vpop.f32.mrb[11].mxu1  ;;  %v2953_v25 = vld [vmem:[%s5608_s9 + $0x68] sm:$0xff] }
 0x3d7   : > { %v2969_v18 = vld [vmem:[%s5608_s9 + $0xe8] sm:$0xff] }
 0x3d8   : > { %3009 = vst.msk [vmem:[%s5608_s9 + $0x28] sm:$0xff] %vm922_vm5, %v2977_v41  ;;  %3025 = vst.msk [vmem:[%s5608_s9 + $0xa8] sm:$0xff] %vm922_vm5, %v2993_v3 }
 0x3dc   : > { %v2811_v22 = vpop.f32.mrb[12].mxu0  ;;  %v2891_v16 = vpop.f32.mrb[12].mxu1 }
 0x3dd   : > { %v2978_v9 = vadd.f32 %v2946_v55, %v2811_v22  ;;  %v2994_v27 = vadd.f32 %v2962_v51, %v2891_v16  ;;  %v2813_v61 = vpop.f32.mrb[13].mxu0  ;;  %v2893_v57 = vpop.f32.mrb[13].mxu1  ;;  %v2954_v22 = vld [vmem:[%s5608_s9 + $0x70] sm:$0xff] }
 0x3de   : > { %v2970_v16 = vld [vmem:[%s5608_s9 + $0xf0] sm:$0xff] }
 0x3df   : > { %3010 = vst.msk [vmem:[%s5608_s9 + $0x30] sm:$0xff] %vm922_vm5, %v2978_v9  ;;  %3026 = vst.msk [vmem:[%s5608_s9 + $0xb0] sm:$0xff] %vm922_vm5, %v2994_v27 }
 0x3e8   : > { %v2816_v50 = vpop.f32.mrb[14].mxu0  ;;  %v2896_v8 = vpop.f32.mrb[14].mxu1 }
 0x3e9   : > { %v2979_v37 = vadd.f32 %v2947_v1, %v2816_v50  ;;  %v2995_v17 = vadd.f32 %v2963_v38, %v2896_v8  ;;  %v2818_v24 = vpop.f32.mrb[15].mxu0  ;;  %v2898_v42 = vpop.f32.mrb[15].mxu1  ;;  %v2955_v50 = vld [vmem:[%s5608_s9 + $0x78] sm:$0xff] }
 0x3ea   : > { %v2971_v8 = vld [vmem:[%s5608_s9 + $0xf8] sm:$0xff] }
 0x3eb   : > { %3011 = vst.msk [vmem:[%s5608_s9 + $0x38] sm:$0xff] %vm922_vm5, %v2979_v37  ;;  %3027 = vst.msk [vmem:[%s5608_s9 + $0xb8] sm:$0xff] %vm922_vm5, %v2995_v17 }
 0x3f5   : > { %v2821_v21 = vpop.f32.mrb[16].mxu0  ;;  %v2901_v39 = vpop.f32.mrb[16].mxu1 }
 0x3f6   : > { %v2980_v62 = vadd.f32 %v2948_v7, %v2821_v21  ;;  %v2996_v58 = vadd.f32 %v2964_v49, %v2901_v39  ;;  %v2823_v2 = vpop.f32.mrb[17].mxu0  ;;  %v2903_v31 = vpop.f32.mrb[17].mxu1 }
 0x3f8   : > { %3012 = vst.msk [vmem:[%s5608_s9 + $0x40] sm:$0xff] %vm922_vm5, %v2980_v62  ;;  %3028 = vst.msk [vmem:[%s5608_s9 + $0xc0] sm:$0xff] %vm922_vm5, %v2996_v58 }
 0x401   : > { %v2826_v28 = vpop.f32.mrb[18].mxu0  ;;  %v2906_v23 = vpop.f32.mrb[18].mxu1 }
 0x402   : > { %v2981_v26 = vadd.f32 %v2949_v4, %v2826_v28  ;;  %v2997_v40 = vadd.f32 %v2965_v54, %v2906_v23  ;;  %v2828_v53 = vpop.f32.mrb[19].mxu0  ;;  %v2908_v15 = vpop.f32.mrb[19].mxu1 }
 0x404   : > { %3013 = vst.msk [vmem:[%s5608_s9 + $0x48] sm:$0xff] %vm922_vm5, %v2981_v26  ;;  %3029 = vst.msk [vmem:[%s5608_s9 + $0xc8] sm:$0xff] %vm922_vm5, %v2997_v40 }
 0x408   : > { %v2831_v44 = vpop.f32.mrb[20].mxu0  ;;  %v2911_v5 = vpop.f32.mrb[20].mxu1 }
 0x409   : > { %v2982_v19 = vadd.f32 %v2950_v35, %v2831_v44  ;;  %v2998_v63 = vadd.f32 %v2966_v11, %v2911_v5  ;;  %v2833_v14 = vpop.f32.mrb[21].mxu0  ;;  %v2913_v13 = vpop.f32.mrb[21].mxu1 }
 0x40b   : > { %3014 = vst.msk [vmem:[%s5608_s9 + $0x50] sm:$0xff] %vm922_vm5, %v2982_v19  ;;  %3030 = vst.msk [vmem:[%s5608_s9 + $0xd0] sm:$0xff] %vm922_vm5, %v2998_v63 }
 0x414   : > { %v2836_v30 = vpop.f32.mrb[22].mxu0  ;;  %v2916_v52 = vpop.f32.mrb[22].mxu1 }
 0x415   : > { %v2983_v33 = vadd.f32 %v2951_v45, %v2836_v30  ;;  %v2999_v20 = vadd.f32 %v2967_v59, %v2916_v52  ;;  %v2838_v10 = vpop.f32.mrb[23].mxu0  ;;  %v2918_v43 = vpop.f32.mrb[23].mxu1 }
 0x417   : > { %3015 = vst.msk [vmem:[%s5608_s9 + $0x58] sm:$0xff] %vm922_vm5, %v2983_v33  ;;  %3031 = vst.msk [vmem:[%s5608_s9 + $0xd8] sm:$0xff] %vm922_vm5, %v2999_v20 }
 0x421   : > { %v2841_v12 = vpop.f32.mrb[24].mxu0  ;;  %v2921_v60 = vpop.f32.mrb[24].mxu1 }
 0x422   : > { %v2984_v32 = vadd.f32 %v2952_v34, %v2841_v12  ;;  %v3000_v46 = vadd.f32 %v2968_v36, %v2921_v60  ;;  %v2843_v56 = vpop.f32.mrb[25].mxu0  ;;  %v2923_v0 = vpop.f32.mrb[25].mxu1 }
 0x424   : > { %3016 = vst.msk [vmem:[%s5608_s9 + $0x60] sm:$0xff] %vm922_vm5, %v2984_v32  ;;  %3032 = vst.msk [vmem:[%s5608_s9 + $0xe0] sm:$0xff] %vm922_vm5, %v3000_v46 }
 0x42d   : > { %v2846_v41 = vpop.f32.mrb[26].mxu0  ;;  %v2926_v3 = vpop.f32.mrb[26].mxu1 }
 0x42e   : > { %v2985_v6 = vadd.f32 %v2953_v25, %v2846_v41  ;;  %v3001_v29 = vadd.f32 %v2969_v18, %v2926_v3  ;;  %v2848_v55 = vpop.f32.mrb[27].mxu0  ;;  %v2928_v51 = vpop.f32.mrb[27].mxu1 }
 0x430   : > { %3017 = vst.msk [vmem:[%s5608_s9 + $0x68] sm:$0xff] %vm922_vm5, %v2985_v6  ;;  %3033 = vst.msk [vmem:[%s5608_s9 + $0xe8] sm:$0xff] %vm922_vm5, %v3001_v29 }
 0x434   : > { %v2851_v9 = vpop.f32.mrb[28].mxu0  ;;  %v2931_v27 = vpop.f32.mrb[28].mxu1 }
 0x435   : > { %v2986_v61 = vadd.f32 %v2954_v22, %v2851_v9  ;;  %v3002_v57 = vadd.f32 %v2970_v16, %v2931_v27  ;;  %v2853_v1 = vpop.f32.mrb[29].mxu0  ;;  %v2933_v38 = vpop.f32.mrb[29].mxu1 }
 0x437   : > { %3018 = vst.msk [vmem:[%s5608_s9 + $0x70] sm:$0xff] %vm922_vm5, %v2986_v61  ;;  %3034 = vst.msk [vmem:[%s5608_s9 + $0xf0] sm:$0xff] %vm922_vm5, %v3002_v57 }
 0x43e   : > { %v2856_v37 = vpop.f32.mrb[30].mxu0  ;;  %v2936_v17 = vpop.f32.mrb[30].mxu1 }
 0x43f   : > { %v2987_v24 = vadd.f32 %v2955_v50, %v2856_v37  ;;  %v3003_v42 = vadd.f32 %v2971_v8, %v2936_v17  ;;  %v2858_v7 = vpop.f32.mrb[31].mxu0  ;;  %v2938_v49 = vpop.f32.mrb[31].mxu1 }
 0x441   : > { %3019 = vst.msk [vmem:[%s5608_s9 + $0x78] sm:$0xff] %vm922_vm5, %v2987_v24  ;;  %3035 = vst.msk [vmem:[%s5608_s9 + $0xf8] sm:$0xff] %vm922_vm5, %v3003_v42 }
 0x442 PF: > { %s4520_s10 = sld [smem:[#allocation6 + $0x3]] }
 0x448   : > { %p4521_p3 = scmp.eq.s32.totalorder %s4520_s10, 0 }
 0x449   : > { %v9084_v21 = vld [vmem:[#allocation19_spill] sm:$0xff] (!%p4521_p3)  ;;  %v9085_v39 = vld [vmem:[#allocation25_spill] sm:$0xff] (!%p4521_p3)  ;;  %v9086_v58 = vld [vmem:[#allocation20_spill] sm:$0xff] (!%p4521_p3)  ;;  %vm3185_vm14 = vcmask (!%p4521_p3), 1046528   ;;  %vm3330_vm15 = vcmask (!%p4521_p3), 1045504  }
 0x44a   : > { %3040 = sbr.rel (%p4521_p3) target bundleno = 1204 (0x4b4), region = 140  ;;  %v3041_v62 = vadd.f32 (!%p4521_p3), %v9085_v39, %v9084_v21  ;;  %v9087_v2 = vld [vmem:[#allocation26_spill] sm:$0xff] (!%p4521_p3)  ;;  %v9088_v4 = vld [vmem:[#allocation21_spill] sm:$0xff] (!%p4521_p3)  ;;  %v9089_v54 = vld [vmem:[#allocation68_spill] sm:$0xff] (!%p4521_p3) }
 0x44b   : > { %v3042_v31 = vadd.f32 (!%p4521_p3), %v9087_v2, %v9086_v58  ;;  %v3043_v28 = vadd.f32 (!%p4521_p3), %v9089_v54, %v9088_v4  ;;  %v9090_v23 = vld [vmem:[#allocation28_spill] sm:$0xff] (!%p4521_p3)  ;;  %v9091_v40 = vld [vmem:[#allocation29_spill] sm:$0xff] (!%p4521_p3)  ;;  %v9092_v15 = vld [vmem:[#allocation27_spill] sm:$0xff] (!%p4521_p3) }
 0x44c   : > { %v3044_v26 = vadd.f32 (!%p4521_p3), %v9090_v23, %v9085_v39  ;;  %v3045_v53 = vadd.f32 (!%p4521_p3), %v9091_v40, %v9087_v2  ;;  %v9093_v35 = vld [vmem:[#allocation69_spill] sm:$0xff] (!%p4521_p3)  ;;  %v3089_v44 = vadd.f32 (!%p4521_p3), %v3041_v62, %v9090_v23  ;;  %v9094_v19 = vld [vmem:[#allocation31_spill] sm:$0xff] (!%p4521_p3)  ;;  %v9095_v14 = vld [vmem:[#allocation32_spill] sm:$0xff] (!%p4521_p3) }
 0x44d   : > { %v3046_v11 = vadd.f32 (!%p4521_p3), %v9093_v35, %v9092_v15  ;;  %v3090_v5 = vadd.f32 (!%p4521_p3), %v3042_v31, %v9091_v40  ;;  %v3047_v63 = vadd.f32 (!%p4521_p3), %v9094_v19, %v9090_v23  ;;  %v3048_v13 = vadd.f32 (!%p4521_p3), %v9095_v14, %v9091_v40  ;;  %v9096_v45 = vld [vmem:[#allocation86_spill] sm:$0xff] (!%p4521_p3)  ;;  %v9097_v33 = vld [vmem:[#allocation87_spill] sm:$0xff] (!%p4521_p3)  ;;  %v3476_v21 = vld [vmem:[%s5608_s9 + $0x8] sm:$0xff] (!%p4521_p3) }
 0x44e   : > { %v3091_v59 = vadd.f32 (!%p4521_p3), %v3043_v28, %v9096_v45  ;;  %v3092_v30 = vadd.f32 (!%p4521_p3), %v3044_v26, %v9094_v19  ;;  %v3093_v52 = vadd.f32 (!%p4521_p3), %v3045_v53, %v9095_v14  ;;  %v3186_v10 = vrot.slane (!%p4521_p3), %v3089_v44, 1  ;;  %v9098_v61 = vld [vmem:[#allocation34_spill] sm:$0xff] (!%p4521_p3)  ;;  %v9099_v1 = vld [vmem:[#allocation35_spill] sm:$0xff] (!%p4521_p3)  ;;  %v3477_v39 = vld [vmem:[%s5608_s9 + $0x10] sm:$0xff] (!%p4521_p3) }
 0x44f   : > { %v3094_v20 = vadd.f32 (!%p4521_p3), %v3046_v11, %v9097_v33  ;;  %v3187_v43 = vrot.slane (!%p4521_p3), %v3090_v5, 1  ;;  %v3331_v34 = vrot.slane (!%p4521_p3), %v3089_v44, 2  ;;  %v3332_v36 = vrot.slane (!%p4521_p3), %v3090_v5, 2  ;;  %v3475_v50 = vld [vmem:[%s5608_s9] sm:$0xff] (!%p4521_p3)  ;;  %v9100_v24 = vld [vmem:[#allocation30_spill] sm:$0xff] (!%p4521_p3)  ;;  %v9102_v53 = vld [vmem:[#allocation88_spill] sm:$0xff] (!%p4521_p3) }
 0x450   : > { %v3189_v12 = vrot.slane (!%p4521_p3), %v3091_v59, 1  ;;  %v3334_v60 = vrot.slane (!%p4521_p3), %v3091_v59, 2  ;;  %v3191_v32 = vrot.slane (!%p4521_p3), %v3092_v30, 1  ;;  %v3192_v46 = vrot.slane (!%p4521_p3), %v3093_v52, 1  ;;  %v9101_v42 = vld [vmem:[#allocation70_spill] sm:$0xff] (!%p4521_p3) }
 0x451   : > { %v3188_v56 = vsel %vm3185_vm14, %v3186_v10, %v3187_v43  ;;  %v3333_v0 = vsel %vm3330_vm15, %v3331_v34, %v3332_v36  ;;  %v3336_v25 = vrot.slane %v3092_v30, 2  ;;  %v3337_v18 = vrot.slane %v3093_v52, 2 }
 0x452   : > { %v3298_v41 = vadd.f32 %v3188_v56, %v3089_v44  ;;  %v3190_v3 = vsel %vm3185_vm14, %v3187_v43, %v3189_v12  ;;  %v3335_v6 = vsel %vm3330_vm15, %v3332_v36, %v3334_v60  ;;  %v3193_v29 = vsel %vm3185_vm14, %v3191_v32, %v3192_v46  ;;  %v3478_v44 = vld [vmem:[%s5608_s9 + $0x18] sm:$0xff]  ;;  %v9105_v43 = vld [vmem:[#allocation71_spill] sm:$0xff] }
 0x453   : > { %v3299_v55 = vadd.f32 %v3190_v3, %v3090_v5  ;;  %v3300_v51 = vadd.f32 %v3193_v29, %v3092_v30  ;;  %v3338_v22 = vsel %vm3330_vm15, %v3336_v25, %v3337_v18  ;;  %v3194_v16 = vrot.slane %v3094_v20, 1  ;;  %v9106_v25 = vld [vmem:[#allocation38_spill] sm:$0xff] }
 0x454   : > { %v3443_v9 = vadd.f32 %v3333_v0, %v3298_v41  ;;  %v3339_v27 = vrot.slane %v3094_v20, 2  ;;  %v3095_v57 = vadd.f32 %v3047_v63, %v9098_v61  ;;  %v3096_v38 = vadd.f32 %v3048_v13, %v9099_v1  ;;  %v9103_v20 = vld [vmem:[#allocation37_spill] sm:$0xff] }
 0x455   : > { %v3444_v8 = vadd.f32 %v3335_v6, %v3299_v55  ;;  %v3445_v37 = vadd.f32 %v3338_v22, %v3300_v51  ;;  %v3195_v17 = vsel %vm3185_vm14, %v3192_v46, %v3194_v16  ;;  %v3049_v7 = vadd.f32 %v9101_v42, %v9100_v24  ;;  %v3479_v46 = vld [vmem:[%s5608_s9 + $0x20] sm:$0xff]  ;;  %v9107_v6 = vld [vmem:[#allocation89_spill] sm:$0xff] }
 0x456   : > { %v3507_v49 = vmul.f32 0.11111111, %v3443_v9  ;;  %v3301_v62 = vadd.f32 %v3195_v17, %v3093_v52  ;;  %v3340_v58 = vsel %vm3330_vm15, %v3337_v18, %v3339_v27  ;;  %v3196_v2 = vrot.slane %v3095_v57, 1  ;;  %v9108_v9 = vld [vmem:[#allocation40_spill] sm:$0xff] }
 0x457   : > { %v3508_v31 = vmul.f32 0.11111111, %v3444_v8  ;;  %v3509_v4 = vmul.f32 0.11111111, %v3445_v37  ;;  %v3197_v54 = vrot.slane %v3096_v38, 1  ;;  %v3341_v28 = vrot.slane %v3095_v57, 2 }
 0x458   : > { %v3539_v23 = vadd.f32 %v3507_v49, %v3475_v50  ;;  %v3446_v26 = vadd.f32 %v3340_v58, %v3301_v62  ;;  %v3342_v40 = vrot.slane %v3096_v38, 2  ;;  %v3097_v15 = vadd.f32 %v3049_v7, %v9102_v53  ;;  %v9109_v8 = vld [vmem:[#allocation41_spill] sm:$0xff] }
 0x459   : > { %v3540_v35 = vadd.f32 %v3508_v31, %v3476_v21  ;;  %v3541_v11 = vadd.f32 %v3509_v4, %v3477_v39  ;;  %v3198_v5 = vsel %vm3185_vm14, %v3196_v2, %v3197_v54  ;;  %v3050_v63 = vadd.f32 %v9098_v61, %v9094_v19  ;;  %v9104_v19 = vld [vmem:[#allocation33_spill] sm:$0xff] }
 0x45a   : > { %3571 = vst.msk [vmem:[%s5608_s9] sm:$0xff] %vm922_vm5, %v3539_v23  ;;  %v3510_v13 = vmul.f32 0.11111111, %v3446_v26  ;;  %v3302_v45 = vadd.f32 %v3198_v5, %v3095_v57  ;;  %v3343_v59 = vsel %vm3330_vm15, %v3341_v28, %v3342_v40  ;;  %v3199_v30 = vrot.slane %v3097_v15, 1  ;;  %v3480_v57 = vld [vmem:[%s5608_s9 + $0x28] sm:$0xff]  ;;  %v3481_v53 = vld [vmem:[%s5608_s9 + $0x30] sm:$0xff] }
 0x45b   : > { %3572 = vst.msk [vmem:[%s5608_s9 + $0x8] sm:$0xff] %vm922_vm5, %v3540_v35  ;;  %3573 = vst.msk [vmem:[%s5608_s9 + $0x10] sm:$0xff] %vm922_vm5, %v3541_v11  ;;  %v3344_v52 = vrot.slane %v3097_v15, 2  ;;  %v3051_v33 = vadd.f32 %v9099_v1, %v9095_v14  ;;  %v3098_v10 = vadd.f32 %v3050_v63, %v9103_v20  ;;  %v3052_v34 = vadd.f32 %v9105_v43, %v9104_v19  ;;  %v9110_v28 = vld [vmem:[#allocation36_spill] sm:$0xff]  ;;  %v3482_v63 = vld [vmem:[%s5608_s9 + $0x38] sm:$0xff] }
 0x45c   : > { %v3542_v36 = vadd.f32 %v3510_v13, %v3478_v44  ;;  %v3447_v12 = vadd.f32 %v3343_v59, %v3302_v45  ;;  %v3200_v60 = vsel %vm3185_vm14, %v3197_v54, %v3199_v30  ;;  %v3053_v32 = vadd.f32 %v9103_v20, %v9098_v61  ;;  %v9111_v23 = vld [vmem:[#allocation72_spill] sm:$0xff]  ;;  %v9112_v13 = vld [vmem:[#allocation90_spill] sm:$0xff]  ;;  %v9113_v59 = vld [vmem:[#allocation43_spill] sm:$0xff] }
 0x45d   : > { %v3303_v56 = vadd.f32 %v3200_v60, %v3096_v38  ;;  %v3345_v0 = vsel %vm3330_vm15, %v3342_v40, %v3344_v52  ;;  %v3099_v18 = vadd.f32 %v3051_v33, %v9106_v25  ;;  %v3201_v14 = vrot.slane %v3098_v10, 1  ;;  %v9114_v52 = vld [vmem:[#allocation39_spill] sm:$0xff]  ;;  %v9115_v33 = vld [vmem:[#allocation73_spill] sm:$0xff]  ;;  %v9116_v43 = vld [vmem:[#allocation44_spill] sm:$0xff] }
 0x45e   : > { %3574 = vst.msk [vmem:[%s5608_s9 + $0x18] sm:$0xff] %vm922_vm5, %v3542_v36  ;;  %v3511_v41 = vmul.f32 0.11111111, %v3447_v12  ;;  %v3346_v3 = vrot.slane %v3098_v10, 2  ;;  %v3100_v29 = vadd.f32 %v3052_v34, %v9107_v6  ;;  %v3054_v55 = vadd.f32 %v9106_v25, %v9099_v1  ;;  %v3483_v60 = vld [vmem:[%s5608_s9 + $0x40] sm:$0xff] }
 0x45f   : > { %v3448_v51 = vadd.f32 %v3345_v0, %v3303_v56  ;;  %v3202_v22 = vrot.slane %v3099_v18, 1  ;;  %v3347_v16 = vrot.slane %v3099_v18, 2  ;;  %v3101_v27 = vadd.f32 %v3053_v32, %v9108_v9 }
 0x460   : > { %v3543_v61 = vadd.f32 %v3511_v41, %v3479_v46  ;;  %v3204_v38 = vrot.slane %v3100_v29, 1  ;;  %v3349_v50 = vrot.slane %v3100_v29, 2  ;;  %v3102_v37 = vadd.f32 %v3054_v55, %v9109_v8  ;;  %v9117_v29 = vld [vmem:[#allocation91_spill] sm:$0xff] }
 0x461   : > { %v3512_v17 = vmul.f32 0.11111111, %v3448_v51  ;;  %v3203_v24 = vsel %vm3185_vm14, %v3201_v14, %v3202_v22  ;;  %v3348_v42 = vsel %vm3330_vm15, %v3346_v3, %v3347_v16  ;;  %v3206_v7 = vrot.slane %v3101_v27, 1 }
 0x462   : > { %3575 = vst.msk [vmem:[%s5608_s9 + $0x20] sm:$0xff] %vm922_vm5, %v3543_v61  ;;  %v3304_v1 = vadd.f32 %v3203_v24, %v3098_v10  ;;  %v3205_v49 = vsel %vm3185_vm14, %v3202_v22, %v3204_v38  ;;  %v3350_v21 = vsel %vm3330_vm15, %v3347_v16, %v3349_v50  ;;  %v3207_v39 = vrot.slane %v3102_v37, 1 }
 0x463   : > { %v3544_v62 = vadd.f32 %v3512_v17, %v3480_v57  ;;  %v3305_v58 = vadd.f32 %v3205_v49, %v3099_v18  ;;  %v3351_v2 = vrot.slane %v3101_v27, 2  ;;  %v3352_v31 = vrot.slane %v3102_v37, 2  ;;  %v9118_v17 = vld [vmem:[#allocation46_spill] sm:$0xff] }
 0x464   : > { %v3449_v4 = vadd.f32 %v3348_v42, %v3304_v1  ;;  %v3208_v54 = vsel %vm3185_vm14, %v3206_v7, %v3207_v39  ;;  %v3055_v26 = vadd.f32 %v9111_v23, %v9110_v28  ;;  %v3056_v40 = vadd.f32 %v9108_v9, %v9103_v20  ;;  %v9119_v42 = vld [vmem:[#allocation47_spill] sm:$0xff]  ;;  %v9120_v1 = vld [vmem:[#allocation42_spill] sm:$0xff] }
 0x465   : > { %3576 = vst.msk [vmem:[%s5608_s9 + $0x28] sm:$0xff] %vm922_vm5, %v3544_v62  ;;  %v3450_v15 = vadd.f32 %v3350_v21, %v3305_v58  ;;  %v3306_v35 = vadd.f32 %v3208_v54, %v3101_v27  ;;  %v3353_v11 = vsel %vm3330_vm15, %v3351_v2, %v3352_v31  ;;  %v3057_v44 = vadd.f32 %v9109_v8, %v9106_v25  ;;  %v3484_v21 = vld [vmem:[%s5608_s9 + $0x48] sm:$0xff] }
 0x466   : > { %v3513_v5 = vmul.f32 0.11111111, %v3449_v4  ;;  %v3103_v45 = vadd.f32 %v3055_v26, %v9112_v13  ;;  %v3104_v30 = vadd.f32 %v3056_v40, %v9113_v59  ;;  %v3058_v20 = vadd.f32 %v9115_v33, %v9114_v52  ;;  %v3486_v13 = vld [vmem:[%s5608_s9 + $0x58] sm:$0xff] }
 0x467   : > { %v3514_v10 = vmul.f32 0.11111111, %v3450_v15  ;;  %v3451_v19 = vadd.f32 %v3353_v11, %v3306_v35  ;;  %v3105_v34 = vadd.f32 %v3057_v44, %v9116_v43  ;;  %v3059_v36 = vadd.f32 %v9113_v59, %v9108_v9 }
 0x468   : > { %v3545_v12 = vadd.f32 %v3513_v5, %v3481_v53  ;;  %v3209_v32 = vrot.slane %v3103_v45, 1  ;;  %v3354_v46 = vrot.slane %v3103_v45, 2  ;;  %v3211_v56 = vrot.slane %v3104_v30, 1  ;;  %v9122_v53 = vld [vmem:[#allocation92_spill] sm:$0xff] }
 0x469   : > { %v3546_v0 = vadd.f32 %v3514_v10, %v3482_v63  ;;  %v3515_v25 = vmul.f32 0.11111111, %v3451_v19  ;;  %v3212_v18 = vrot.slane %v3105_v34, 1  ;;  %v3356_v14 = vrot.slane %v3104_v30, 2 }
 0x46a   : > { %3577 = vst.msk [vmem:[%s5608_s9 + $0x30] sm:$0xff] %vm922_vm5, %v3545_v12  ;;  %v3210_v41 = vsel %vm3185_vm14, %v3207_v39, %v3209_v32  ;;  %v3355_v3 = vsel %vm3330_vm15, %v3352_v31, %v3354_v46  ;;  %v3357_v6 = vrot.slane %v3105_v34, 2  ;;  %v3106_v55 = vadd.f32 %v3058_v20, %v9117_v29  ;;  %v3485_v31 = vld [vmem:[%s5608_s9 + $0x50] sm:$0xff]  ;;  %v3487_v46 = vld [vmem:[%s5608_s9 + $0x60] sm:$0xff] }
 0x46b   : > { %3578 = vst.msk [vmem:[%s5608_s9 + $0x38] sm:$0xff] %vm922_vm5, %v3546_v0  ;;  %v3547_v51 = vadd.f32 %v3515_v25, %v3483_v60  ;;  %v3307_v22 = vadd.f32 %v3210_v41, %v3102_v37  ;;  %v3213_v16 = vsel %vm3185_vm14, %v3211_v56, %v3212_v18  ;;  %v3060_v9 = vadd.f32 %v9116_v43, %v9109_v8  ;;  %v9121_v37 = vld [vmem:[#allocation74_spill] sm:$0xff]  ;;  %v9125_v29 = vld [vmem:[#allocation93_spill] sm:$0xff] }
 0x46c   : > { %v3308_v27 = vadd.f32 %v3213_v16, %v3104_v30  ;;  %v3358_v61 = vsel %vm3330_vm15, %v3356_v14, %v3357_v6  ;;  %v3214_v57 = vrot.slane %v3106_v55, 1  ;;  %v3359_v38 = vrot.slane %v3106_v55, 2 }
 0x46d   : > { %3579 = vst.msk [vmem:[%s5608_s9 + $0x40] sm:$0xff] %vm922_vm5, %v3547_v51  ;;  %v3452_v50 = vadd.f32 %v3355_v3, %v3307_v22  ;;  %v3107_v24 = vadd.f32 %v3059_v36, %v9118_v17  ;;  %v3108_v7 = vadd.f32 %v3060_v9, %v9119_v42  ;;  %v3061_v49 = vadd.f32 %v9121_v37, %v9120_v1  ;;  %v9124_v36 = vld [vmem:[#allocation75_spill] sm:$0xff]  ;;  %v9126_v22 = vld [vmem:[#allocation50_spill] sm:$0xff] }
 0x46e   : > { %v3453_v39 = vadd.f32 %v3358_v61, %v3308_v27  ;;  %v3215_v8 = vsel %vm3185_vm14, %v3212_v18, %v3214_v57  ;;  %v3360_v62 = vsel %vm3330_vm15, %v3357_v6, %v3359_v38  ;;  %v3062_v58 = vadd.f32 %v9118_v17, %v9113_v59  ;;  %v3488_v27 = vld [vmem:[%s5608_s9 + $0x68] sm:$0xff] }
 0x46f   : > { %v3516_v2 = vmul.f32 0.11111111, %v3452_v50  ;;  %v3309_v4 = vadd.f32 %v3215_v8, %v3105_v34  ;;  %v3216_v54 = vrot.slane %v3107_v24, 1  ;;  %v3217_v28 = vrot.slane %v3108_v7, 1  ;;  %v9123_v34 = vld [vmem:[#allocation45_spill] sm:$0xff]  ;;  %v9127_v38 = vld [vmem:[#allocation48_spill] sm:$0xff] }
 0x470   : > { %v3517_v23 = vmul.f32 0.11111111, %v3453_v39  ;;  %v3361_v26 = vrot.slane %v3107_v24, 2  ;;  %v3362_v40 = vrot.slane %v3108_v7, 2  ;;  %v3109_v15 = vadd.f32 %v3061_v49, %v9122_v53  ;;  %v9128_v50 = vld [vmem:[#allocation76_spill] sm:$0xff]  ;;  %v9130_v8 = vld [vmem:[#allocation94_spill] sm:$0xff] }
 0x471   : > { %v3548_v35 = vadd.f32 %v3516_v2, %v3484_v21  ;;  %v3454_v11 = vadd.f32 %v3360_v62, %v3309_v4  ;;  %v3218_v44 = vsel %vm3185_vm14, %v3216_v54, %v3217_v28  ;;  %v3063_v5 = vadd.f32 %v9119_v42, %v9116_v43  ;;  %v3489_v54 = vld [vmem:[%s5608_s9 + $0x70] sm:$0xff] }
 0x472   : > { %v3549_v63 = vadd.f32 %v3517_v23, %v3485_v31  ;;  %v3310_v45 = vadd.f32 %v3218_v44, %v3107_v24  ;;  %v3363_v59 = vsel %vm3330_vm15, %v3361_v26, %v3362_v40  ;;  %v3219_v30 = vrot.slane %v3109_v15, 1 }
 0x473   : > { %3580 = vst.msk [vmem:[%s5608_s9 + $0x48] sm:$0xff] %vm922_vm5, %v3548_v35  ;;  %v3518_v52 = vmul.f32 0.11111111, %v3454_v11  ;;  %v3364_v33 = vrot.slane %v3109_v15, 2  ;;  %v3110_v20 = vadd.f32 %v3062_v58, %v6273_v47  ;;  %v3111_v10 = vadd.f32 %v3063_v5, %v6275_v48 }
 0x474   : > { %3581 = vst.msk [vmem:[%s5608_s9 + $0x50] sm:$0xff] %vm922_vm5, %v3549_v63  ;;  %v3455_v19 = vadd.f32 %v3363_v59, %v3310_v45  ;;  %v3220_v43 = vsel %vm3185_vm14, %v3217_v28, %v3219_v30  ;;  %v3064_v12 = vadd.f32 %v9124_v36, %v9123_v34  ;;  %v3065_v60 = vadd.f32 %v6273_v47, %v9118_v17  ;;  %v3490_v59 = vld [vmem:[%s5608_s9 + $0x78] sm:$0xff]  ;;  %v9133_v36 = vld [vmem:[#allocation49_spill] sm:$0xff] }
 0x475   : > { %v3550_v32 = vadd.f32 %v3518_v52, %v3486_v13  ;;  %v3311_v56 = vadd.f32 %v3220_v43, %v3108_v7  ;;  %v3365_v0 = vsel %vm3330_vm15, %v3362_v40, %v3364_v33  ;;  %v3221_v25 = vrot.slane %v3110_v20, 1  ;;  %v9132_v43 = vld [vmem:[#allocation54_spill] sm:$0xff] }
 0x476   : > { %v3519_v18 = vmul.f32 0.11111111, %v3455_v19  ;;  %v3222_v14 = vrot.slane %v3111_v10, 1  ;;  %v3366_v41 = vrot.slane %v3110_v20, 2  ;;  %v3367_v3 = vrot.slane %v3111_v10, 2 }
 0x477   : > { %3582 = vst.msk [vmem:[%s5608_s9 + $0x58] sm:$0xff] %vm922_vm5, %v3550_v32  ;;  %v3456_v6 = vadd.f32 %v3365_v0, %v3311_v56  ;;  %v3112_v55 = vadd.f32 %v3064_v12, %v9125_v29  ;;  %v3066_v51 = vadd.f32 %v6275_v48, %v9119_v42  ;;  %v3113_v16 = vadd.f32 %v3065_v60, %v9126_v22  ;;  %v9129_v42 = vld [vmem:[#allocation51_spill] sm:$0xff]  ;;  %v9134_v12 = vld [vmem:[#allocation77_spill] sm:$0xff] }
 0x478   : > { %v3551_v9 = vadd.f32 %v3519_v18, %v3487_v46  ;;  %v3223_v61 = vsel %vm3185_vm14, %v3221_v25, %v3222_v14  ;;  %v3368_v57 = vsel %vm3330_vm15, %v3366_v41, %v3367_v3  ;;  %v3067_v17 = vadd.f32 %v9128_v50, %v9127_v38  ;;  %v3491_v18 = vld [vmem:[%s5608_s9 + $0x80] sm:$0xff]  ;;  %v9138_v50 = vld [vmem:[#allocation52_spill] sm:$0xff] }
 0x479   : > { %v3520_v24 = vmul.f32 0.11111111, %v3456_v6  ;;  %v3312_v7 = vadd.f32 %v3223_v61, %v3110_v20  ;;  %v3224_v1 = vrot.slane %v3112_v55, 1  ;;  %v3369_v37 = vrot.slane %v3112_v55, 2 }
 0x47a   : > { %3583 = vst.msk [vmem:[%s5608_s9 + $0x60] sm:$0xff] %vm922_vm5, %v3551_v9  ;;  %v3114_v49 = vadd.f32 %v3066_v51, %v9129_v42  ;;  %v3226_v21 = vrot.slane %v3113_v16, 1  ;;  %v3371_v39 = vrot.slane %v3113_v16, 2  ;;  %v3115_v62 = vadd.f32 %v3067_v17, %v9130_v8  ;;  %v9139_v17 = vld [vmem:[#allocation78_spill] sm:$0xff] }
 0x47b   : > { %v3552_v58 = vadd.f32 %v3520_v24, %v3488_v27  ;;  %v3457_v2 = vadd.f32 %v3368_v57, %v3312_v7  ;;  %v3225_v31 = vsel %vm3185_vm14, %v3222_v14, %v3224_v1  ;;  %v3370_v4 = vsel %vm3330_vm15, %v3367_v3, %v3369_v37  ;;  %v3492_v14 = vld [vmem:[%s5608_s9 + $0x88] sm:$0xff]  ;;  %v9137_v57 = vld [vmem:[#allocation57_spill] sm:$0xff] }
 0x47c   : > { %v3313_v28 = vadd.f32 %v3225_v31, %v3111_v10  ;;  %v3227_v23 = vrot.slane %v3114_v49, 1  ;;  %v3372_v26 = vrot.slane %v3114_v49, 2  ;;  %v3229_v40 = vrot.slane %v3115_v62, 1  ;;  %v9131_v10 = vld [vmem:[#allocation53_spill] sm:$0xff]  ;;  %v9136_v27 = vld [vmem:[#allocation56_spill] sm:$0xff] }
 0x47d   : > { %3584 = vst.msk [vmem:[%s5608_s9 + $0x68] sm:$0xff] %vm922_vm5, %v3552_v58  ;;  %v3521_v53 = vmul.f32 0.11111111, %v3457_v2  ;;  %v3374_v15 = vrot.slane %v3115_v62, 2  ;;  %v3068_v35 = vadd.f32 %v9126_v22, %v6273_v47  ;;  %v3069_v11 = vadd.f32 %v9129_v42, %v6275_v48  ;;  %v9140_v31 = vld [vmem:[#allocation96_spill] sm:$0xff] }
 0x47e   : > { %v3458_v44 = vadd.f32 %v3370_v4, %v3313_v28  ;;  %v3228_v5 = vsel %vm3185_vm14, %v3226_v21, %v3227_v23  ;;  %v3373_v63 = vsel %vm3330_vm15, %v3371_v39, %v3372_v26  ;;  %v3230_v13 = vsel %vm3185_vm14, %v3227_v23, %v3229_v40 }
 0x47f   : > { %v3553_v45 = vadd.f32 %v3521_v53, %v3489_v54  ;;  %v3314_v30 = vadd.f32 %v3228_v5, %v3113_v16  ;;  %v3315_v52 = vadd.f32 %v3230_v13, %v3114_v49  ;;  %v3375_v33 = vsel %vm3330_vm15, %v3372_v26, %v3374_v15  ;;  %v9135_v16 = vld [vmem:[#allocation95_spill] sm:$0xff]  ;;  %v3493_v54 = vld [vmem:[%s5608_s9 + $0x90] sm:$0xff] }
 0x480   : > { %v3522_v20 = vmul.f32 0.11111111, %v3458_v44  ;;  %v3116_v19 = vadd.f32 %v3068_v35, %v9131_v10  ;;  %v3117_v34 = vadd.f32 %v3069_v11, %v9132_v43  ;;  %v3070_v60 = vadd.f32 %v9134_v12, %v9133_v36  ;;  %v9141_v13 = vld [vmem:[#allocation59_spill] sm:$0xff] }
 0x481   : > { %3585 = vst.msk [vmem:[%s5608_s9 + $0x70] sm:$0xff] %vm922_vm5, %v3553_v45  ;;  %v3459_v32 = vadd.f32 %v3373_v63, %v3314_v30  ;;  %v3460_v46 = vadd.f32 %v3375_v33, %v3315_v52  ;;  %v3071_v56 = vadd.f32 %v9131_v10, %v9126_v22  ;;  %v3072_v0 = vadd.f32 %v9132_v43, %v9129_v42  ;;  %v9142_v33 = vld [vmem:[#allocation55_spill] sm:$0xff] }
 0x482   : > { %v3554_v25 = vadd.f32 %v3522_v20, %v3490_v59  ;;  %v3231_v41 = vrot.slane %v3116_v19, 1  ;;  %v3232_v3 = vrot.slane %v3117_v34, 1  ;;  %v3376_v6 = vrot.slane %v3116_v19, 2  ;;  %v9143_v20 = vld [vmem:[#allocation79_spill] sm:$0xff] }
 0x483   : > { %v3523_v29 = vmul.f32 0.11111111, %v3459_v32  ;;  %v3524_v55 = vmul.f32 0.11111111, %v3460_v46  ;;  %v3377_v51 = vrot.slane %v3117_v34, 2  ;;  %v3118_v9 = vadd.f32 %v3070_v60, %v9135_v16  ;;  %v3495_v36 = vld [vmem:[%s5608_s9 + $0xa0] sm:$0xff] }
 0x484   : > { %3586 = vst.msk [vmem:[%s5608_s9 + $0x78] sm:$0xff] %vm922_vm5, %v3554_v25  ;;  %v3233_v22 = vsel %vm3185_vm14, %v3231_v41, %v3232_v3  ;;  %v3119_v61 = vadd.f32 %v3071_v56, %v9136_v27  ;;  %v3120_v38 = vadd.f32 %v3072_v0, %v9137_v57  ;;  %v3073_v24 = vadd.f32 %v9139_v17, %v9138_v50  ;;  %v9144_v60 = vld [vmem:[#allocation60_spill] sm:$0xff]  ;;  %v9145_v41 = vld [vmem:[#allocation97_spill] sm:$0xff] }
 0x485   : > { %v3555_v7 = vadd.f32 %v3523_v29, %v3491_v18  ;;  %v3556_v1 = vadd.f32 %v3524_v55, %v3492_v14  ;;  %v3316_v37 = vadd.f32 %v3233_v22, %v3116_v19  ;;  %v3378_v42 = vsel %vm3330_vm15, %v3376_v6, %v3377_v51 }
 0x486   : > { %v3234_v49 = vrot.slane %v3118_v9, 1  ;;  %v3379_v21 = vrot.slane %v3118_v9, 2  ;;  %v3236_v39 = vrot.slane %v3119_v61, 1  ;;  %v3237_v8 = vrot.slane %v3120_v38, 1  ;;  %v3496_v9 = vld [vmem:[%s5608_s9 + $0xa8] sm:$0xff] }
 0x487   : > { %3587 = vst.msk [vmem:[%s5608_s9 + $0x80] sm:$0xff] %vm922_vm5, %v3555_v7  ;;  %3588 = vst.msk [vmem:[%s5608_s9 + $0x88] sm:$0xff] %vm922_vm5, %v3556_v1  ;;  %v3461_v62 = vadd.f32 %v3378_v42, %v3316_v37  ;;  %v3381_v58 = vrot.slane %v3119_v61, 2  ;;  %v3382_v2 = vrot.slane %v3120_v38, 2  ;;  %v3121_v4 = vadd.f32 %v3073_v24, %v9140_v31  ;;  %v9146_v24 = vld [vmem:[#allocation62_spill] sm:$0xff]  ;;  %v9147_v1 = vld [vmem:[#allocation63_spill] sm:$0xff] }
 0x488   : > { %v3235_v28 = vsel %vm3185_vm14, %v3232_v3, %v3234_v49  ;;  %v3380_v23 = vsel %vm3330_vm15, %v3377_v51, %v3379_v21  ;;  %v3238_v26 = vsel %vm3185_vm14, %v3236_v39, %v3237_v8  ;;  %v3074_v40 = vadd.f32 %v9136_v27, %v9131_v10  ;;  %v3494_v10 = vld [vmem:[%s5608_s9 + $0x98] sm:$0xff]  ;;  %v9149_v21 = vld [vmem:[#allocation80_spill] sm:$0xff] }
 0x489   : > { %v3525_v53 = vmul.f32 0.11111111, %v3461_v62  ;;  %v3317_v15 = vadd.f32 %v3235_v28, %v3117_v34  ;;  %v3318_v35 = vadd.f32 %v3238_v26, %v3119_v61  ;;  %v3383_v11 = vsel %vm3330_vm15, %v3381_v58, %v3382_v2  ;;  %v9148_v49 = vld [vmem:[#allocation58_spill] sm:$0xff] }
 0x48a   : > { %v3239_v44 = vrot.slane %v3121_v4, 1  ;;  %v3384_v5 = vrot.slane %v3121_v4, 2  ;;  %v3075_v63 = vadd.f32 %v9137_v57, %v9132_v43  ;;  %v3122_v45 = vadd.f32 %v3074_v40, %v9141_v13  ;;  %v3497_v4 = vld [vmem:[%s5608_s9 + $0xb0] sm:$0xff]  ;;  %v9150_v26 = vld [vmem:[#allocation98_spill] sm:$0xff] }
 0x48b   : > { %v3557_v59 = vadd.f32 %v3525_v53, %v3493_v54  ;;  %v3462_v30 = vadd.f32 %v3380_v23, %v3317_v15  ;;  %v3463_v52 = vadd.f32 %v3383_v11, %v3318_v35  ;;  %v3076_v19 = vadd.f32 %v9143_v20, %v9142_v33  ;;  %v9151_v11 = vld [vmem:[#allocation65_spill] sm:$0xff]  ;;  %v9152_v20 = vld [vmem:[#allocation66_spill] sm:$0xff] }
 0x48c   : > { %v3240_v34 = vsel %vm3185_vm14, %v3237_v8, %v3239_v44  ;;  %v3385_v12 = vsel %vm3330_vm15, %v3382_v2, %v3384_v5  ;;  %v3123_v32 = vadd.f32 %v3075_v63, %v9144_v60  ;;  %v3241_v46 = vrot.slane %v3122_v45, 1  ;;  %v3498_v5 = vld [vmem:[%s5608_s9 + $0xb8] sm:$0xff] }
 0x48d   : > { %3589 = vst.msk [vmem:[%s5608_s9 + $0x90] sm:$0xff] %vm922_vm5, %v3557_v59  ;;  %v3526_v43 = vmul.f32 0.11111111, %v3462_v30  ;;  %v3527_v56 = vmul.f32 0.11111111, %v3463_v52  ;;  %v3319_v0 = vadd.f32 %v3240_v34, %v3120_v38  ;;  %v3386_v25 = vrot.slane %v3122_v45, 2 }
 0x48e   : > { %v3242_v18 = vrot.slane %v3123_v32, 1  ;;  %v3387_v14 = vrot.slane %v3123_v32, 2  ;;  %v3124_v3 = vadd.f32 %v3076_v19, %v9145_v41  ;;  %v3077_v6 = vadd.f32 %v9141_v13, %v9136_v27 }
 0x48f   : > { %v3558_v29 = vadd.f32 %v3526_v43, %v3494_v10  ;;  %v3559_v55 = vadd.f32 %v3527_v56, %v3495_v36  ;;  %v3464_v51 = vadd.f32 %v3385_v12, %v3319_v0  ;;  %v3078_v16 = vadd.f32 %v9144_v60, %v9137_v57  ;;  %v3499_v56 = vld [vmem:[%s5608_s9 + $0xc0] sm:$0xff] }
 0x490   : > { %v3243_v22 = vsel %vm3185_vm14, %v3241_v46, %v3242_v18  ;;  %v3388_v61 = vsel %vm3330_vm15, %v3386_v25, %v3387_v14  ;;  %v3244_v38 = vrot.slane %v3124_v3, 1  ;;  %v3389_v50 = vrot.slane %v3124_v3, 2  ;;  %v9153_v25 = vld [vmem:[#allocation61_spill] sm:$0xff] }
 0x491   : > { %3590 = vst.msk [vmem:[%s5608_s9 + $0x98] sm:$0xff] %vm922_vm5, %v3558_v29  ;;  %3591 = vst.msk [vmem:[%s5608_s9 + $0xa0] sm:$0xff] %vm922_vm5, %v3559_v55  ;;  %v3528_v17 = vmul.f32 0.11111111, %v3464_v51  ;;  %v3320_v27 = vadd.f32 %v3243_v22, %v3122_v45  ;;  %v3125_v7 = vadd.f32 %v3077_v6, %v9146_v24  ;;  %v3126_v37 = vadd.f32 %v3078_v16, %v9147_v1  ;;  %v9155_v51 = vld [vmem:[#allocation64_spill] sm:$0xff]  ;;  %v9156_v16 = vld [vmem:[#allocation82_spill] sm:$0xff] }
 0x492   : > { %v3245_v57 = vsel %vm3185_vm14, %v3242_v18, %v3244_v38  ;;  %v3390_v42 = vsel %vm3330_vm15, %v3387_v14, %v3389_v50  ;;  %v3079_v39 = vadd.f32 %v9149_v21, %v9148_v49  ;;  %v3080_v8 = vadd.f32 %v9146_v24, %v9141_v13  ;;  %v9154_v18 = vld [vmem:[#allocation81_spill] sm:$0xff]  ;;  %v3500_v22 = vld [vmem:[%s5608_s9 + $0xc8] sm:$0xff]  ;;  %v9157_v50 = vld [vmem:[#allocation99_spill] sm:$0xff] }
 0x493   : > { %v3560_v62 = vadd.f32 %v3528_v17, %v3496_v9  ;;  %v3465_v58 = vadd.f32 %v3388_v61, %v3320_v27  ;;  %v3321_v2 = vadd.f32 %v3245_v57, %v3123_v32  ;;  %v3246_v31 = vrot.slane %v3125_v7, 1  ;;  %v9158_v27 = vld [vmem:[#allocation83_spill] sm:$0xff] }
 0x494   : > { %v3247_v54 = vrot.slane %v3126_v37, 1  ;;  %v3391_v28 = vrot.slane %v3125_v7, 2  ;;  %v3392_v23 = vrot.slane %v3126_v37, 2  ;;  %v3127_v40 = vadd.f32 %v3079_v39, %v9150_v26 }
 0x495   : > { %3592 = vst.msk [vmem:[%s5608_s9 + $0xa8] sm:$0xff] %vm922_vm5, %v3560_v62  ;;  %v3529_v53 = vmul.f32 0.11111111, %v3465_v58  ;;  %v3466_v15 = vadd.f32 %v3390_v42, %v3321_v2  ;;  %v3081_v35 = vadd.f32 %v9147_v1, %v9144_v60  ;;  %v3128_v44 = vadd.f32 %v3080_v8, %v9151_v11  ;;  %v9160_v42 = vld [vmem:[#allocation100_spill] sm:$0xff]  ;;  %v3501_v2 = vld [vmem:[%s5608_s9 + $0xd0] sm:$0xff] }
 0x496   : > { %v3248_v63 = vsel %vm3185_vm14, %v3246_v31, %v3247_v54  ;;  %v3393_v13 = vsel %vm3330_vm15, %v3391_v28, %v3392_v23  ;;  %v3249_v45 = vrot.slane %v3127_v40, 1  ;;  %v3394_v59 = vrot.slane %v3127_v40, 2 }
 0x497   : > { %v3561_v30 = vadd.f32 %v3529_v53, %v3497_v4  ;;  %v3530_v52 = vmul.f32 0.11111111, %v3466_v15  ;;  %v3322_v33 = vadd.f32 %v3248_v63, %v3125_v7  ;;  %v3129_v19 = vadd.f32 %v3081_v35, %v9152_v20 }
 0x498   : > { %v3250_v10 = vsel %vm3185_vm14, %v3247_v54, %v3249_v45  ;;  %v3395_v36 = vsel %vm3330_vm15, %v3392_v23, %v3394_v59  ;;  %v3251_v34 = vrot.slane %v3128_v44, 1  ;;  %v3396_v12 = vrot.slane %v3128_v44, 2 }
 0x499   : > { %3593 = vst.msk [vmem:[%s5608_s9 + $0xb0] sm:$0xff] %vm922_vm5, %v3561_v30  ;;  %v3562_v60 = vadd.f32 %v3530_v52, %v3498_v5  ;;  %v3467_v32 = vadd.f32 %v3393_v13, %v3322_v33  ;;  %v3323_v46 = vadd.f32 %v3250_v10, %v3126_v37  ;;  %v3252_v43 = vrot.slane %v3129_v19, 1  ;;  %v9159_v37 = vld [vmem:[#allocation84_spill] sm:$0xff] }
 0x49a   : > { %v3397_v0 = vrot.slane %v3129_v19, 2  ;;  %v3082_v14 = vadd.f32 %v9154_v18, %v9153_v25  ;;  %v3083_v41 = vadd.f32 %v9151_v11, %v9146_v24  ;;  %v3084_v3 = vadd.f32 %v9152_v20, %v9147_v1  ;;  %v3504_v18 = vld [vmem:[%s5608_s9 + $0xe8] sm:$0xff] }
 0x49b   : > { %3594 = vst.msk [vmem:[%s5608_s9 + $0xb8] sm:$0xff] %vm922_vm5, %v3562_v60  ;;  %v3531_v6 = vmul.f32 0.11111111, %v3467_v32  ;;  %v3468_v29 = vadd.f32 %v3395_v36, %v3323_v46  ;;  %v3253_v55 = vsel %vm3185_vm14, %v3251_v34, %v3252_v43  ;;  %v3085_v9 = vadd.f32 %v9156_v16, %v9155_v51  ;;  %v9161_v36 = vld [vmem:[#allocation22_spill] sm:$0xff]  ;;  %v9163_v60 = vld [vmem:[#allocation85_spill] sm:$0xff] }
 0x49c   : > { %v3324_v61 = vadd.f32 %v3253_v55, %v3128_v44  ;;  %v3398_v38 = vsel %vm3330_vm15, %v3396_v12, %v3397_v0  ;;  %v3130_v17 = vadd.f32 %v3082_v14, %v9157_v50  ;;  %v3131_v24 = vadd.f32 %v3083_v41, %v9158_v27  ;;  %v9162_v12 = vld [vmem:[#allocation67_spill] sm:$0xff]  ;;  %v9165_v41 = vld [vmem:[#allocation24_spill] sm:$0xff] }
 0x49d   : > { %v3563_v7 = vadd.f32 %v3531_v6, %v3499_v56  ;;  %v3532_v1 = vmul.f32 0.11111111, %v3468_v29  ;;  %v3132_v57 = vadd.f32 %v3084_v3, %v9159_v37  ;;  %v3133_v49 = vadd.f32 %v3085_v9, %v9160_v42  ;;  %v9164_v56 = vld [vmem:[#allocation23_spill] sm:$0xff] }
 0x49e   : > { %v3469_v21 = vadd.f32 %v3398_v38, %v3324_v61  ;;  %v3254_v39 = vrot.slane %v3130_v17, 1  ;;  %v3399_v8 = vrot.slane %v3130_v17, 2  ;;  %v3256_v62 = vrot.slane %v3131_v24, 1 }
 0x49f   : > { %3595 = vst.msk [vmem:[%s5608_s9 + $0xc0] sm:$0xff] %vm922_vm5, %v3563_v7  ;;  %v3564_v58 = vadd.f32 %v3532_v1, %v3500_v22  ;;  %v3257_v31 = vrot.slane %v3132_v57, 1  ;;  %v3401_v4 = vrot.slane %v3131_v24, 2  ;;  %v3402_v54 = vrot.slane %v3132_v57, 2 }
 0x4a0   : > { %v3533_v28 = vmul.f32 0.11111111, %v3469_v21  ;;  %v3255_v23 = vsel %vm3185_vm14, %v3252_v43, %v3254_v39  ;;  %v3400_v26 = vsel %vm3330_vm15, %v3397_v0, %v3399_v8  ;;  %v3259_v40 = vrot.slane %v3133_v49, 1  ;;  %v3503_v43 = vld [vmem:[%s5608_s9 + $0xe0] sm:$0xff] }
 0x4a1   : > { %3596 = vst.msk [vmem:[%s5608_s9 + $0xc8] sm:$0xff] %vm922_vm5, %v3564_v58  ;;  %v3325_v53 = vadd.f32 %v3255_v23, %v3129_v19  ;;  %v3258_v15 = vsel %vm3185_vm14, %v3256_v62, %v3257_v31  ;;  %v3403_v35 = vsel %vm3330_vm15, %v3401_v4, %v3402_v54  ;;  %v3404_v44 = vrot.slane %v3133_v49, 2  ;;  %v3502_v19 = vld [vmem:[%s5608_s9 + $0xd8] sm:$0xff] }
 0x4a2   : > { %v3565_v5 = vadd.f32 %v3533_v28, %v3501_v2  ;;  %v3326_v63 = vadd.f32 %v3258_v15, %v3131_v24  ;;  %v3260_v13 = vsel %vm3185_vm14, %v3257_v31, %v3259_v40  ;;  %v3086_v45 = vadd.f32 %v9158_v27, %v9151_v11  ;;  %v3506_v49 = vld [vmem:[%s5608_s9 + $0xf8] sm:$0xff] }
 0x4a3   : > { %v3470_v59 = vadd.f32 %v3400_v26, %v3325_v53  ;;  %v3327_v30 = vadd.f32 %v3260_v13, %v3132_v57  ;;  %v3405_v52 = vsel %vm3330_vm15, %v3402_v54, %v3404_v44  ;;  %v3087_v33 = vadd.f32 %v9159_v37, %v9152_v20  ;;  %v3505_v37 = vld [vmem:[%s5608_s9 + $0xf0] sm:$0xff] }
 0x4a4   : > { %3597 = vst.msk [vmem:[%s5608_s9 + $0xd0] sm:$0xff] %vm922_vm5, %v3565_v5  ;;  %v3471_v10 = vadd.f32 %v3403_v35, %v3326_v63  ;;  %v3134_v34 = vadd.f32 %v3086_v45, %v9161_v36  ;;  %v3088_v32 = vadd.f32 %v9163_v60, %v9162_v12 }
 0x4a5   : > { %v3534_v46 = vmul.f32 0.11111111, %v3470_v59  ;;  %v3472_v11 = vadd.f32 %v3405_v52, %v3327_v30  ;;  %v3135_v0 = vadd.f32 %v3087_v33, %v9164_v56 }
 0x4a6   : > { %v3535_v25 = vmul.f32 0.11111111, %v3471_v10  ;;  %v3261_v14 = vrot.slane %v3134_v34, 1  ;;  %v3406_v20 = vrot.slane %v3134_v34, 2  ;;  %v3136_v3 = vadd.f32 %v3088_v32, %v9165_v41 }
 0x4a7   : > { %v3566_v6 = vadd.f32 %v3534_v46, %v3502_v19  ;;  %v3536_v29 = vmul.f32 0.11111111, %v3472_v11  ;;  %v3262_v55 = vrot.slane %v3135_v0, 1  ;;  %v3407_v51 = vrot.slane %v3135_v0, 2 }
 0x4a8   : > { %v3567_v16 = vadd.f32 %v3535_v25, %v3503_v43  ;;  %v3264_v9 = vrot.slane %v3136_v3, 1  ;;  %v3409_v22 = vrot.slane %v3136_v3, 2 }
 0x4a9   : > { %3598 = vst.msk [vmem:[%s5608_s9 + $0xd8] sm:$0xff] %vm922_vm5, %v3566_v6  ;;  %v3568_v61 = vadd.f32 %v3536_v29, %v3504_v18  ;;  %v3263_v38 = vsel %vm3185_vm14, %v3261_v14, %v3262_v55  ;;  %v3408_v50 = vsel %vm3330_vm15, %v3406_v20, %v3407_v51 }
 0x4aa   : > { %3599 = vst.msk [vmem:[%s5608_s9 + $0xe0] sm:$0xff] %vm922_vm5, %v3567_v16  ;;  %v3328_v17 = vadd.f32 %v3263_v38, %v3134_v34  ;;  %v3265_v27 = vsel %vm3185_vm14, %v3262_v55, %v3264_v9  ;;  %v3410_v24 = vsel %vm3330_vm15, %v3407_v51, %v3409_v22 }
 0x4ab   : > { %3600 = vst.msk [vmem:[%s5608_s9 + $0xe8] sm:$0xff] %vm922_vm5, %v3568_v61  ;;  %v3329_v7 = vadd.f32 %v3265_v27, %v3135_v0 }
 0x4ac   : > { %v3473_v1 = vadd.f32 %v3408_v50, %v3328_v17 }
 0x4ad   : > { %v3474_v57 = vadd.f32 %v3410_v24, %v3329_v7 }
 0x4ae   : > { %v3537_v42 = vmul.f32 0.11111111, %v3473_v1 }
 0x4af   : > { %v3538_v21 = vmul.f32 0.11111111, %v3474_v57 }
 0x4b0   : > { %v3569_v39 = vadd.f32 %v3537_v42, %v3505_v37 }
 0x4b1   : > { %v3570_v8 = vadd.f32 %v3538_v21, %v3506_v49 }
 0x4b2   : > { %3601 = vst.msk [vmem:[%s5608_s9 + $0xf0] sm:$0xff] %vm922_vm5, %v3569_v39 }
 0x4b3   : > { %3602 = vst.msk [vmem:[%s5608_s9 + $0xf8] sm:$0xff] %vm922_vm5, %v3570_v8 }
 0x4b4 PF: > { %s4522_s29 = sld [smem:[#allocation6 + $0x4]] }
 0x4ba   : > { %p4523_p9 = scmp.eq.s32.totalorder %s4522_s29, 0 }
 0x4bb   : > { %v3608_v62 = vlaneseq (!%p4523_p9)  ;;  %v9166_v58 = vld [vmem:[#allocation25_spill] sm:$0xff] (!%p4523_p9)  ;;  %v9167_v31 = vld [vmem:[#allocation26_spill] sm:$0xff] (!%p4523_p9)  ;;  %vm3885_vm0 = vcmask (!%p4523_p9), 1046528   ;;  %vm4032_vm1 = vcmask (!%p4523_p9), 1045504   ;;  %v9168_v54 = vld [vmem:[#allocation68_spill] sm:$0xff] (!%p4523_p9) }
 0x4bc   : > { %3607 = sbr.rel (%p4523_p9) target bundleno = 1316 (0x524), region = 144  ;;  %v3659_v2 = vmax.f32 (!%p4523_p9), %v9166_v58, -3.4028235e+38  ;;  %v3660_v4 = vmax.f32 (!%p4523_p9), %v9167_v31, -3.4028235e+38  ;;  %v9169_v23 = vld [vmem:[#allocation28_spill] sm:$0xff] (!%p4523_p9) }
 0x4bd   : > { %v3661_v28 = vmax.f32 (!%p4523_p9), %v9168_v54, -3.4028235e+38  ;;  %v3662_v26 = vmax.f32 (!%p4523_p9), %v9166_v58, %v9169_v23  ;;  %v9170_v40 = vld [vmem:[#allocation29_spill] sm:$0xff] (!%p4523_p9)  ;;  %v8128_v15 = vshrl.u32 (!%p4523_p9), %v3608_v62, 7  ;;  %v9172_v63 = vld [vmem:[#allocation27_spill] sm:$0xff] (!%p4523_p9)  ;;  %v9173_v45 = vld [vmem:[#allocation86_spill] sm:$0xff] (!%p4523_p9) }
 0x4be   : > { %v3663_v53 = vmax.f32 (!%p4523_p9), %v9167_v31, %v9170_v40  ;;  %v3755_v35 = vmax.f32 (!%p4523_p9), %v3659_v2, %v9169_v23  ;;  %v3756_v44 = vmax.f32 (!%p4523_p9), %v3660_v4, %v9170_v40  ;;  %v9171_v5 = vld [vmem:[#allocation69_spill] sm:$0xff] (!%p4523_p9)  ;;  %v9174_v30 = vld [vmem:[#allocation31_spill] sm:$0xff] (!%p4523_p9)  ;;  %v9175_v33 = vld [vmem:[#allocation32_spill] sm:$0xff] (!%p4523_p9) }
 0x4bf   : > { %v3664_v13 = vmax.f32 (!%p4523_p9), %v9172_v63, %v9171_v5  ;;  %v3757_v59 = vmax.f32 (!%p4523_p9), %v3661_v28, %v9173_v45  ;;  %v3758_v52 = vmax.f32 (!%p4523_p9), %v3662_v26, %v9174_v30  ;;  %v3665_v10 = vmax.f32 (!%p4523_p9), %v9169_v23, %v9174_v30  ;;  %v4209_v41 = vld [vmem:[%s5608_s9] sm:$0xff] (!%p4523_p9)  ;;  %v4210_v9 = vld [vmem:[%s5608_s9 + $0x8] sm:$0xff] (!%p4523_p9)  ;;  %v9177_v24 = vld [vmem:[#allocation34_spill] sm:$0xff] (!%p4523_p9) }
 0x4c0   : > { %v3759_v19 = vmax.f32 (!%p4523_p9), %v3663_v53, %v9175_v33  ;;  %vm3803_vm2 = vcmp.ge.s32.totalorder (!%p4523_p9), %v8128_v15, 1  ;;  %v3886_v36 = vrot.slane (!%p4523_p9), %v3755_v35, 1  ;;  %v3887_v34 = vrot.slane (!%p4523_p9), %v3756_v44, 1  ;;  %v9176_v61 = vld [vmem:[#allocation87_spill] sm:$0xff] (!%p4523_p9)  ;;  %v4211_v21 = vld [vmem:[%s5608_s9 + $0x10] sm:$0xff] (!%p4523_p9)  ;;  %v9179_v5 = vld [vmem:[#allocation70_spill] sm:$0xff] (!%p4523_p9) }
 0x4c1   : > { %v4033_v12 = vrot.slane (!%p4523_p9), %v3755_v35, 2  ;;  %v3805_v60 = vsel (!%p4523_p9), %vm3803_vm2, %v3755_v35, -3.4028235e+38  ;;  %v4034_v32 = vrot.slane (!%p4523_p9), %v3756_v44, 2  ;;  %v8143_v46 = vadd.s32 (!%p4523_p9), 8, %v8128_v15  ;;  %v9178_v8 = vld [vmem:[#allocation35_spill] sm:$0xff] (!%p4523_p9) }
 0x4c2   : > { %v3889_v43 = vrot.slane (!%p4523_p9), %v3757_v59, 1  ;;  %v3888_v11 = vsel (!%p4523_p9), %vm3885_vm0, %v3886_v36, %v3887_v34  ;;  %v4036_v56 = vrot.slane (!%p4523_p9), %v3757_v59, 2  ;;  %v3807_v0 = vsel (!%p4523_p9), %vm3803_vm2, %v3758_v52, -3.4028235e+38  ;;  %v9180_v63 = vld [vmem:[#allocation30_spill] sm:$0xff] (!%p4523_p9)  ;;  %v4238_v15 = vld [vmem:[%s5608_s9 + $0xe8] sm:$0xff] (!%p4523_p9) }
 0x4c3   : > { %v3891_v25 = vrot.slane %v3758_v52, 1  ;;  %v3998_v18 = vmax.f32 %v3805_v60, %v3888_v11  ;;  %v4035_v14 = vsel %vm4032_vm1, %v4033_v12, %v4034_v32  ;;  %vm4031_vm3 = vcmp.le.s32.totalorder %v8143_v46, 14  ;;  %v9182_v60 = vld [vmem:[#allocation37_spill] sm:$0xff] }
 0x4c4   : > { %v3890_v20 = vsel %vm3885_vm0, %v3887_v34, %v3889_v43  ;;  %v4037_v6 = vsel %vm4032_vm1, %v4034_v32, %v4036_v56  ;;  %v3892_v29 = vrot.slane %v3759_v19, 1  ;;  %v4038_v55 = vrot.slane %v3758_v52, 2  ;;  %v9181_v34 = vld [vmem:[#allocation88_spill] sm:$0xff]  ;;  %v9183_v43 = vld [vmem:[#allocation71_spill] sm:$0xff]  ;;  %v9184_v11 = vld [vmem:[#allocation33_spill] sm:$0xff] }
 0x4c5   : > { %v3999_v3 = vmax.f32 %v3756_v44, %v3890_v20  ;;  %v4177_v51 = vmax.f32 %v3998_v18, %v4035_v14  ;;  %v4146_v16 = vsel %vm4031_vm3, %v4037_v6, -3.4028235e+38  ;;  %v4039_v22 = vrot.slane %v3759_v19, 2  ;;  %v4212_v44 = vld [vmem:[%s5608_s9 + $0x18] sm:$0xff] }
 0x4c6   : > { %v3760_v38 = vmax.f32 %v3664_v13, %v9176_v61  ;;  %v3893_v17 = vsel %vm3885_vm0, %v3891_v25, %v3892_v29  ;;  %v3666_v27 = vmax.f32 %v9170_v40, %v9175_v33  ;;  %v3761_v7 = vmax.f32 %v3665_v10, %v9177_v24  ;;  %v9185_v25 = vld [vmem:[#allocation38_spill] sm:$0xff] }
 0x4c7   : > { %v4178_v50 = vmax.f32 %v3999_v3, %v4146_v16  ;;  %v4241_v1 = vadd.f32 %v4209_v41, %v4177_v51  ;;  %v4000_v37 = vmax.f32 %v3807_v0, %v3893_v17  ;;  %v4040_v57 = vsel %vm4032_vm1, %v4038_v55, %v4039_v22  ;;  %v4213_v0 = vld [vmem:[%s5608_s9 + $0x20] sm:$0xff] }
 0x4c8   : > { %v3894_v42 = vrot.slane %v3760_v38, 1  ;;  %v4041_v39 = vrot.slane %v3760_v38, 2  ;;  %v3762_v62 = vmax.f32 %v3666_v27, %v9178_v8  ;;  %v3809_v58 = vsel %vm3803_vm2, %v3761_v7, -3.4028235e+38  ;;  %v9186_v38 = vld [vmem:[#allocation89_spill] sm:$0xff] }
 0x4c9   : > { %v4242_v49 = vadd.f32 %v4210_v9, %v4178_v50  ;;  %4273 = vst.msk [vmem:[%s5608_s9] sm:$0xff] %vm922_vm5, %v4241_v1  ;;  %v4179_v2 = vmax.f32 %v4000_v37, %v4040_v57  ;;  %v3896_v4 = vrot.slane %v3761_v7, 1  ;;  %v4043_v54 = vrot.slane %v3761_v7, 2  ;;  %v4214_v1 = vld [vmem:[%s5608_s9 + $0x28] sm:$0xff] }
 0x4ca   : > { %v3895_v31 = vsel %vm3885_vm0, %v3892_v29, %v3894_v42  ;;  %v4042_v23 = vsel %vm4032_vm1, %v4039_v22, %v4041_v39  ;;  %v3897_v26 = vrot.slane %v3762_v62, 1  ;;  %v4044_v40 = vrot.slane %v3762_v62, 2 }
 0x4cb   : > { %4274 = vst.msk [vmem:[%s5608_s9 + $0x8] sm:$0xff] %vm922_vm5, %v4242_v49  ;;  %v4001_v28 = vmax.f32 %v3759_v19, %v3895_v31  ;;  %v4243_v53 = vadd.f32 %v4211_v21, %v4179_v2  ;;  %v4148_v35 = vsel %vm4031_vm3, %v4042_v23, -3.4028235e+38  ;;  %v3667_v13 = vmax.f32 %v9180_v63, %v9179_v5  ;;  %v9187_v49 = vld [vmem:[#allocation40_spill] sm:$0xff] }
 0x4cc   : > { %v3668_v45 = vmax.f32 %v9174_v30, %v9177_v24  ;;  %v3898_v52 = vsel %vm3885_vm0, %v3896_v4, %v3897_v26  ;;  %v4045_v19 = vsel %vm4032_vm1, %v4043_v54, %v4044_v40  ;;  %v3669_v10 = vmax.f32 %v9175_v33, %v9178_v8  ;;  %v9189_v2 = vld [vmem:[#allocation72_spill] sm:$0xff] }
 0x4cd   : > { %v4180_v59 = vmax.f32 %v4001_v28, %v4148_v35  ;;  %4275 = vst.msk [vmem:[%s5608_s9 + $0x10] sm:$0xff] %vm922_vm5, %v4243_v53  ;;  %v4002_v36 = vmax.f32 %v3809_v58, %v3898_v52  ;;  %v3763_v12 = vmax.f32 %v3667_v13, %v9181_v34  ;;  %v3670_v56 = vmax.f32 %v9184_v11, %v9183_v43  ;;  %v9188_v58 = vld [vmem:[#allocation41_spill] sm:$0xff]  ;;  %v9190_v31 = vld [vmem:[#allocation36_spill] sm:$0xff]  ;;  %v4216_v13 = vld [vmem:[%s5608_s9 + $0x38] sm:$0xff] }
 0x4ce   : > { %v3764_v32 = vmax.f32 %v3668_v45, %v9182_v60  ;;  %v3765_v18 = vmax.f32 %v3669_v10, %v9185_v25  ;;  %v3671_v14 = vmax.f32 %v9177_v24, %v9182_v60  ;;  %v3672_v33 = vmax.f32 %v9178_v8, %v9185_v25  ;;  %v4215_v8 = vld [vmem:[%s5608_s9 + $0x30] sm:$0xff]  ;;  %v9191_v10 = vld [vmem:[#allocation90_spill] sm:$0xff] }
 0x4cf   : > { %v4244_v30 = vadd.f32 %v4212_v44, %v4180_v59  ;;  %v4181_v20 = vmax.f32 %v4002_v36, %v4045_v19  ;;  %v3899_v41 = vrot.slane %v3763_v12, 1  ;;  %v4046_v3 = vrot.slane %v3763_v12, 2  ;;  %v9192_v12 = vld [vmem:[#allocation43_spill] sm:$0xff]  ;;  %v9193_v11 = vld [vmem:[#allocation73_spill] sm:$0xff] }
 0x4d0   : > { %v3811_v6 = vsel %vm3803_vm2, %v3764_v32, -3.4028235e+38  ;;  %v3901_v29 = vrot.slane %v3764_v32, 1  ;;  %v3902_v55 = vrot.slane %v3765_v18, 1  ;;  %v4048_v51 = vrot.slane %v3764_v32, 2 }
 0x4d1   : > { %4276 = vst.msk [vmem:[%s5608_s9 + $0x18] sm:$0xff] %vm922_vm5, %v4244_v30  ;;  %v4049_v16 = vrot.slane %v3765_v18, 2  ;;  %v4245_v9 = vadd.f32 %v4213_v0, %v4181_v20  ;;  %v3900_v22 = vsel %vm3885_vm0, %v3897_v26, %v3899_v41  ;;  %v4047_v61 = vsel %vm4032_vm1, %v4044_v40, %v4046_v3  ;;  %v9195_v41 = vld [vmem:[#allocation44_spill] sm:$0xff] }
 0x4d2   : > { %v3766_v50 = vmax.f32 %v3670_v56, %v9186_v38  ;;  %v4003_v17 = vmax.f32 %v3762_v62, %v3900_v22  ;;  %v4150_v27 = vsel %vm4031_vm3, %v4047_v61, -3.4028235e+38  ;;  %v3903_v24 = vsel %vm3885_vm0, %v3901_v29, %v3902_v55  ;;  %v9194_v56 = vld [vmem:[#allocation39_spill] sm:$0xff] }
 0x4d3   : > { %v4050_v7 = vsel %vm4032_vm1, %v4048_v51, %v4049_v16  ;;  %4277 = vst.msk [vmem:[%s5608_s9 + $0x20] sm:$0xff] %vm922_vm5, %v4245_v9  ;;  %v4004_v37 = vmax.f32 %v3811_v6, %v3903_v24  ;;  %v3767_v21 = vmax.f32 %v3671_v14, %v9187_v49  ;;  %v3768_v62 = vmax.f32 %v3672_v33, %v9188_v58  ;;  %v9196_v22 = vld [vmem:[#allocation91_spill] sm:$0xff] }
 0x4d4   : > { %v3904_v57 = vrot.slane %v3766_v50, 1  ;;  %v4051_v42 = vrot.slane %v3766_v50, 2  ;;  %v4182_v39 = vmax.f32 %v4003_v17, %v4150_v27  ;;  %v3673_v4 = vmax.f32 %v9190_v31, %v9189_v2 }
 0x4d5   : > { %v3674_v54 = vmax.f32 %v9182_v60, %v9187_v49  ;;  %v4183_v28 = vmax.f32 %v4004_v37, %v4050_v7  ;;  %v3813_v40 = vsel %vm3803_vm2, %v3767_v21, -3.4028235e+38  ;;  %v3906_v5 = vrot.slane %v3767_v21, 1  ;;  %v4218_v7 = vld [vmem:[%s5608_s9 + $0x48] sm:$0xff] }
 0x4d6   : > { %v3905_v23 = vsel %vm3885_vm0, %v3902_v55, %v3904_v57  ;;  %v4052_v26 = vsel %vm4032_vm1, %v4049_v16, %v4051_v42  ;;  %v4246_v53 = vadd.f32 %v4214_v1, %v4182_v39  ;;  %v3907_v45 = vrot.slane %v3768_v62, 1  ;;  %v9197_v39 = vld [vmem:[#allocation46_spill] sm:$0xff] }
 0x4d7   : > { %v4005_v35 = vmax.f32 %v3765_v18, %v3905_v23  ;;  %v4152_v44 = vsel %vm4031_vm3, %v4052_v26, -3.4028235e+38  ;;  %v4247_v63 = vadd.f32 %v4215_v8, %v4183_v28  ;;  %v4053_v59 = vrot.slane %v3767_v21, 2 }
 0x4d8   : > { %v4054_v52 = vrot.slane %v3768_v62, 2  ;;  %4278 = vst.msk [vmem:[%s5608_s9 + $0x28] sm:$0xff] %vm922_vm5, %v4246_v53  ;;  %v3769_v36 = vmax.f32 %v3673_v4, %v9191_v10  ;;  %v3675_v34 = vmax.f32 %v9185_v25, %v9188_v58  ;;  %v3770_v60 = vmax.f32 %v3674_v54, %v9192_v12  ;;  %v4217_v25 = vld [vmem:[%s5608_s9 + $0x40] sm:$0xff] }
 0x4d9   : > { %v4184_v19 = vmax.f32 %v4005_v35, %v4152_v44  ;;  %4279 = vst.msk [vmem:[%s5608_s9 + $0x30] sm:$0xff] %vm922_vm5, %v4247_v63  ;;  %v3908_v32 = vsel %vm3885_vm0, %v3906_v5, %v3907_v45  ;;  %v3676_v30 = vmax.f32 %v9194_v56, %v9193_v11  ;;  %v3677_v0 = vmax.f32 %v9187_v49, %v9192_v12  ;;  %v9198_v4 = vld [vmem:[#allocation47_spill] sm:$0xff]  ;;  %v4220_v35 = vld [vmem:[%s5608_s9 + $0x58] sm:$0xff] }
 0x4da   : > { %v4055_v43 = vsel %vm4032_vm1, %v4053_v59, %v4054_v52  ;;  %v4006_v14 = vmax.f32 %v3813_v40, %v3908_v32  ;;  %v3909_v33 = vrot.slane %v3769_v36, 1  ;;  %v4056_v20 = vrot.slane %v3769_v36, 2  ;;  %v9199_v59 = vld [vmem:[#allocation74_spill] sm:$0xff]  ;;  %v9201_v32 = vld [vmem:[#allocation75_spill] sm:$0xff] }
 0x4db   : > { %v4248_v18 = vadd.f32 %v4216_v13, %v4184_v19  ;;  %v3771_v3 = vmax.f32 %v3675_v34, %v9195_v41  ;;  %v3815_v6 = vsel %vm3803_vm2, %v3770_v60, -3.4028235e+38  ;;  %v3911_v29 = vrot.slane %v3770_v60, 1 }
 0x4dc   : > { %v4058_v55 = vrot.slane %v3770_v60, 2  ;;  %v4185_v51 = vmax.f32 %v4006_v14, %v4055_v43  ;;  %v3910_v16 = vsel %vm3885_vm0, %v3907_v45, %v3909_v33  ;;  %v4057_v9 = vsel %vm4032_vm1, %v4054_v52, %v4056_v20  ;;  %v9200_v52 = vld [vmem:[#allocation42_spill] sm:$0xff]  ;;  %v9202_v43 = vld [vmem:[#allocation45_spill] sm:$0xff]  ;;  %v4221_v33 = vld [vmem:[%s5608_s9 + $0x60] sm:$0xff] }
 0x4dd   : > { %4280 = vst.msk [vmem:[%s5608_s9 + $0x38] sm:$0xff] %vm922_vm5, %v4248_v18  ;;  %v3772_v61 = vmax.f32 %v3676_v30, %v9196_v22  ;;  %v4007_v38 = vmax.f32 %v3768_v62, %v3910_v16  ;;  %v4154_v50 = vsel %vm4031_vm3, %v4057_v9, -3.4028235e+38  ;;  %v3912_v17 = vrot.slane %v3771_v3, 1  ;;  %v9203_v18 = vld [vmem:[#allocation92_spill] sm:$0xff] }
 0x4de   : > { %v4059_v27 = vrot.slane %v3771_v3, 2  ;;  %v4249_v24 = vadd.f32 %v4217_v25, %v4185_v51  ;;  %v3678_v57 = vmax.f32 %v9188_v58, %v9195_v41  ;;  %v3773_v8 = vmax.f32 %v3677_v0, %v9197_v39  ;;  %v4219_v58 = vld [vmem:[%s5608_s9 + $0x50] sm:$0xff] }
 0x4df   : > { %v3914_v1 = vrot.slane %v3772_v61, 1  ;;  %v4061_v37 = vrot.slane %v3772_v61, 2  ;;  %v4186_v42 = vmax.f32 %v4007_v38, %v4154_v50  ;;  %v3913_v49 = vsel %vm3885_vm0, %v3911_v29, %v3912_v17  ;;  %v9204_v25 = vld [vmem:[#allocation93_spill] sm:$0xff] }
 0x4e0   : > { %v4060_v21 = vsel %vm4032_vm1, %v4058_v55, %v4059_v27  ;;  %4281 = vst.msk [vmem:[%s5608_s9 + $0x40] sm:$0xff] %vm922_vm5, %v4249_v24  ;;  %v4008_v62 = vmax.f32 %v3815_v6, %v3913_v49  ;;  %v3774_v54 = vmax.f32 %v3678_v57, %v9198_v4  ;;  %v3817_v40 = vsel %vm3803_vm2, %v3773_v8, -3.4028235e+38  ;;  %v4222_v57 = vld [vmem:[%s5608_s9 + $0x68] sm:$0xff] }
 0x4e1   : > { %v3915_v2 = vsel %vm3885_vm0, %v3912_v17, %v3914_v1  ;;  %v4062_v31 = vsel %vm4032_vm1, %v4059_v27, %v4061_v37  ;;  %v4250_v28 = vadd.f32 %v4218_v7, %v4186_v42  ;;  %v3916_v44 = vrot.slane %v3773_v8, 1 }
 0x4e2   : > { %v4009_v23 = vmax.f32 %v3771_v3, %v3915_v2  ;;  %v4156_v26 = vsel %vm4031_vm3, %v4062_v31, -3.4028235e+38  ;;  %v4187_v53 = vmax.f32 %v4008_v62, %v4060_v21  ;;  %v3917_v5 = vrot.slane %v3774_v54, 1  ;;  %v4223_v2 = vld [vmem:[%s5608_s9 + $0x70] sm:$0xff] }
 0x4e3   : > { %v4063_v63 = vrot.slane %v3773_v8, 2  ;;  %4282 = vst.msk [vmem:[%s5608_s9 + $0x48] sm:$0xff] %vm922_vm5, %v4250_v28  ;;  %v4064_v45 = vrot.slane %v3774_v54, 2  ;;  %v3679_v19 = vmax.f32 %v9200_v52, %v9199_v59  ;;  %v3680_v10 = vmax.f32 %v9192_v12, %v9197_v39  ;;  %v9207_v28 = vld [vmem:[#allocation76_spill] sm:$0xff] }
 0x4e4   : > { %v4188_v13 = vmax.f32 %v4009_v23, %v4156_v26  ;;  %v4251_v36 = vadd.f32 %v4219_v58, %v4187_v53  ;;  %v3918_v34 = vsel %vm3885_vm0, %v3916_v44, %v3917_v5  ;;  %v3681_v60 = vmax.f32 %v9195_v41, %v9198_v4  ;;  %v9208_v58 = vld [vmem:[#allocation48_spill] sm:$0xff] }
 0x4e5   : > { %v3682_v11 = vmax.f32 %v9202_v43, %v9201_v32  ;;  %v4010_v30 = vmax.f32 %v3817_v40, %v3918_v34  ;;  %v4065_v0 = vsel %vm4032_vm1, %v4063_v63, %v4064_v45  ;;  %v3775_v14 = vmax.f32 %v3679_v19, %v9203_v18  ;;  %v4224_v63 = vld [vmem:[%s5608_s9 + $0x78] sm:$0xff]  ;;  %v9211_v18 = vld [vmem:[#allocation49_spill] sm:$0xff] }
 0x4e6   : > { %v4252_v56 = vadd.f32 %v4220_v35, %v4188_v13  ;;  %4283 = vst.msk [vmem:[%s5608_s9 + $0x50] sm:$0xff] %vm922_vm5, %v4251_v36  ;;  %v3776_v12 = vmax.f32 %v3680_v10, %v6273_v47  ;;  %v3777_v20 = vmax.f32 %v3681_v60, %v6275_v48  ;;  %v3683_v41 = vmax.f32 %v9197_v39, %v6273_v47  ;;  %v9205_v39 = vld [vmem:[#allocation50_spill] sm:$0xff] }
 0x4e7   : > { %v3778_v3 = vmax.f32 %v3682_v11, %v9204_v25  ;;  %v4189_v6 = vmax.f32 %v4010_v30, %v4065_v0  ;;  %v3919_v29 = vrot.slane %v3775_v14, 1  ;;  %v4066_v55 = vrot.slane %v3775_v14, 2  ;;  %v9209_v34 = vld [vmem:[#allocation94_spill] sm:$0xff]  ;;  %v9210_v0 = vld [vmem:[#allocation77_spill] sm:$0xff] }
 0x4e8   : > { %4284 = vst.msk [vmem:[%s5608_s9 + $0x58] sm:$0xff] %vm922_vm5, %v4252_v56  ;;  %v3684_v51 = vmax.f32 %v9198_v4, %v6275_v48  ;;  %v3819_v16 = vsel %vm3803_vm2, %v3776_v12, -3.4028235e+38  ;;  %v3921_v9 = vrot.slane %v3776_v12, 1  ;;  %v3922_v22 = vrot.slane %v3777_v20, 1  ;;  %v9206_v4 = vld [vmem:[#allocation51_spill] sm:$0xff] }
 0x4e9   : > { %v4068_v61 = vrot.slane %v3776_v12, 2  ;;  %v4253_v38 = vadd.f32 %v4221_v33, %v4189_v6  ;;  %v3920_v50 = vsel %vm3885_vm0, %v3917_v5, %v3919_v29  ;;  %v4067_v17 = vsel %vm4032_vm1, %v4064_v45, %v4066_v55  ;;  %v4225_v33 = vld [vmem:[%s5608_s9 + $0x80] sm:$0xff]  ;;  %v9212_v25 = vld [vmem:[#allocation53_spill] sm:$0xff] }
 0x4ea   : > { %v4069_v27 = vrot.slane %v3777_v20, 2  ;;  %v4011_v24 = vmax.f32 %v3774_v54, %v3920_v50  ;;  %v4158_v7 = vsel %vm4031_vm3, %v4067_v17, -3.4028235e+38  ;;  %v3923_v1 = vsel %vm3885_vm0, %v3921_v9, %v3922_v22  ;;  %v9214_v6 = vld [vmem:[#allocation95_spill] sm:$0xff] }
 0x4eb   : > { %v3924_v37 = vrot.slane %v3778_v3, 1  ;;  %4285 = vst.msk [vmem:[%s5608_s9 + $0x60] sm:$0xff] %vm922_vm5, %v4253_v38  ;;  %v4012_v42 = vmax.f32 %v3819_v16, %v3923_v1  ;;  %v4071_v21 = vrot.slane %v3778_v3, 2  ;;  %v3779_v8 = vmax.f32 %v3683_v41, %v9205_v39  ;;  %v9213_v41 = vld [vmem:[#allocation54_spill] sm:$0xff] }
 0x4ec   : > { %v4070_v49 = vsel %vm4032_vm1, %v4068_v61, %v4069_v27  ;;  %v4190_v62 = vmax.f32 %v4011_v24, %v4158_v7  ;;  %v3780_v54 = vmax.f32 %v3684_v51, %v9206_v4  ;;  %v3685_v23 = vmax.f32 %v9208_v58, %v9207_v28  ;;  %v4226_v24 = vld [vmem:[%s5608_s9 + $0x88] sm:$0xff]  ;;  %v4227_v58 = vld [vmem:[%s5608_s9 + $0x90] sm:$0xff] }
 0x4ed   : > { %v3925_v31 = vsel %vm3885_vm0, %v3922_v22, %v3924_v37  ;;  %v4191_v26 = vmax.f32 %v4012_v42, %v4070_v49  ;;  %v4072_v53 = vsel %vm4032_vm1, %v4069_v27, %v4071_v21  ;;  %v3821_v35 = vsel %vm3803_vm2, %v3779_v8, -3.4028235e+38  ;;  %v9215_v21 = vld [vmem:[#allocation56_spill] sm:$0xff] }
 0x4ee   : > { %v4013_v40 = vmax.f32 %v3777_v20, %v3925_v31  ;;  %v4254_v44 = vadd.f32 %v4222_v57, %v4190_v62  ;;  %v4160_v5 = vsel %vm4031_vm3, %v4072_v53, -3.4028235e+38  ;;  %v3926_v13 = vrot.slane %v3779_v8, 1 }
 0x4ef   : > { %v3927_v45 = vrot.slane %v3780_v54, 1  ;;  %v4255_v59 = vadd.f32 %v4223_v2, %v4191_v26  ;;  %v4073_v19 = vrot.slane %v3779_v8, 2  ;;  %v4074_v10 = vrot.slane %v3780_v54, 2  ;;  %v9216_v8 = vld [vmem:[#allocation57_spill] sm:$0xff] }
 0x4f0   : > { %v4192_v52 = vmax.f32 %v4013_v40, %v4160_v5  ;;  %4286 = vst.msk [vmem:[%s5608_s9 + $0x68] sm:$0xff] %vm922_vm5, %v4254_v44  ;;  %v3781_v60 = vmax.f32 %v3685_v23, %v9209_v34  ;;  %v3686_v32 = vmax.f32 %v6273_v47, %v9205_v39  ;;  %v3687_v43 = vmax.f32 %v6275_v48, %v9206_v4 }
 0x4f1   : > { %v3928_v36 = vsel %vm3885_vm0, %v3926_v13, %v3927_v45  ;;  %4287 = vst.msk [vmem:[%s5608_s9 + $0x70] sm:$0xff] %vm922_vm5, %v4255_v59  ;;  %v4075_v30 = vsel %vm4032_vm1, %v4073_v19, %v4074_v10  ;;  %v3688_v14 = vmax.f32 %v9211_v18, %v9210_v0  ;;  %v3689_v55 = vmax.f32 %v9205_v39, %v9212_v25  ;;  %v9217_v59 = vld [vmem:[#allocation78_spill] sm:$0xff]  ;;  %v9221_v18 = vld [vmem:[#allocation96_spill] sm:$0xff] }
 0x4f2   : > { %v4256_v11 = vadd.f32 %v4224_v63, %v4192_v52  ;;  %v4014_v56 = vmax.f32 %v3821_v35, %v3928_v36  ;;  %v3929_v12 = vrot.slane %v3781_v60, 1  ;;  %v4076_v20 = vrot.slane %v3781_v60, 2  ;;  %v4228_v35 = vld [vmem:[%s5608_s9 + $0x98] sm:$0xff]  ;;  %v9218_v52 = vld [vmem:[#allocation52_spill] sm:$0xff] }
 0x4f3   : > { %v3782_v3 = vmax.f32 %v3686_v32, %v9212_v25  ;;  %v3783_v47 = vmax.f32 %v3687_v43, %v9213_v41  ;;  %v3784_v29 = vmax.f32 %v3688_v14, %v9214_v6  ;;  %v3690_v51 = vmax.f32 %v9206_v4, %v9213_v41  ;;  %v9219_v32 = vld [vmem:[#allocation79_spill] sm:$0xff] }
 0x4f4   : > { %4288 = vst.msk [vmem:[%s5608_s9 + $0x78] sm:$0xff] %vm922_vm5, %v4256_v11  ;;  %v4193_v48 = vmax.f32 %v4014_v56, %v4075_v30  ;;  %v3930_v16 = vsel %vm3885_vm0, %v3927_v45, %v3929_v12  ;;  %v4077_v9 = vsel %vm4032_vm1, %v4074_v10, %v4076_v20  ;;  %v3785_v39 = vmax.f32 %v3689_v55, %v9215_v21  ;;  %v9220_v43 = vld [vmem:[#allocation55_spill] sm:$0xff] }
 0x4f5   : > { %v3823_v22 = vsel %vm3803_vm2, %v3782_v3, -3.4028235e+38  ;;  %v3931_v61 = vrot.slane %v3782_v3, 1  ;;  %v4015_v50 = vmax.f32 %v3780_v54, %v3930_v16  ;;  %v4162_v17 = vsel %vm4031_vm3, %v4077_v9, -3.4028235e+38  ;;  %v9222_v12 = vld [vmem:[#allocation59_spill] sm:$0xff] }
 0x4f6   : > { %v4257_v38 = vadd.f32 %v4225_v33, %v4193_v48  ;;  %v3932_v27 = vrot.slane %v3783_v47, 1  ;;  %v4078_v7 = vrot.slane %v3782_v3, 2  ;;  %v4079_v1 = vrot.slane %v3783_v47, 2  ;;  %v4229_v33 = vld [vmem:[%s5608_s9 + $0xa0] sm:$0xff] }
 0x4f7   : > { %v3934_v37 = vrot.slane %v3784_v29, 1  ;;  %v4081_v57 = vrot.slane %v3784_v29, 2  ;;  %v4194_v42 = vmax.f32 %v4015_v50, %v4162_v17  ;;  %v3786_v62 = vmax.f32 %v3690_v51, %v9216_v8 }
 0x4f8   : > { %4289 = vst.msk [vmem:[%s5608_s9 + $0x80] sm:$0xff] %vm922_vm5, %v4257_v38  ;;  %v3933_v49 = vsel %vm3885_vm0, %v3931_v61, %v3932_v27  ;;  %v4080_v31 = vsel %vm4032_vm1, %v4078_v7, %v4079_v1  ;;  %v3825_v40 = vsel %vm3803_vm2, %v3785_v39, -3.4028235e+38  ;;  %v3936_v44 = vrot.slane %v3785_v39, 1 }
 0x4f9   : > { %v4016_v2 = vmax.f32 %v3823_v22, %v3933_v49  ;;  %v3935_v4 = vsel %vm3885_vm0, %v3932_v27, %v3934_v37  ;;  %v4082_v54 = vsel %vm4032_vm1, %v4079_v1, %v4081_v57  ;;  %v4258_v28 = vadd.f32 %v4226_v24, %v4194_v42  ;;  %v4230_v57 = vld [vmem:[%s5608_s9 + $0xa8] sm:$0xff] }
 0x4fa   : > { %v4017_v23 = vmax.f32 %v3783_v47, %v3935_v4  ;;  %v4164_v26 = vsel %vm4031_vm3, %v4082_v54, -3.4028235e+38  ;;  %v3937_v5 = vrot.slane %v3786_v62, 1  ;;  %v4083_v63 = vrot.slane %v3785_v39, 2  ;;  %v9224_v47 = vld [vmem:[#allocation97_spill] sm:$0xff]  ;;  %v9225_v39 = vld [vmem:[#allocation62_spill] sm:$0xff] }
 0x4fb   : > { %v4195_v53 = vmax.f32 %v4016_v2, %v4080_v31  ;;  %4290 = vst.msk [vmem:[%s5608_s9 + $0x88] sm:$0xff] %vm922_vm5, %v4258_v28  ;;  %v4084_v45 = vrot.slane %v3786_v62, 2  ;;  %v3691_v19 = vmax.f32 %v9218_v52, %v9217_v59  ;;  %v3692_v10 = vmax.f32 %v9212_v25, %v9215_v21  ;;  %v9223_v25 = vld [vmem:[#allocation60_spill] sm:$0xff]  ;;  %v4231_v31 = vld [vmem:[%s5608_s9 + $0xb0] sm:$0xff]  ;;  %v9226_v4 = vld [vmem:[#allocation63_spill] sm:$0xff] }
 0x4fc   : > { %v4196_v13 = vmax.f32 %v4017_v23, %v4164_v26  ;;  %v3938_v34 = vsel %vm3885_vm0, %v3936_v44, %v3937_v5  ;;  %v3693_v60 = vmax.f32 %v9213_v41, %v9216_v8  ;;  %v3694_v11 = vmax.f32 %v9220_v43, %v9219_v32  ;;  %v9227_v28 = vld [vmem:[#allocation80_spill] sm:$0xff] }
 0x4fd   : > { %v4259_v36 = vadd.f32 %v4227_v58, %v4195_v53  ;;  %v4018_v30 = vmax.f32 %v3825_v40, %v3938_v34  ;;  %v4085_v0 = vsel %vm4032_vm1, %v4083_v63, %v4084_v45  ;;  %v3787_v14 = vmax.f32 %v3691_v19, %v9221_v18  ;;  %v9228_v58 = vld [vmem:[#allocation58_spill] sm:$0xff]  ;;  %v9231_v18 = vld [vmem:[#allocation61_spill] sm:$0xff] }
 0x4fe   : > { %v4260_v56 = vadd.f32 %v4228_v35, %v4196_v13  ;;  %v3788_v20 = vmax.f32 %v3692_v10, %v9222_v12  ;;  %v3789_v3 = vmax.f32 %v3693_v60, %v9223_v25  ;;  %v3790_v48 = vmax.f32 %v3694_v11, %v9224_v47  ;;  %v4232_v63 = vld [vmem:[%s5608_s9 + $0xb8] sm:$0xff]  ;;  %v9232_v47 = vld [vmem:[#allocation65_spill] sm:$0xff] }
 0x4ff   : > { %4291 = vst.msk [vmem:[%s5608_s9 + $0x90] sm:$0xff] %vm922_vm5, %v4259_v36  ;;  %v3695_v41 = vmax.f32 %v9215_v21, %v9222_v12  ;;  %v4197_v6 = vmax.f32 %v4018_v30, %v4085_v0  ;;  %v3939_v29 = vrot.slane %v3787_v14, 1  ;;  %v4086_v55 = vrot.slane %v3787_v14, 2  ;;  %v9229_v34 = vld [vmem:[#allocation98_spill] sm:$0xff]  ;;  %v9230_v0 = vld [vmem:[#allocation81_spill] sm:$0xff] }
 0x500   : > { %4292 = vst.msk [vmem:[%s5608_s9 + $0x98] sm:$0xff] %vm922_vm5, %v4260_v56  ;;  %v3696_v51 = vmax.f32 %v9216_v8, %v9223_v25  ;;  %v3827_v16 = vsel %vm3803_vm2, %v3788_v20, -3.4028235e+38  ;;  %v3941_v9 = vrot.slane %v3788_v20, 1  ;;  %v3942_v22 = vrot.slane %v3789_v3, 1 }
 0x501   : > { %v4088_v61 = vrot.slane %v3788_v20, 2  ;;  %v4261_v38 = vadd.f32 %v4229_v33, %v4197_v6  ;;  %v3940_v50 = vsel %vm3885_vm0, %v3937_v5, %v3939_v29  ;;  %v4087_v17 = vsel %vm4032_vm1, %v4084_v45, %v4086_v55  ;;  %v4233_v33 = vld [vmem:[%s5608_s9 + $0xc0] sm:$0xff] }
 0x502   : > { %v4089_v27 = vrot.slane %v3789_v3, 2  ;;  %v4019_v24 = vmax.f32 %v3786_v62, %v3940_v50  ;;  %v4166_v7 = vsel %vm4031_vm3, %v4087_v17, -3.4028235e+38  ;;  %v3943_v1 = vsel %vm3885_vm0, %v3941_v9, %v3942_v22  ;;  %v9234_v6 = vld [vmem:[#allocation99_spill] sm:$0xff] }
 0x503   : > { %v3944_v37 = vrot.slane %v3790_v48, 1  ;;  %4293 = vst.msk [vmem:[%s5608_s9 + $0xa0] sm:$0xff] %vm922_vm5, %v4261_v38  ;;  %v4020_v42 = vmax.f32 %v3827_v16, %v3943_v1  ;;  %v4091_v21 = vrot.slane %v3790_v48, 2  ;;  %v3791_v8 = vmax.f32 %v3695_v41, %v9225_v39  ;;  %v9233_v41 = vld [vmem:[#allocation66_spill] sm:$0xff] }
 0x504   : > { %v4090_v49 = vsel %vm4032_vm1, %v4088_v61, %v4089_v27  ;;  %v4198_v2 = vmax.f32 %v4019_v24, %v4166_v7  ;;  %v3792_v54 = vmax.f32 %v3696_v51, %v9226_v4  ;;  %v3697_v23 = vmax.f32 %v9228_v58, %v9227_v28  ;;  %v4234_v24 = vld [vmem:[%s5608_s9 + $0xc8] sm:$0xff]  ;;  %v4235_v58 = vld [vmem:[%s5608_s9 + $0xd0] sm:$0xff] }
 0x505   : > { %v3945_v62 = vsel %vm3885_vm0, %v3942_v22, %v3944_v37  ;;  %v4199_v26 = vmax.f32 %v4020_v42, %v4090_v49  ;;  %v4092_v53 = vsel %vm4032_vm1, %v4089_v27, %v4091_v21  ;;  %v3829_v35 = vsel %vm3803_vm2, %v3791_v8, -3.4028235e+38  ;;  %v9235_v21 = vld [vmem:[#allocation83_spill] sm:$0xff] }
 0x506   : > { %v4021_v40 = vmax.f32 %v3789_v3, %v3945_v62  ;;  %v4262_v44 = vadd.f32 %v4230_v57, %v4198_v2  ;;  %v4168_v5 = vsel %vm4031_vm3, %v4092_v53, -3.4028235e+38  ;;  %v3946_v13 = vrot.slane %v3791_v8, 1 }
 0x507   : > { %v3947_v45 = vrot.slane %v3792_v54, 1  ;;  %v4263_v59 = vadd.f32 %v4231_v31, %v4199_v26  ;;  %v4093_v19 = vrot.slane %v3791_v8, 2  ;;  %v4094_v10 = vrot.slane %v3792_v54, 2  ;;  %v9236_v8 = vld [vmem:[#allocation84_spill] sm:$0xff] }
 0x508   : > { %v4200_v52 = vmax.f32 %v4021_v40, %v4168_v5  ;;  %4294 = vst.msk [vmem:[%s5608_s9 + $0xa8] sm:$0xff] %vm922_vm5, %v4262_v44  ;;  %v3793_v60 = vmax.f32 %v3697_v23, %v9229_v34  ;;  %v3698_v32 = vmax.f32 %v9222_v12, %v9225_v39  ;;  %v3699_v43 = vmax.f32 %v9223_v25, %v9226_v4 }
 0x509   : > { %v3948_v36 = vsel %vm3885_vm0, %v3946_v13, %v3947_v45  ;;  %4295 = vst.msk [vmem:[%s5608_s9 + $0xb0] sm:$0xff] %vm922_vm5, %v4263_v59  ;;  %v4095_v30 = vsel %vm4032_vm1, %v4093_v19, %v4094_v10  ;;  %v3700_v14 = vmax.f32 %v9231_v18, %v9230_v0  ;;  %v3701_v55 = vmax.f32 %v9225_v39, %v9232_v47  ;;  %v9237_v59 = vld [vmem:[#allocation82_spill] sm:$0xff]  ;;  %v4237_v18 = vld [vmem:[%s5608_s9 + $0xe0] sm:$0xff] }
 0x50a   : > { %v4264_v11 = vadd.f32 %v4232_v63, %v4200_v52  ;;  %v4022_v56 = vmax.f32 %v3829_v35, %v3948_v36  ;;  %v3949_v20 = vrot.slane %v3793_v60, 1  ;;  %v4096_v3 = vrot.slane %v3793_v60, 2  ;;  %v4236_v35 = vld [vmem:[%s5608_s9 + $0xd8] sm:$0xff]  ;;  %v9238_v52 = vld [vmem:[#allocation64_spill] sm:$0xff] }
 0x50b   : > { %v3794_v48 = vmax.f32 %v3698_v32, %v9232_v47  ;;  %v3795_v12 = vmax.f32 %v3699_v43, %v9233_v41  ;;  %v3796_v29 = vmax.f32 %v3700_v14, %v9234_v6  ;;  %v3702_v51 = vmax.f32 %v9226_v4, %v9233_v41  ;;  %v9239_v32 = vld [vmem:[#allocation85_spill] sm:$0xff]  ;;  %v9240_v43 = vld [vmem:[#allocation67_spill] sm:$0xff]  ;;  %v9241_v14 = vld [vmem:[#allocation100_spill] sm:$0xff] }
 0x50c   : > { %4296 = vst.msk [vmem:[%s5608_s9 + $0xb8] sm:$0xff] %vm922_vm5, %v4264_v11  ;;  %v4201_v25 = vmax.f32 %v4022_v56, %v4095_v30  ;;  %v3950_v16 = vsel %vm3885_vm0, %v3947_v45, %v3949_v20  ;;  %v4097_v9 = vsel %vm4032_vm1, %v4094_v10, %v4096_v3  ;;  %v3797_v39 = vmax.f32 %v3701_v55, %v9235_v21 }
 0x50d   : > { %v3831_v22 = vsel %vm3803_vm2, %v3794_v48, -3.4028235e+38  ;;  %v3951_v61 = vrot.slane %v3794_v48, 1  ;;  %v4023_v50 = vmax.f32 %v3792_v54, %v3950_v16  ;;  %v4170_v17 = vsel %vm4031_vm3, %v4097_v9, -3.4028235e+38 }
 0x50e   : > { %v4265_v38 = vadd.f32 %v4233_v33, %v4201_v25  ;;  %v3952_v27 = vrot.slane %v3795_v12, 1  ;;  %v4098_v7 = vrot.slane %v3794_v48, 2  ;;  %v4099_v1 = vrot.slane %v3795_v12, 2 }
 0x50f   : > { %v3954_v37 = vrot.slane %v3796_v29, 1  ;;  %v4101_v57 = vrot.slane %v3796_v29, 2  ;;  %v4202_v42 = vmax.f32 %v4023_v50, %v4170_v17  ;;  %v3798_v2 = vmax.f32 %v3702_v51, %v9236_v8 }
 0x510   : > { %4297 = vst.msk [vmem:[%s5608_s9 + $0xc0] sm:$0xff] %vm922_vm5, %v4265_v38  ;;  %v3953_v49 = vsel %vm3885_vm0, %v3951_v61, %v3952_v27  ;;  %v4100_v62 = vsel %vm4032_vm1, %v4098_v7, %v4099_v1  ;;  %v3833_v40 = vsel %vm3803_vm2, %v3797_v39, -3.4028235e+38  ;;  %v3956_v44 = vrot.slane %v3797_v39, 1 }
 0x511   : > { %v4024_v31 = vmax.f32 %v3831_v22, %v3953_v49  ;;  %v3955_v4 = vsel %vm3885_vm0, %v3952_v27, %v3954_v37  ;;  %v4102_v54 = vsel %vm4032_vm1, %v4099_v1, %v4101_v57  ;;  %v4266_v28 = vadd.f32 %v4234_v24, %v4202_v42  ;;  %v4239_v37 = vld [vmem:[%s5608_s9 + $0xf0] sm:$0xff] }
 0x512   : > { %v4025_v23 = vmax.f32 %v3795_v12, %v3955_v4  ;;  %v4172_v26 = vsel %vm4031_vm3, %v4102_v54, -3.4028235e+38  ;;  %v3957_v5 = vrot.slane %v3798_v2, 1  ;;  %v4103_v63 = vrot.slane %v3797_v39, 2 }
 0x513   : > { %v4203_v53 = vmax.f32 %v4024_v31, %v4100_v62  ;;  %4298 = vst.msk [vmem:[%s5608_s9 + $0xc8] sm:$0xff] %vm922_vm5, %v4266_v28  ;;  %v4104_v45 = vrot.slane %v3798_v2, 2  ;;  %v3703_v19 = vmax.f32 %v9238_v52, %v9237_v59  ;;  %v3704_v10 = vmax.f32 %v9232_v47, %v9235_v21 }
 0x514   : > { %v4204_v13 = vmax.f32 %v4025_v23, %v4172_v26  ;;  %v3958_v34 = vsel %vm3885_vm0, %v3956_v44, %v3957_v5  ;;  %v3705_v60 = vmax.f32 %v9233_v41, %v9236_v8  ;;  %v3706_v11 = vmax.f32 %v9240_v43, %v9239_v32 }
 0x515   : > { %v4267_v36 = vadd.f32 %v4235_v58, %v4203_v53  ;;  %v4026_v30 = vmax.f32 %v3833_v40, %v3958_v34  ;;  %v4105_v0 = vsel %vm4032_vm1, %v4103_v63, %v4104_v45  ;;  %v3799_v33 = vmax.f32 %v3703_v19, %v9241_v14 }
 0x516   : > { %v4268_v56 = vadd.f32 %v4236_v35, %v4204_v13  ;;  %v3800_v20 = vmax.f32 %v3704_v10, -3.4028235e+38  ;;  %v3801_v3 = vmax.f32 %v3705_v60, -3.4028235e+38  ;;  %v3802_v47 = vmax.f32 %v3706_v11, -3.4028235e+38 }
 0x517   : > { %4299 = vst.msk [vmem:[%s5608_s9 + $0xd0] sm:$0xff] %vm922_vm5, %v4267_v36  ;;  %v4205_v48 = vmax.f32 %v4026_v30, %v4105_v0  ;;  %v3959_v41 = vrot.slane %v3799_v33, 1  ;;  %v4106_v12 = vrot.slane %v3799_v33, 2 }
 0x518   : > { %4300 = vst.msk [vmem:[%s5608_s9 + $0xd8] sm:$0xff] %vm922_vm5, %v4268_v56  ;;  %v3835_v25 = vsel %vm3803_vm2, %v3800_v20, -3.4028235e+38  ;;  %v3961_v6 = vrot.slane %v3800_v20, 1  ;;  %v3962_v29 = vrot.slane %v3801_v3, 1  ;;  %v4108_v55 = vrot.slane %v3800_v20, 2 }
 0x519   : > { %v4269_v51 = vadd.f32 %v4237_v18, %v4205_v48  ;;  %v3960_v16 = vsel %vm3885_vm0, %v3957_v5, %v3959_v41  ;;  %v4107_v9 = vsel %vm4032_vm1, %v4104_v45, %v4106_v12  ;;  %v4109_v22 = vrot.slane %v3801_v3, 2 }
 0x51a   : > { %v4027_v61 = vmax.f32 %v3798_v2, %v3960_v16  ;;  %v4174_v38 = vsel %vm4031_vm3, %v4107_v9, -3.4028235e+38  ;;  %v3963_v50 = vsel %vm3885_vm0, %v3961_v6, %v3962_v29  ;;  %v3964_v17 = vrot.slane %v3802_v47, 1  ;;  %v4240_v2 = vld [vmem:[%s5608_s9 + $0xf8] sm:$0xff] }
 0x51b   : > { %4301 = vst.msk [vmem:[%s5608_s9 + $0xe0] sm:$0xff] %vm922_vm5, %v4269_v51  ;;  %v4028_v27 = vmax.f32 %v3835_v25, %v3963_v50  ;;  %v4110_v24 = vsel %vm4032_vm1, %v4108_v55, %v4109_v22  ;;  %v4111_v7 = vrot.slane %v3802_v47, 2 }
 0x51c   : > { %v4206_v1 = vmax.f32 %v4027_v61, %v4174_v38  ;;  %v3965_v57 = vsel %vm3885_vm0, %v3962_v29, %v3964_v17 }
 0x51d   : > { %v4207_v42 = vmax.f32 %v4028_v27, %v4110_v24  ;;  %v4029_v49 = vmax.f32 %v3801_v3, %v3965_v57  ;;  %v4112_v21 = vsel %vm4032_vm1, %v4109_v22, %v4111_v7 }
 0x51e   : > { %v4270_v39 = vadd.f32 %v4238_v15, %v4206_v1  ;;  %v4176_v8 = vsel %vm4031_vm3, %v4112_v21, -3.4028235e+38 }
 0x51f   : > { %v4271_v31 = vadd.f32 %v4239_v37, %v4207_v42  ;;  %v4208_v62 = vmax.f32 %v4029_v49, %v4176_v8 }
 0x520   : > { %4302 = vst.msk [vmem:[%s5608_s9 + $0xe8] sm:$0xff] %vm922_vm5, %v4270_v39 }
 0x521   : > { %4303 = vst.msk [vmem:[%s5608_s9 + $0xf0] sm:$0xff] %vm922_vm5, %v4271_v31  ;;  %v4272_v4 = vadd.f32 %v4240_v2, %v4208_v62 }
 0x523   : > { %4304 = vst.msk [vmem:[%s5608_s9 + $0xf8] sm:$0xff] %vm922_vm5, %v4272_v4 }
 0x524 PF: > { %s4532_s11 = sshll.u32 %s5485_s19, 12  ;;  %s4319_s12 = sshll.u32 %s5608_s9, 4  ;;  %s8497_s12 = int_to_ptr.vmem [resolvable:$true] %s4319_s12 }
 0x525   : > { %s8494_s30 = scalar_lea.hbm %s8545_s4, %s4532_s11  ;;  %s4306_s8 = scalar_lea.sflag [#allocation8], %s5596_s6 }
 0x526   : > { %s5346_s26 = scalar_lea.vmem %s8497_s12, 4096  ;;  %p9242_p2 = scmp.ne.s32.totalorder %s8783_s27, 0 }
 0x527   : > { %p5347_p10 = scmp.ne.s32.totalorder %s8497_s12, %s5346_s26  ;;  %s5436_s13 = smov [#allocation11]  }
 0x528   : > { %s5350_s14 = sshll.u32 %s5436_s13, 4  ;;  %s5351_s14 = int_to_ptr.vmem [resolvable:$false] %s5350_s14 }
 0x529   : > { %p5348_p4 = pnand %p5347_p10, %p9242_p2  ;;  %s5352_s19 = scalar_lea.vmem %s5351_s14, 8192 }
 0x52a   : > { %p5353_p1 = scmp.lt.s32.totalorder %s8497_s12, %s5351_s14  ;;  %p5354_p0 = scmp.lt.s32.totalorder %s5352_s19, %s5346_s26 }
 0x52b   : > { %p5349_p11 = pneg %p5348_p4 }
 0x52c   : > { %p5355_p7 = por %p5354_p0, %p5353_p1 }
 0x52e   : > { %p5356_p5 = pnand %p5355_p7, %p5349_p11 }
 0x530   : > { %5359 = shalt.err (!%p5356_p5)
}
 0x531   : > { %s5360_s9 = scalar_lea.hbm %s8494_s30, 4096  ;;  %s5364_s5 = scalar_lea.hbm %s8545_s4, 8192 }
 0x532   : > { %p5361_p12 = scmp.ne.s32.totalorder %s8494_s30, %s5360_s9  ;;  %p5365_p8 = scmp.lt.u32.totalorder %s8494_s30, %s8545_s4 }
 0x533   : > { %p5366_p3 = scmp.lt.u32.totalorder %s5364_s5, %s5360_s9  ;;  %p5368_p10 = scmp.lt.u32.totalorder %s5360_s9, %s8494_s30 }
 0x534   : > { %p5362_p6 = pnand %p5361_p12, %p9242_p2 }
 0x535   : > { %p5367_p9 = por %p5366_p3, %p5365_p8 }
 0x536   : > { %p5363_p13 = pneg %p5362_p6 }
 0x537   : > { %p5369_p4 = por %p5368_p10, %p5367_p9 }
 0x539   : > { %p5370_p11 = pnand %p5369_p4, %p5363_p13 }
 0x53b   : > { %5373 = shalt.err (!%p5370_p11)
}
 0x53c   : > { %s5437_s29 = smov 128   ;;  %s5438_s11 = smov 8  }
 0x53d   : > { %4676 = dma.vmem_to_hbm [thread:$0]  (%p9242_p2), %s8497_s12, 4096, %s8494_s30, %s4306_s8, %s5437_s29, %s5437_s29, %s5438_s11  }
 0x53e PF: > { %s4334_s20 = sand.u32 1, %s5408_s15   ;;  %p9243_p1 = scmp.ne.s32.totalorder %s8784_s28, 0 }
 0x53f   : > { %p9244_p0 = scmp.ge.s32.totalorder %s5420_s18, 2  ;;  %s4335_s25 = scalar_lea.sflag [#allocation8], %s4334_s20 }
 0x541   : > { %p4687_p7 = pnand %p9244_p0, %p9243_p1 }
 0x543   : > { %5403 = dma.done.wait (!%p4687_p7), %s4335_s25, 4096  }
 0x544   : > { %5405 = vsyncadd (!%p4687_p7), %s4335_s25, 4294963200  ;;  %p18_p5 = scmp.ge.s32.totalorder %s5489_s21, 4   ;;  %s9245_s15 = smov %s5412_s16 }
 0x545   : > { %s9246_s16 = smov %s5416_s17  ;;  %s9247_s17 = smov %s5501_s24 }
 0x546   : > { %s9248_s18 = smov %s5489_s21  ;;  %20 = sbr.rel (!%p18_p5) target bundleno = 6 (0x6), region = 206 }
 0x54d   :  { %4340 = vsyncpa [#allocation7], 1 }
 0x54e   :  { %4342 = vsyncpa [#allocation7 + $0x1], 1 }
 0x54f   :  { %4343 = vsyncpa [#allocation8], 1 }
 0x550   :  { %4345 = vsyncpa [#allocation8 + $0x1], 1 }
 0x551   :  { %4346 = vsyncpa [#allocation9], 1 }
 0x552   :  { %4348 = vsyncpa [#allocation9 + $0x1], 1 }
 0x553   :  { %4349 = vsyncmov [#allocation5] }
 0x556   :  { %s4350_s18 = vpop.sfrf %4349 }
 0x557   :  { %p4529_p2 = scmp.ne.s32.totalorder %s4350_s18, 0 }
 0x559   :  { %4354 = shalt.err (%p4529_p2)  }
 0x55a   :  { %4356 = vsyncmov [#allocation5 + $0x1] }
 0x55d   :  { %s4357_s27 = vpop.sfrf %4356 }
 0x55e   :  { %p4530_p12 = scmp.ne.s32.totalorder %s4357_s27, 0 }
 0x560   :  { %4361 = shalt.err (%p4530_p12)  }

</bundles_post_ra>
